<compile_context>
chip_gen: v5e
topology: v5e:2x2
jax: 0.10.0
libtpu: 0.0.40
codegen_flags: <defaults>
</compile_context>

<pallas_src>
import jax
import jax.numpy as jnp
from jax.experimental import pallas as pl
from jax.experimental.pallas import tpu as pltpu

EPS = 1e-5
IN_DIM = 50
IN_PAD = 64      # padded K for the first contraction (bf16 sublane friendly)
HID = 512
OUT_DIM = 10
OUT_PAD = 128    # lane-dense padded output width


def _bn_relu(z, g, beta):
    """Training-mode BatchNorm1d + ReLU. f32 math, single pass over batch axis."""
    mu = jnp.mean(z, axis=0, keepdims=True)
    ms = jnp.mean(z * z, axis=0, keepdims=True)
    var = jnp.maximum(ms - mu * mu, 0.0)
    scale = g * jax.lax.rsqrt(var + EPS)
    shift = beta - mu * scale
    return jnp.maximum(z * scale + shift, 0.0)


def mlp_kernel(x_ref,
               w1_ref, b1_ref,
               w2_ref, g2_ref, be2_ref,
               g3_ref, be3_ref,
               g4_ref, be4_ref,
               b5_ref,
               w3_hbm, w4_hbm, w5_hbm,
               o_ref,
               w3_vmem, w4_vmem, w5_vmem, sems):
    # Kick off the big late-layer weight DMAs immediately; they stream while
    # layers 1-2 compute and are waited on only at their point of use.
    cp_w3 = pltpu.make_async_copy(w3_hbm, w3_vmem, sems.at[0])
    cp_w4 = pltpu.make_async_copy(w4_hbm, w4_vmem, sems.at[1])
    cp_w5 = pltpu.make_async_copy(w5_hbm, w5_vmem, sems.at[2])
    cp_w3.start()
    cp_w4.start()
    cp_w5.start()

    # Layer 1: Linear(50->64 padded, 512) + ReLU (bias kept: no BN follows).
    h = jnp.dot(x_ref[...], w1_ref[...],
                preferred_element_type=jnp.float32) + b1_ref[...]
    h = jnp.maximum(h, 0.0).astype(jnp.bfloat16)

    # Layer 2: Linear + BN + ReLU (bias dropped: cancelled by batch-mean).
    z = jnp.dot(h, w2_ref[...], preferred_element_type=jnp.float32)
    h = _bn_relu(z, g2_ref[...], be2_ref[...]).astype(jnp.bfloat16)

    # Layer 3.
    cp_w3.wait()
    z = jnp.dot(h, w3_vmem[...], preferred_element_type=jnp.float32)
    h = _bn_relu(z, g3_ref[...], be3_ref[...]).astype(jnp.bfloat16)

    # Layer 4.
    cp_w4.wait()
    z = jnp.dot(h, w4_vmem[...], preferred_element_type=jnp.float32)
    h = _bn_relu(z, g4_ref[...], be4_ref[...]).astype(jnp.bfloat16)

    # Layer 5: Linear(512, 10) zero-padded to 128 lanes for a dense store.
    cp_w5.wait()
    out = jnp.dot(h, w5_vmem[...],
                  preferred_element_type=jnp.float32) + b5_ref[...]
    o_ref[...] = out.astype(o_ref.dtype)


def prepare_params(params):
    """Convert module-style f32 params into kernel-ready args:
    bf16 weights, w1 K-padded to 64, BN-layer biases dropped, last layer
    lane-padded to 128 columns."""
    (w1, b1, w2, _b2, g2, be2, w3, _b3, g3, be3,
     w4, _b4, g4, be4, w5, b5) = params
    w1p = jnp.zeros((IN_PAD, HID), jnp.bfloat16)
    w1p = w1p.at[:IN_DIM, :].set(w1.astype(jnp.bfloat16))
    w2b = w2.astype(jnp.bfloat16)
    w3b = w3.astype(jnp.bfloat16)
    w4b = w4.astype(jnp.bfloat16)
    w5p = jnp.zeros((HID, OUT_PAD), jnp.bfloat16)
    w5p = w5p.at[:, :OUT_DIM].set(w5.astype(jnp.bfloat16))
    b5p = jnp.zeros((1, OUT_PAD), jnp.float32).at[:, :OUT_DIM].set(b5)
    return (w1p, b1,
            w2b, g2, be2,
            g3, be3,
            g4, be4,
            b5p,
            w3b, w4b, w5p)


@jax.jit
def mlp_v1_forward(x, kernel_params):
    """x: (B, 50) float32. kernel_params: output of prepare_params()."""
    B = x.shape[0]
    # Host-side K pad + bf16 cast (fuses into the jit, keeps layer-1 operands
    # dense and halves the activation DMA).
    xp = jnp.zeros((B, IN_PAD), jnp.bfloat16)
    xp = xp.at[:, :IN_DIM].set(x.astype(jnp.bfloat16))

    (w1p, b1, w2b, g2, be2, g3, be3, g4, be4, b5p, w3b, w4b, w5p) = kernel_params

    vmem = pl.BlockSpec(memory_space=pltpu.MemorySpace.VMEM)
    hbm = pl.BlockSpec(memory_space=pl.ANY)

    out = pl.pallas_call(
        mlp_kernel,
        out_shape=jax.ShapeDtypeStruct((B, OUT_PAD), jnp.float32),
        in_specs=[vmem] * 11 + [hbm] * 3,
        out_specs=vmem,
        scratch_shapes=[
            pltpu.VMEM((HID, HID), jnp.bfloat16),      # w3 landing buffer
            pltpu.VMEM((HID, HID), jnp.bfloat16),      # w4 landing buffer
            pltpu.VMEM((HID, OUT_PAD), jnp.bfloat16),  # w5 landing buffer
            pltpu.SemaphoreType.DMA((3,)),
        ],
    )(xp, w1p, b1, w2b, g2, be2, g3, be3, g4, be4, b5p, w3b, w4b, w5p)
    return out[:, :OUT_DIM]


def init_params(key):
    """Deterministic synthetic parameters (shapes match MLP_V1.__init__)."""
    dims = [(50, 512), (512, 512), (512, 512), (512, 512), (512, 10)]
    keys = jax.random.split(key, len(dims) * 2)
    lin = []
    for i, (fin, fout) in enumerate(dims):
        w = (jax.random.normal(keys[2 * i], (fin, fout), jnp.float32)
             * (1.0 / jnp.sqrt(fin)))
        b = jax.random.normal(keys[2 * i + 1], (1, fout), jnp.float32) * 0.01
        lin.append((w, b))

    def bn_params(n, salt):
        g = 1.0 + 0.01 * jnp.arange(n, dtype=jnp.float32).reshape(1, n) / n
        be = 0.01 * jnp.sin(jnp.arange(n, dtype=jnp.float32) + salt).reshape(1, n)
        return g, be

    g2, be2 = bn_params(512, 0.0)
    g3, be3 = bn_params(512, 1.0)
    g4, be4 = bn_params(512, 2.0)

    (w1, b1), (w2, b2), (w3, b3), (w4, b4), (w5, b5) = lin
    return (w1, b1,
            w2, b2, g2, be2,
            w3, b3, g3, be3,
            w4, b4, g4, be4,
            w5, b5)


# ---------------- references ----------------
_HI = jax.lax.Precision.HIGHEST


def _bn_relu_ref(z, g, be):
    mu = jnp.mean(z, axis=0, keepdims=True)
    var = jnp.mean((z - mu) ** 2, axis=0, keepdims=True)
    return jnp.maximum((z - mu) / jnp.sqrt(var + EPS) * g + be, 0.0)


def mlp_v1_reference_f32(x, params):
    """Pure-f32 reference with full module semantics (biases included)."""
    (w1, b1, w2, b2, w2g, w2b, w3, b3, w3g, w3b,
     w4, b4, w4g, w4b, w5, b5) = params
    h = jnp.maximum(jnp.dot(x, w1, precision=_HI) + b1, 0.0)
    h = _bn_relu_ref(jnp.dot(h, w2, precision=_HI) + b2, w2g, w2b)
    h = _bn_relu_ref(jnp.dot(h, w3, precision=_HI) + b3, w3g, w3b)
    h = _bn_relu_ref(jnp.dot(h, w4, precision=_HI) + b4, w4g, w4b)
    return jnp.dot(h, w5, precision=_HI) + b5


def mlp_v1_reference_bf16(x, params):
    """Reference emulating the kernel's numerics: bf16 matmul operands,
    f32 accumulation and f32 elementwise/BN math."""
    (w1, b1, w2, b2, w2g, w2b, w3, b3, w3g, w3b,
     w4, b4, w4g, w4b, w5, b5) = params

    def q(a):  # round to bf16, compute in f32
        return a.astype(jnp.bfloat16).astype(jnp.float32)

    h = jnp.maximum(jnp.dot(q(x), q(w1), precision=_HI) + b1, 0.0)
    h = _bn_relu_ref(jnp.dot(q(h), q(w2), precision=_HI) + b2, w2g, w2b)
    h = _bn_relu_ref(jnp.dot(q(h), q(w3), precision=_HI) + b3, w3g, w3b)
    h = _bn_relu_ref(jnp.dot(q(h), q(w4), precision=_HI) + b4, w4g, w4b)
    return jnp.dot(q(h), q(w5), precision=_HI) + b5


if __name__ == "__main__":
    key = jax.random.PRNGKey(0)
    kx, kp = jax.random.split(key)

    B = 8
    x = jax.random.normal(kx, (B, IN_DIM), jnp.float32)
    params = init_params(kp)
    kparams = prepare_params(params)

    out = mlp_v1_forward(x, kparams)
    out = jax.block_until_ready(out)
    assert out.shape == (B, OUT_DIM), out.shape

    # Tight check against a reference that emulates the kernel's bf16 MXU path.
    ref_bf16 = mlp_v1_reference_bf16(x, params)
    err_bf16 = float(jnp.max(jnp.abs(out - ref_bf16)))
    assert jnp.allclose(out, ref_bf16, atol=1e-3, rtol=1e-3), \
        f"bf16-emulated ref mismatch, max abs err = {err_bf16}"

    # Loose (bf16-precision) check against the full-f32 module semantics.
    ref_f32 = mlp_v1_reference_f32(x, params)
    err_f32 = float(jnp.max(jnp.abs(out - ref_f32)))
    assert jnp.allclose(out, ref_f32, atol=1e-1, rtol=1e-1), \
        f"f32 ref mismatch, max abs err = {err_f32}"

    print("KERNEL_OK")
</pallas_src>

<mosaic_0001>
module attributes {stable_mosaic.version = 11 : i64} {
  func.func @mlp_kernel(%arg0: memref<8x64xbf16, #tpu.memory_space<vmem>>, %arg1: memref<64x512xbf16, #tpu.memory_space<vmem>>, %arg2: memref<1x512xf32, #tpu.memory_space<vmem>>, %arg3: memref<512x512xbf16, #tpu.memory_space<vmem>>, %arg4: memref<1x512xf32, #tpu.memory_space<vmem>>, %arg5: memref<1x512xf32, #tpu.memory_space<vmem>>, %arg6: memref<1x512xf32, #tpu.memory_space<vmem>>, %arg7: memref<1x512xf32, #tpu.memory_space<vmem>>, %arg8: memref<1x512xf32, #tpu.memory_space<vmem>>, %arg9: memref<1x512xf32, #tpu.memory_space<vmem>>, %arg10: memref<1x128xf32, #tpu.memory_space<vmem>>, %arg11: memref<512x512xbf16, #tpu.memory_space<any>>, %arg12: memref<512x512xbf16, #tpu.memory_space<any>>, %arg13: memref<512x128xbf16, #tpu.memory_space<any>>, %arg14: memref<8x128xf32, #tpu.memory_space<vmem>>, %arg15: memref<512x512xbf16, #tpu.memory_space<vmem>>, %arg16: memref<512x512xbf16, #tpu.memory_space<vmem>>, %arg17: memref<512x128xbf16, #tpu.memory_space<vmem>>, %arg18: memref<3x!tpu.dma_semaphore, #tpu.memory_space<semaphore_mem>>) attributes {dimension_semantics = [], scalar_prefetch = 0 : i64, scratch_operands = 4 : i64, tpu.core_type = #tpu.core_type<tc>} {
    %c0_i32 = arith.constant 0 : i32
    %0 = tpu.memref_slice %arg18[%c0_i32] : memref<3x!tpu.dma_semaphore, #tpu.memory_space<semaphore_mem>> -> memref<1x!tpu.dma_semaphore, #tpu.memory_space<semaphore_mem>>
    %1 = tpu.memref_squeeze %0 : memref<1x!tpu.dma_semaphore, #tpu.memory_space<semaphore_mem>> -> memref<!tpu.dma_semaphore, #tpu.memory_space<semaphore_mem>>
    tpu.enqueue_dma source(%arg11 : memref<512x512xbf16, #tpu.memory_space<any>>) target(%arg15 : memref<512x512xbf16, #tpu.memory_space<vmem>>) target_semaphore(%1 : memref<!tpu.dma_semaphore, #tpu.memory_space<semaphore_mem>>)
    %c1_i32 = arith.constant 1 : i32
    %2 = tpu.memref_slice %arg18[%c1_i32] : memref<3x!tpu.dma_semaphore, #tpu.memory_space<semaphore_mem>> -> memref<1x!tpu.dma_semaphore, #tpu.memory_space<semaphore_mem>>
    %3 = tpu.memref_squeeze %2 : memref<1x!tpu.dma_semaphore, #tpu.memory_space<semaphore_mem>> -> memref<!tpu.dma_semaphore, #tpu.memory_space<semaphore_mem>>
    tpu.enqueue_dma source(%arg12 : memref<512x512xbf16, #tpu.memory_space<any>>) target(%arg16 : memref<512x512xbf16, #tpu.memory_space<vmem>>) target_semaphore(%3 : memref<!tpu.dma_semaphore, #tpu.memory_space<semaphore_mem>>)
    %c2_i32 = arith.constant 2 : i32
    %4 = tpu.memref_slice %arg18[%c2_i32] : memref<3x!tpu.dma_semaphore, #tpu.memory_space<semaphore_mem>> -> memref<1x!tpu.dma_semaphore, #tpu.memory_space<semaphore_mem>>
    %5 = tpu.memref_squeeze %4 : memref<1x!tpu.dma_semaphore, #tpu.memory_space<semaphore_mem>> -> memref<!tpu.dma_semaphore, #tpu.memory_space<semaphore_mem>>
    tpu.enqueue_dma source(%arg13 : memref<512x128xbf16, #tpu.memory_space<any>>) target(%arg17 : memref<512x128xbf16, #tpu.memory_space<vmem>>) target_semaphore(%5 : memref<!tpu.dma_semaphore, #tpu.memory_space<semaphore_mem>>)
    %c0 = arith.constant 0 : index
    %c0_0 = arith.constant 0 : index
    %6 = vector.load %arg0[%c0, %c0_0] : memref<8x64xbf16, #tpu.memory_space<vmem>>, vector<8x64xbf16>
    %c0_1 = arith.constant 0 : index
    %c0_2 = arith.constant 0 : index
    %7 = vector.load %arg1[%c0_1, %c0_2] : memref<64x512xbf16, #tpu.memory_space<vmem>>, vector<64x512xbf16>
    %cst = arith.constant dense<0.000000e+00> : vector<8x512xf32>
    %8 = tpu.matmul %6, %7, %cst {dimension_numbers = #tpu.dot_dimension_numbers<[1], [0], [0], [1], [0, 0, 1, 1], [], []>} : vector<8x64xbf16>, vector<64x512xbf16>, vector<8x512xf32> -> vector<8x512xf32>
    %c0_3 = arith.constant 0 : index
    %c0_4 = arith.constant 0 : index
    %9 = vector.load %arg2[%c0_3, %c0_4] : memref<1x512xf32, #tpu.memory_space<vmem>>, vector<1x512xf32>
    %10 = vector.broadcast %9 : vector<1x512xf32> to vector<8x512xf32>
    %11 = arith.addf %8, %10 : vector<8x512xf32>
    %cst_5 = arith.constant 0.000000e+00 : f32
    %12 = vector.broadcast %cst_5 : f32 to vector<8x512xf32>
    %13 = arith.maximumf %11, %12 : vector<8x512xf32>
    %14 = arith.truncf %13 : vector<8x512xf32> to vector<8x512xbf16>
    %c0_6 = arith.constant 0 : index
    %c0_7 = arith.constant 0 : index
    %15 = vector.load %arg3[%c0_6, %c0_7] : memref<512x512xbf16, #tpu.memory_space<vmem>>, vector<512x512xbf16>
    %cst_8 = arith.constant dense<0.000000e+00> : vector<8x512xf32>
    %16 = tpu.matmul %14, %15, %cst_8 {dimension_numbers = #tpu.dot_dimension_numbers<[1], [0], [0], [1], [0, 0, 1, 1], [], []>} : vector<8x512xbf16>, vector<512x512xbf16>, vector<8x512xf32> -> vector<8x512xf32>
    %c0_9 = arith.constant 0 : index
    %c0_10 = arith.constant 0 : index
    %17 = vector.load %arg4[%c0_9, %c0_10] : memref<1x512xf32, #tpu.memory_space<vmem>>, vector<1x512xf32>
    %c0_11 = arith.constant 0 : index
    %c0_12 = arith.constant 0 : index
    %18 = vector.load %arg5[%c0_11, %c0_12] : memref<1x512xf32, #tpu.memory_space<vmem>>, vector<1x512xf32>
    %cst_13 = arith.constant dense<0.000000e+00> : vector<512xf32>
    %19 = vector.multi_reduction <add>, %16, %cst_13 [0] : vector<8x512xf32> to vector<512xf32>
    %20 = vector.shape_cast %19 : vector<512xf32> to vector<1x512xf32>
    %cst_14 = arith.constant 8.000000e+00 : f32
    %21 = vector.broadcast %cst_14 : f32 to vector<1x512xf32>
    %22 = arith.divf %20, %21 : vector<1x512xf32>
    %23 = arith.mulf %16, %16 : vector<8x512xf32>
    %cst_15 = arith.constant dense<0.000000e+00> : vector<512xf32>
    %24 = vector.multi_reduction <add>, %23, %cst_15 [0] : vector<8x512xf32> to vector<512xf32>
    %25 = vector.shape_cast %24 : vector<512xf32> to vector<1x512xf32>
    %cst_16 = arith.constant 8.000000e+00 : f32
    %26 = vector.broadcast %cst_16 : f32 to vector<1x512xf32>
    %27 = arith.divf %25, %26 : vector<1x512xf32>
    %28 = arith.mulf %22, %22 : vector<1x512xf32>
    %29 = arith.subf %27, %28 : vector<1x512xf32>
    %cst_17 = arith.constant 0.000000e+00 : f32
    %30 = vector.broadcast %cst_17 : f32 to vector<1x512xf32>
    %31 = arith.maximumf %29, %30 : vector<1x512xf32>
    %cst_18 = arith.constant 9.99999974E-6 : f32
    %32 = vector.broadcast %cst_18 : f32 to vector<1x512xf32>
    %33 = arith.addf %31, %32 : vector<1x512xf32>
    %34 = math.rsqrt %33 : vector<1x512xf32>
    %35 = arith.mulf %17, %34 : vector<1x512xf32>
    %36 = arith.mulf %22, %35 : vector<1x512xf32>
    %37 = arith.subf %18, %36 : vector<1x512xf32>
    %38 = vector.broadcast %35 : vector<1x512xf32> to vector<8x512xf32>
    %39 = arith.mulf %16, %38 : vector<8x512xf32>
    %40 = vector.broadcast %37 : vector<1x512xf32> to vector<8x512xf32>
    %41 = arith.addf %39, %40 : vector<8x512xf32>
    %cst_19 = arith.constant 0.000000e+00 : f32
    %42 = vector.broadcast %cst_19 : f32 to vector<8x512xf32>
    %43 = arith.maximumf %41, %42 : vector<8x512xf32>
    %44 = arith.truncf %43 : vector<8x512xf32> to vector<8x512xbf16>
    %c0_i32_20 = arith.constant 0 : i32
    %45 = tpu.memref_slice %arg18[%c0_i32_20] : memref<3x!tpu.dma_semaphore, #tpu.memory_space<semaphore_mem>> -> memref<1x!tpu.dma_semaphore, #tpu.memory_space<semaphore_mem>>
    %46 = tpu.memref_squeeze %45 : memref<1x!tpu.dma_semaphore, #tpu.memory_space<semaphore_mem>> -> memref<!tpu.dma_semaphore, #tpu.memory_space<semaphore_mem>>
    tpu.wait_dma2 semaphore(%46 : memref<!tpu.dma_semaphore, #tpu.memory_space<semaphore_mem>>) src(%arg11 : memref<512x512xbf16, #tpu.memory_space<any>>) dst(%arg15 : memref<512x512xbf16, #tpu.memory_space<vmem>>)
    %c0_21 = arith.constant 0 : index
    %c0_22 = arith.constant 0 : index
    %47 = vector.load %arg15[%c0_21, %c0_22] : memref<512x512xbf16, #tpu.memory_space<vmem>>, vector<512x512xbf16>
    %cst_23 = arith.constant dense<0.000000e+00> : vector<8x512xf32>
    %48 = tpu.matmul %44, %47, %cst_23 {dimension_numbers = #tpu.dot_dimension_numbers<[1], [0], [0], [1], [0, 0, 1, 1], [], []>} : vector<8x512xbf16>, vector<512x512xbf16>, vector<8x512xf32> -> vector<8x512xf32>
    %c0_24 = arith.constant 0 : index
    %c0_25 = arith.constant 0 : index
    %49 = vector.load %arg6[%c0_24, %c0_25] : memref<1x512xf32, #tpu.memory_space<vmem>>, vector<1x512xf32>
    %c0_26 = arith.constant 0 : index
    %c0_27 = arith.constant 0 : index
    %50 = vector.load %arg7[%c0_26, %c0_27] : memref<1x512xf32, #tpu.memory_space<vmem>>, vector<1x512xf32>
    %cst_28 = arith.constant dense<0.000000e+00> : vector<512xf32>
    %51 = vector.multi_reduction <add>, %48, %cst_28 [0] : vector<8x512xf32> to vector<512xf32>
    %52 = vector.shape_cast %51 : vector<512xf32> to vector<1x512xf32>
    %cst_29 = arith.constant 8.000000e+00 : f32
    %53 = vector.broadcast %cst_29 : f32 to vector<1x512xf32>
    %54 = arith.divf %52, %53 : vector<1x512xf32>
    %55 = arith.mulf %48, %48 : vector<8x512xf32>
    %cst_30 = arith.constant dense<0.000000e+00> : vector<512xf32>
    %56 = vector.multi_reduction <add>, %55, %cst_30 [0] : vector<8x512xf32> to vector<512xf32>
    %57 = vector.shape_cast %56 : vector<512xf32> to vector<1x512xf32>
    %cst_31 = arith.constant 8.000000e+00 : f32
    %58 = vector.broadcast %cst_31 : f32 to vector<1x512xf32>
    %59 = arith.divf %57, %58 : vector<1x512xf32>
    %60 = arith.mulf %54, %54 : vector<1x512xf32>
    %61 = arith.subf %59, %60 : vector<1x512xf32>
    %cst_32 = arith.constant 0.000000e+00 : f32
    %62 = vector.broadcast %cst_32 : f32 to vector<1x512xf32>
    %63 = arith.maximumf %61, %62 : vector<1x512xf32>
    %cst_33 = arith.constant 9.99999974E-6 : f32
    %64 = vector.broadcast %cst_33 : f32 to vector<1x512xf32>
    %65 = arith.addf %63, %64 : vector<1x512xf32>
    %66 = math.rsqrt %65 : vector<1x512xf32>
    %67 = arith.mulf %49, %66 : vector<1x512xf32>
    %68 = arith.mulf %54, %67 : vector<1x512xf32>
    %69 = arith.subf %50, %68 : vector<1x512xf32>
    %70 = vector.broadcast %67 : vector<1x512xf32> to vector<8x512xf32>
    %71 = arith.mulf %48, %70 : vector<8x512xf32>
    %72 = vector.broadcast %69 : vector<1x512xf32> to vector<8x512xf32>
    %73 = arith.addf %71, %72 : vector<8x512xf32>
    %cst_34 = arith.constant 0.000000e+00 : f32
    %74 = vector.broadcast %cst_34 : f32 to vector<8x512xf32>
    %75 = arith.maximumf %73, %74 : vector<8x512xf32>
    %76 = arith.truncf %75 : vector<8x512xf32> to vector<8x512xbf16>
    %c1_i32_35 = arith.constant 1 : i32
    %77 = tpu.memref_slice %arg18[%c1_i32_35] : memref<3x!tpu.dma_semaphore, #tpu.memory_space<semaphore_mem>> -> memref<1x!tpu.dma_semaphore, #tpu.memory_space<semaphore_mem>>
    %78 = tpu.memref_squeeze %77 : memref<1x!tpu.dma_semaphore, #tpu.memory_space<semaphore_mem>> -> memref<!tpu.dma_semaphore, #tpu.memory_space<semaphore_mem>>
    tpu.wait_dma2 semaphore(%78 : memref<!tpu.dma_semaphore, #tpu.memory_space<semaphore_mem>>) src(%arg12 : memref<512x512xbf16, #tpu.memory_space<any>>) dst(%arg16 : memref<512x512xbf16, #tpu.memory_space<vmem>>)
    %c0_36 = arith.constant 0 : index
    %c0_37 = arith.constant 0 : index
    %79 = vector.load %arg16[%c0_36, %c0_37] : memref<512x512xbf16, #tpu.memory_space<vmem>>, vector<512x512xbf16>
    %cst_38 = arith.constant dense<0.000000e+00> : vector<8x512xf32>
    %80 = tpu.matmul %76, %79, %cst_38 {dimension_numbers = #tpu.dot_dimension_numbers<[1], [0], [0], [1], [0, 0, 1, 1], [], []>} : vector<8x512xbf16>, vector<512x512xbf16>, vector<8x512xf32> -> vector<8x512xf32>
    %c0_39 = arith.constant 0 : index
    %c0_40 = arith.constant 0 : index
    %81 = vector.load %arg8[%c0_39, %c0_40] : memref<1x512xf32, #tpu.memory_space<vmem>>, vector<1x512xf32>
    %c0_41 = arith.constant 0 : index
    %c0_42 = arith.constant 0 : index
    %82 = vector.load %arg9[%c0_41, %c0_42] : memref<1x512xf32, #tpu.memory_space<vmem>>, vector<1x512xf32>
    %cst_43 = arith.constant dense<0.000000e+00> : vector<512xf32>
    %83 = vector.multi_reduction <add>, %80, %cst_43 [0] : vector<8x512xf32> to vector<512xf32>
    %84 = vector.shape_cast %83 : vector<512xf32> to vector<1x512xf32>
    %cst_44 = arith.constant 8.000000e+00 : f32
    %85 = vector.broadcast %cst_44 : f32 to vector<1x512xf32>
    %86 = arith.divf %84, %85 : vector<1x512xf32>
    %87 = arith.mulf %80, %80 : vector<8x512xf32>
    %cst_45 = arith.constant dense<0.000000e+00> : vector<512xf32>
    %88 = vector.multi_reduction <add>, %87, %cst_45 [0] : vector<8x512xf32> to vector<512xf32>
    %89 = vector.shape_cast %88 : vector<512xf32> to vector<1x512xf32>
    %cst_46 = arith.constant 8.000000e+00 : f32
    %90 = vector.broadcast %cst_46 : f32 to vector<1x512xf32>
    %91 = arith.divf %89, %90 : vector<1x512xf32>
    %92 = arith.mulf %86, %86 : vector<1x512xf32>
    %93 = arith.subf %91, %92 : vector<1x512xf32>
    %cst_47 = arith.constant 0.000000e+00 : f32
    %94 = vector.broadcast %cst_47 : f32 to vector<1x512xf32>
    %95 = arith.maximumf %93, %94 : vector<1x512xf32>
    %cst_48 = arith.constant 9.99999974E-6 : f32
    %96 = vector.broadcast %cst_48 : f32 to vector<1x512xf32>
    %97 = arith.addf %95, %96 : vector<1x512xf32>
    %98 = math.rsqrt %97 : vector<1x512xf32>
    %99 = arith.mulf %81, %98 : vector<1x512xf32>
    %100 = arith.mulf %86, %99 : vector<1x512xf32>
    %101 = arith.subf %82, %100 : vector<1x512xf32>
    %102 = vector.broadcast %99 : vector<1x512xf32> to vector<8x512xf32>
    %103 = arith.mulf %80, %102 : vector<8x512xf32>
    %104 = vector.broadcast %101 : vector<1x512xf32> to vector<8x512xf32>
    %105 = arith.addf %103, %104 : vector<8x512xf32>
    %cst_49 = arith.constant 0.000000e+00 : f32
    %106 = vector.broadcast %cst_49 : f32 to vector<8x512xf32>
    %107 = arith.maximumf %105, %106 : vector<8x512xf32>
    %108 = arith.truncf %107 : vector<8x512xf32> to vector<8x512xbf16>
    %c2_i32_50 = arith.constant 2 : i32
    %109 = tpu.memref_slice %arg18[%c2_i32_50] : memref<3x!tpu.dma_semaphore, #tpu.memory_space<semaphore_mem>> -> memref<1x!tpu.dma_semaphore, #tpu.memory_space<semaphore_mem>>
    %110 = tpu.memref_squeeze %109 : memref<1x!tpu.dma_semaphore, #tpu.memory_space<semaphore_mem>> -> memref<!tpu.dma_semaphore, #tpu.memory_space<semaphore_mem>>
    tpu.wait_dma2 semaphore(%110 : memref<!tpu.dma_semaphore, #tpu.memory_space<semaphore_mem>>) src(%arg13 : memref<512x128xbf16, #tpu.memory_space<any>>) dst(%arg17 : memref<512x128xbf16, #tpu.memory_space<vmem>>)
    %c0_51 = arith.constant 0 : index
    %c0_52 = arith.constant 0 : index
    %111 = vector.load %arg17[%c0_51, %c0_52] : memref<512x128xbf16, #tpu.memory_space<vmem>>, vector<512x128xbf16>
    %cst_53 = arith.constant dense<0.000000e+00> : vector<8x128xf32>
    %112 = tpu.matmul %108, %111, %cst_53 {dimension_numbers = #tpu.dot_dimension_numbers<[1], [0], [0], [1], [0, 0, 1, 1], [], []>} : vector<8x512xbf16>, vector<512x128xbf16>, vector<8x128xf32> -> vector<8x128xf32>
    %c0_54 = arith.constant 0 : index
    %c0_55 = arith.constant 0 : index
    %113 = vector.load %arg10[%c0_54, %c0_55] : memref<1x128xf32, #tpu.memory_space<vmem>>, vector<1x128xf32>
    %114 = vector.broadcast %113 : vector<1x128xf32> to vector<8x128xf32>
    %115 = arith.addf %112, %114 : vector<8x128xf32>
    %c0_56 = arith.constant 0 : index
    %c0_57 = arith.constant 0 : index
    %116 = vector.load %arg14[%c0_56, %c0_57] : memref<8x128xf32, #tpu.memory_space<vmem>>, vector<8x128xf32>
    tpu.vector_store %arg14[%c0_56, %c0_57], %115 {strides = array<i32>} : memref<8x128xf32, #tpu.memory_space<vmem>>, vector<8x128xf32>,
    return
  }
}

</mosaic_0001>

<bundles_post_ra>
// kernel: mlp_v1_forward.1
= control target key start
LH: loop header
LB: loop body
LE: loop exit
PB: predicated region body
PF: predicated region fallthrough
CT: control target
= control target key end

     0   :  { %19 = vsyncpa [#allocation7], 0  ;;  %s6891_s0 = inlined_call_operand.vmem [shape: bf16[8,64], index: 0, kind: input, shape index: {}]   ;;  %s6892_s1 = inlined_call_operand.hbm [shape: bf16[64,512], index: 1, kind: input, shape index: {}]   ;;  %s6893_s2 = inlined_call_operand.vmem [shape: f32[1,512], index: 2, kind: input, shape index: {}]   ;;  %s6894_s3 = inlined_call_operand.hbm [shape: bf16[512,512], index: 3, kind: input, shape index: {}]   ;;  %s6895_s4 = inlined_call_operand.vmem [shape: f32[1,512], index: 4, kind: input, shape index: {}]   ;;  %s6896_s5 = inlined_call_operand.vmem [shape: f32[1,512], index: 5, kind: input, shape index: {}]   ;;  %s6897_s6 = inlined_call_operand.vmem [shape: f32[1,512], index: 6, kind: input, shape index: {}]   ;;  %s6898_s7 = inlined_call_operand.vmem [shape: f32[1,512], index: 7, kind: input, shape index: {}]   ;;  %s6899_s8 = inlined_call_operand.vmem [shape: f32[1,512], index: 8, kind: input, shape index: {}]   ;;  %s6900_s9 = inlined_call_operand.vmem [shape: f32[1,512], index: 9, kind: input, shape index: {}]   ;;  %s6901_s10 = inlined_call_operand.vmem [shape: f32[1,128], index: 10, kind: input, shape index: {}]   ;;  %s6902_s11 = inlined_call_operand.hbm [shape: bf16[512,512], index: 11, kind: input, shape index: {}]   ;;  %s6903_s12 = inlined_call_operand.hbm [shape: bf16[512,512], index: 12, kind: input, shape index: {}]   ;;  %s6904_s13 = inlined_call_operand.hbm [shape: bf16[512,128], index: 13, kind: input, shape index: {}]   ;;  %s6905_s14 = inlined_call_operand.hbm [shape: f32[8,128], index: 14, kind: output, shape index: {}]  }
   0x1   :  { %20 = vsyncpa [#allocation10], 0 }
   0x2   :  { %21 = vsyncpa [#allocation8], 0  ;;  %s28_s15 = sshll.u32 %s6892_s1, 4  ;;  %s6484_s16 = smov [#allocation6]   ;;  %s29_s15 = int_to_ptr.hbm [resolvable:$true] %s28_s15 }
   0x3   :  { %s30_s17 = sshll.u32 %s6484_s16, 4  ;;  %s43_s20 = sshll.u32 %s6894_s3, 4  ;;  %s31_s17 = int_to_ptr.vmem [resolvable:$true] %s30_s17  ;;  %s44_s20 = int_to_ptr.hbm [resolvable:$true] %s43_s20 }
   0x4   :  { %s6485_s21 = smov 256   ;;  %s6486_s22 = smov 16  }
   0x5   :  { %36 = dma.hbm_to_vmem [thread:$0]  %s29_s15, 2048, %s31_s17, [#allocation7], %s6485_s21, %s6485_s21, %s6486_s22  }
   0x6   :  { %s6487_s23 = smov [#allocation9]  }
   0x7   :  { %s45_s24 = sshll.u32 %s6487_s23, 4  ;;  %s46_s24 = int_to_ptr.vmem [resolvable:$true] %s45_s24 }
   0x8   :  { %51 = dma.hbm_to_vmem [thread:$0]  %s44_s20, 16384, %s46_s24, [#allocation10], %s6485_s21, %s6485_s21, %s6486_s22  }
   0x9   :  { %6472 = dma.done.wait [#allocation7], 2048  }
   0xa   :  { %6473 = vsyncadd [#allocation7], 4294965248 }
   0xb   :  { %6474 = dma.done.wait [#allocation10], 16384  }
   0xc   :  { %6475 = vsyncadd [#allocation10], 4294950912  ;;  %v4175_v0 = vld [vmem:[#allocation6 + $0x60] sm:$0xf]  ;;  %v5874_v1 = vld [vmem:[#allocation6 + $0x6c] sm:$0xf0] }
   0xd   :  { %v5872_v2 = vld [vmem:[#allocation6 + $0x64] sm:$0xf]  ;;  %v4176_v3 = vor.u32 %v5874_v1, %v4175_v0  ;;  %v4177_v4 = vld [vmem:[#allocation6 + $0x70] sm:$0xf0]  ;;  %v4183_v5 = vld [vmem:[#allocation6 + $0x68] sm:$0xf] }
   0xe   :  { %v5875_v6 = vld [vmem:[#allocation6 + $0x74] sm:$0xf0]  ;;  %v4180_v7 = vor.u32 %v5872_v2, %v4177_v4  ;;  %v5873_v9 = vld [vmem:[#allocation6 + $0x6c] sm:$0xf]  ;;  %v4185_v10 = vld [vmem:[#allocation6 + $0x78] sm:$0xf0] }
   0xf   :  { %v4184_v8 = vor.u32 %v5875_v6, %v4183_v5  ;;  %v4159_v11 = vld [vmem:[#allocation6 + $0x40] sm:$0xf]  ;;  %231 = vmatpush.bf16.msra.mxu0 %v4176_v3  ;;  %v4188_v12 = vor.u32 %v5873_v9, %v4185_v10  ;;  %v5870_v13 = vld [vmem:[#allocation6 + $0x4c] sm:$0xf0]  ;;  %v5868_v14 = vld [vmem:[#allocation6 + $0x44] sm:$0xf] }
  0x10   :  { %v4161_v15 = vld [vmem:[#allocation6 + $0x50] sm:$0xf0]  ;;  %244 = vmatpush.bf16.msra.mxu1 %v4180_v7  ;;  %v4160_v16 = vor.u32 %v5870_v13, %v4159_v11  ;;  %v4167_v18 = vld [vmem:[#allocation6 + $0x48] sm:$0xf]  ;;  %v5871_v19 = vld [vmem:[#allocation6 + $0x54] sm:$0xf0] }
  0x11   :  { %257 = vmatpush.bf16.msra.mxu2 %v4184_v8  ;;  %v4164_v17 = vor.u32 %v5868_v14, %v4161_v15  ;;  %v5869_v20 = vld [vmem:[#allocation6 + $0x4c] sm:$0xf]  ;;  %270 = vmatpush.bf16.msra.mxu3 %v4188_v12  ;;  %v4168_v21 = vor.u32 %v5871_v19, %v4167_v18  ;;  %v4169_v22 = vld [vmem:[#allocation6 + $0x58] sm:$0xf0]  ;;  %v4143_v23 = vld [vmem:[#allocation6 + $0x20] sm:$0xf] }
  0x12   :  { %v5866_v24 = vld [vmem:[#allocation6 + $0x2c] sm:$0xf0]  ;;  %v4172_v25 = vor.u32 %v5869_v20, %v4169_v22  ;;  %v5864_v26 = vld [vmem:[#allocation6 + $0x24] sm:$0xf]  ;;  %v4145_v27 = vld [vmem:[#allocation6 + $0x30] sm:$0xf0] }
  0x13   :  { %v4151_v28 = vld [vmem:[#allocation6 + $0x28] sm:$0xf]  ;;  %232 = vmatpush.bf16.msra.mxu0 %v4160_v16  ;;  %v4144_v29 = vor.u32 %v5866_v24, %v4143_v23  ;;  %v5867_v30 = vld [vmem:[#allocation6 + $0x34] sm:$0xf0]  ;;  %v5865_v31 = vld [vmem:[#allocation6 + $0x2c] sm:$0xf]  ;;  %v4148_v33 = vor.u32 %v5864_v26, %v4145_v27 }
  0x14   :  { %v4153_v32 = vld [vmem:[#allocation6 + $0x38] sm:$0xf0]  ;;  %245 = vmatpush.bf16.msra.mxu1 %v4164_v17  ;;  %v4152_v34 = vor.u32 %v5867_v30, %v4151_v28  ;;  %v4127_v35 = vld [vmem:[#allocation6] sm:$0xf]  ;;  %v5862_v36 = vld [vmem:[#allocation6 + $0xc] sm:$0xf0] }
  0x15   :  { %258 = vmatpush.bf16.msra.mxu2 %v4168_v21  ;;  %v5860_v37 = vld [vmem:[#allocation6 + $0x4] sm:$0xf]  ;;  %271 = vmatpush.bf16.msra.mxu3 %v4172_v25  ;;  %v4156_v38 = vor.u32 %v5865_v31, %v4153_v32  ;;  %v4129_v39 = vld [vmem:[#allocation6 + $0x10] sm:$0xf0]  ;;  %v4135_v40 = vld [vmem:[#allocation6 + $0x8] sm:$0xf]  ;;  %v4128_v44 = vor.u32 %v5862_v36, %v4127_v35 }
  0x16   :  { %v5863_v41 = vld [vmem:[#allocation6 + $0x14] sm:$0xf0]  ;;  %v5861_v42 = vld [vmem:[#allocation6 + $0xc] sm:$0xf]  ;;  %v4137_v43 = vld [vmem:[#allocation6 + $0x18] sm:$0xf0]  ;;  %v4132_v48 = vor.u32 %v5860_v37, %v4129_v39 }
  0x17   :  { %233 = vmatpush.bf16.msra.mxu0 %v4144_v29  ;;  %v4307_v45 = vld [vmem:[#allocation9 + $0xe0] sm:$0xf]  ;;  %v5906_v46 = vld [vmem:[#allocation9 + $0xec] sm:$0xf0]  ;;  %v4136_v49 = vor.u32 %v5863_v41, %v4135_v40  ;;  %vm223_vm0 = vcmask 523264   ;;  %v4140_v51 = vor.u32 %v5861_v42, %v4137_v43  ;;  %s82_s27 = sshll.u32 %s6902_s11, 4  ;;  %s83_s27 = int_to_ptr.hbm [resolvable:$true] %s82_s27 }
  0x18   :  { %v4435_v47 = vld [vmem:[#allocation9 + $0x1e0] sm:$0xf]  ;;  %246 = vmatpush.bf16.msra.mxu1 %v4148_v33  ;;  %v5938_v50 = vld [vmem:[#allocation9 + $0x1ec] sm:$0xf0]  ;;  %v4308_v52 = vor.u32 %v5906_v46, %v4307_v45  ;;  %s6488_s28 = smov [#allocation2]   ;;  %s96_s16 = sshll.u32 %s6903_s12, 4  ;;  %s97_s16 = int_to_ptr.hbm [resolvable:$true] %s96_s16 }
  0x19   :  { %259 = vmatpush.bf16.msra.mxu2 %v4152_v34  ;;  %272 = vmatpush.bf16.msra.mxu3 %v4156_v38  ;;  %v4291_v53 = vld [vmem:[#allocation9 + $0xc0] sm:$0xf]  ;;  %v5902_v54 = vld [vmem:[#allocation9 + $0xcc] sm:$0xf0]  ;;  %v4436_v56 = vor.u32 %v5938_v50, %v4435_v47  ;;  %s84_s29 = sshll.u32 %s6488_s28, 4  ;;  %s6489_s17 = smov [#allocation3]   ;;  %s85_s29 = int_to_ptr.vmem [resolvable:$true] %s84_s29 }
  0x1a   :  { %v4563_v55 = vld [vmem:[#allocation9 + $0x2e0] sm:$0xf]  ;;  %v5970_v57 = vld [vmem:[#allocation9 + $0x2ec] sm:$0xf0]  ;;  %v4292_v0 = vor.u32 %v5902_v54, %v4291_v53  ;;  %87 = dma.hbm_to_vmem [thread:$0]  %s83_s27, 16384, %s85_s29, [#allocation5] }
  0x1b   :  { %v4691_v58 = vld [vmem:[#allocation9 + $0x3e0] sm:$0xf]  ;;  %v6002_v59 = vld [vmem:[#allocation9 + $0x3ec] sm:$0xf0]  ;;  %234 = vmatpush.bf16.msra.mxu0 %v4128_v44  ;;  %v4564_v63 = vor.u32 %v5970_v57, %v4563_v55  ;;  %s98_s18 = sshll.u32 %s6489_s17, 4  ;;  %s110_s11 = sshll.u32 %s6904_s13, 4  ;;  %s99_s18 = int_to_ptr.vmem [resolvable:$true] %s98_s18  ;;  %s111_s11 = int_to_ptr.hbm [resolvable:$true] %s110_s11 }
  0x1c   :  { %v116_v60 = vld [vmem:[%s6891_s0] sm:$0xf]  ;;  %v5934_v62 = vld [vmem:[#allocation9 + $0x1cc] sm:$0xf0]  ;;  %247 = vmatpush.bf16.msra.mxu1 %v4132_v48  ;;  %v4692_v1 = vor.u32 %v6002_v59, %v4691_v58  ;;  %101 = dma.hbm_to_vmem [thread:$0]  %s97_s16, 16384, %s99_s18, [#allocation5 + $0x1] }
  0x1d   :  { %v4419_v61 = vld [vmem:[#allocation9 + $0x1c0] sm:$0xf]  ;;  %260 = vmatpush.bf16.msra.mxu2 %v4136_v49  ;;  %273 = vmatpush.bf16.msra.mxu3 %v4140_v51  ;;  %v5966_v4 = vld [vmem:[#allocation9 + $0x2cc] sm:$0xf0]  ;;  %s6490_s21 = smov [#allocation4]   ;;  %vm1395_vm13 = vcmask 1040384  }
  0x1e   :  { %v4275_v2 = vld [vmem:[#allocation9 + $0xa0] sm:$0xf]  ;;  %4189 = vmatmul.msk.bf16.vlgmr.msra.gmra.mxu0 %vm223_vm0, %v116_v60  ;;  %v4420_v5 = vor.u32 %v5934_v62, %v4419_v61  ;;  %v5898_v6 = vld [vmem:[#allocation9 + $0xac] sm:$0xf0]  ;;  %s112_s22 = sshll.u32 %s6490_s21, 4  ;;  %vm1397_vm14 = vcmask 1042434   ;;  %s113_s22 = int_to_ptr.vmem [resolvable:$true] %s112_s22 }
  0x1f   :  { %1055 = vmatpush.bf16.msrb.mxu0 %v4308_v52  ;;  %v4547_v3 = vld [vmem:[#allocation9 + $0x2c0] sm:$0xf]  ;;  %v5998_v8 = vld [vmem:[#allocation9 + $0x3cc] sm:$0xf0]  ;;  %4190 = vmatmul.msk.bf16.vlgmr.msra.gmra.mxu1 %vm223_vm0, %v116_v60  ;;  %v4276_v12 = vor.u32 %v5898_v6, %v4275_v2  ;;  %115 = dma.hbm_to_vmem [thread:$0]  %s111_s11, 4096, %s113_s22, [#allocation5 + $0x2] }
  0x20   :  { %1068 = vmatpush.bf16.msrb.mxu1 %v4436_v56  ;;  %v4675_v7 = vld [vmem:[#allocation9 + $0x3c0] sm:$0xf]  ;;  %4191 = vmatmul.msk.bf16.vlgmr.msra.gmra.mxu2 %vm223_vm0, %v116_v60  ;;  %v5930_v10 = vld [vmem:[#allocation9 + $0x1ac] sm:$0xf0]  ;;  %v4548_v11 = vor.u32 %v5966_v4, %v4547_v3 }
  0x21   :  { %v4403_v9 = vld [vmem:[#allocation9 + $0x1a0] sm:$0xf]  ;;  %4192 = vmatmul.msk.bf16.vlgmr.msra.gmra.mxu3 %vm223_vm0, %v116_v60  ;;  %1081 = vmatpush.bf16.msrb.mxu2 %v4564_v63  ;;  %v4676_v13 = vor.u32 %v5998_v8, %v4675_v7  ;;  %v5962_v16 = vld [vmem:[#allocation9 + $0x2ac] sm:$0xf0]  ;;  %v5904_v7 = vld [vmem:[#allocation9 + $0xe4] sm:$0xf] }
  0x22   :  { %1094 = vmatpush.bf16.msrb.mxu3 %v4692_v1  ;;  %v4259_v14 = vld [vmem:[#allocation9 + $0x80] sm:$0xf]  ;;  %v4404_v17 = vor.u32 %v5930_v10, %v4403_v9  ;;  %v5894_v18 = vld [vmem:[#allocation9 + $0x8c] sm:$0xf0]  ;;  %v4309_v8 = vld [vmem:[#allocation9 + $0xf0] sm:$0xf0] }
  0x23   :  { %1056 = vmatpush.bf16.msrb.mxu0 %v4292_v0  ;;  %v4531_v15 = vld [vmem:[#allocation9 + $0x2a0] sm:$0xf]  ;;  %v5994_v20 = vld [vmem:[#allocation9 + $0x3ac] sm:$0xf0]  ;;  %v4260_v24 = vor.u32 %v5894_v18, %v4259_v14  ;;  %v5936_v9 = vld [vmem:[#allocation9 + $0x1e4] sm:$0xf] }
  0x24   :  { %1069 = vmatpush.bf16.msrb.mxu1 %v4420_v5  ;;  %v4659_v19 = vld [vmem:[#allocation9 + $0x3a0] sm:$0xf]  ;;  %v5926_v22 = vld [vmem:[#allocation9 + $0x18c] sm:$0xf0]  ;;  %v4532_v23 = vor.u32 %v5962_v16, %v4531_v15  ;;  %v4437_v10 = vld [vmem:[#allocation9 + $0x1f0] sm:$0xf0] }
  0x25   :  { %v4387_v21 = vld [vmem:[#allocation9 + $0x180] sm:$0xf]  ;;  %1082 = vmatpush.bf16.msrb.mxu2 %v4548_v11  ;;  %v4660_v25 = vor.u32 %v5994_v20, %v4659_v19  ;;  %v5958_v28 = vld [vmem:[#allocation9 + $0x28c] sm:$0xf0]  ;;  %v5900_v14 = vld [vmem:[#allocation9 + $0xc4] sm:$0xf]  ;;  %v4312_v19 = vor.u32 %v5904_v7, %v4309_v8 }
  0x26   :  { %1095 = vmatpush.bf16.msrb.mxu3 %v4676_v13  ;;  %v4243_v26 = vld [vmem:[#allocation9 + $0x60] sm:$0xf]  ;;  %v4388_v29 = vor.u32 %v5926_v22, %v4387_v21  ;;  %v5890_v30 = vld [vmem:[#allocation9 + $0x6c] sm:$0xf0]  ;;  %v5968_v21 = vld [vmem:[#allocation9 + $0x2e4] sm:$0xf] }
  0x27   :  { %1057 = vmatpush.bf16.msrb.mxu0 %v4276_v12  ;;  %v4515_v27 = vld [vmem:[#allocation9 + $0x280] sm:$0xf]  ;;  %v5990_v32 = vld [vmem:[#allocation9 + $0x38c] sm:$0xf0]  ;;  %v4244_v36 = vor.u32 %v5890_v30, %v4243_v26  ;;  %v4565_v22 = vld [vmem:[#allocation9 + $0x2f0] sm:$0xf0] }
  0x28   :  { %1070 = vmatpush.bf16.msrb.mxu1 %v4404_v17  ;;  %v4643_v31 = vld [vmem:[#allocation9 + $0x380] sm:$0xf]  ;;  %v5922_v34 = vld [vmem:[#allocation9 + $0x16c] sm:$0xf0]  ;;  %v4516_v35 = vor.u32 %v5958_v28, %v4515_v27  ;;  %v4693_v26 = vld [vmem:[#allocation9 + $0x3f0] sm:$0xf0] }
  0x29   :  { %v4371_v33 = vld [vmem:[#allocation9 + $0x160] sm:$0xf]  ;;  %1083 = vmatpush.bf16.msrb.mxu2 %v4532_v23  ;;  %v4644_v37 = vor.u32 %v5990_v32, %v4643_v31  ;;  %v5954_v40 = vld [vmem:[#allocation9 + $0x26c] sm:$0xf0]  ;;  %v4440_v23 = vor.u32 %v5936_v9, %v4437_v10  ;;  %v5932_v27 = vld [vmem:[#allocation9 + $0x1c4] sm:$0xf]  ;;  %v4568_v31 = vor.u32 %v5968_v21, %v4565_v22 }
  0x2a   :  { %1096 = vmatpush.bf16.msrb.mxu3 %v4660_v25  ;;  %v4227_v38 = vld [vmem:[#allocation9 + $0x40] sm:$0xf]  ;;  %v4372_v41 = vor.u32 %v5922_v34, %v4371_v33  ;;  %v5886_v42 = vld [vmem:[#allocation9 + $0x4c] sm:$0xf0]  ;;  %v6000_v25 = vld [vmem:[#allocation9 + $0x3e4] sm:$0xf] }
  0x2b   :  { %1058 = vmatpush.bf16.msrb.mxu0 %v4260_v24  ;;  %v4499_v39 = vld [vmem:[#allocation9 + $0x260] sm:$0xf]  ;;  %v5986_v44 = vld [vmem:[#allocation9 + $0x36c] sm:$0xf0]  ;;  %v4228_v48 = vor.u32 %v5886_v42, %v4227_v38  ;;  %v4293_v24 = vld [vmem:[#allocation9 + $0xd0] sm:$0xf0]  ;;  %v4696_v33 = vor.u32 %v6000_v25, %v4693_v26 }
  0x2c   :  { %1071 = vmatpush.bf16.msrb.mxu1 %v4388_v29  ;;  %v4627_v43 = vld [vmem:[#allocation9 + $0x360] sm:$0xf]  ;;  %v5918_v46 = vld [vmem:[#allocation9 + $0x14c] sm:$0xf0]  ;;  %v4500_v47 = vor.u32 %v5954_v40, %v4499_v39  ;;  %v4421_v28 = vld [vmem:[#allocation9 + $0x1d0] sm:$0xf0]  ;;  %v4296_v32 = vor.u32 %v5900_v14, %v4293_v24 }
  0x2d   :  { %v4355_v45 = vld [vmem:[#allocation9 + $0x140] sm:$0xf]  ;;  %1084 = vmatpush.bf16.msrb.mxu2 %v4516_v35  ;;  %v4628_v49 = vor.u32 %v5986_v44, %v4627_v43  ;;  %v5950_v52 = vld [vmem:[#allocation9 + $0x24c] sm:$0xf0]  ;;  %v5896_v34 = vld [vmem:[#allocation9 + $0xa4] sm:$0xf] }
  0x2e   :  { %1097 = vmatpush.bf16.msrb.mxu3 %v4644_v37  ;;  %v4211_v50 = vld [vmem:[#allocation9 + $0x20] sm:$0xf]  ;;  %v4356_v53 = vor.u32 %v5918_v46, %v4355_v45  ;;  %v5882_v54 = vld [vmem:[#allocation9 + $0x2c] sm:$0xf0]  ;;  %v5964_v35 = vld [vmem:[#allocation9 + $0x2c4] sm:$0xf]  ;;  %v4424_v37 = vor.u32 %v5932_v27, %v4421_v28 }
  0x2f   :  { %1059 = vmatpush.bf16.msrb.mxu0 %v4244_v36  ;;  %v4483_v51 = vld [vmem:[#allocation9 + $0x240] sm:$0xf]  ;;  %v5982_v56 = vld [vmem:[#allocation9 + $0x34c] sm:$0xf0]  ;;  %v4212_v61 = vor.u32 %v5882_v54, %v4211_v50  ;;  %v4549_v36 = vld [vmem:[#allocation9 + $0x2d0] sm:$0xf0] }
  0x30   :  { %1072 = vmatpush.bf16.msrb.mxu1 %v4372_v41  ;;  %v4611_v55 = vld [vmem:[#allocation9 + $0x340] sm:$0xf]  ;;  %v5914_v58 = vld [vmem:[#allocation9 + $0x12c] sm:$0xf0]  ;;  %v4484_v59 = vor.u32 %v5950_v52, %v4483_v51  ;;  %v4277_v38 = vld [vmem:[#allocation9 + $0xb0] sm:$0xf0]  ;;  %v4552_v43 = vor.u32 %v5964_v35, %v4549_v36 }
  0x31   :  { %v4339_v57 = vld [vmem:[#allocation9 + $0x120] sm:$0xf]  ;;  %1085 = vmatpush.bf16.msrb.mxu2 %v4500_v47  ;;  %v4612_v62 = vor.u32 %v5982_v56, %v4611_v55  ;;  %v5878_v63 = vld [vmem:[#allocation9 + $0xc] sm:$0xf0]  ;;  %v5996_v39 = vld [vmem:[#allocation9 + $0x3c4] sm:$0xf]  ;;  %v4280_v44 = vor.u32 %v5896_v34, %v4277_v38 }
  0x32   :  { %v4195_v60 = vld [vmem:[#allocation9] sm:$0xf]  ;;  %1098 = vmatpush.bf16.msrb.mxu3 %v4628_v49  ;;  %v5946_v1 = vld [vmem:[#allocation9 + $0x22c] sm:$0xf0]  ;;  %v4340_v2 = vor.u32 %v5914_v58, %v4339_v57  ;;  %v4677_v40 = vld [vmem:[#allocation9 + $0x3d0] sm:$0xf0] }
  0x33   :  { %1060 = vmatpush.bf16.msrb.mxu0 %v4228_v48  ;;  %v4467_v0 = vld [vmem:[#allocation9 + $0x220] sm:$0xf]  ;;  %v5978_v5 = vld [vmem:[#allocation9 + $0x32c] sm:$0xf0]  ;;  %v4196_v12 = vor.u32 %v5878_v63, %v4195_v60  ;;  %v5928_v41 = vld [vmem:[#allocation9 + $0x1a4] sm:$0xf]  ;;  %v4680_v45 = vor.u32 %v5996_v39, %v4677_v40 }
  0x34   :  { %1073 = vmatpush.bf16.msrb.mxu1 %v4356_v53  ;;  %v4323_v3 = vld [vmem:[#allocation9 + $0x100] sm:$0xf]  ;;  %v5910_v6 = vld [vmem:[#allocation9 + $0x10c] sm:$0xf0]  ;;  %v4468_v11 = vor.u32 %v5946_v1, %v4467_v0  ;;  %v4405_v42 = vld [vmem:[#allocation9 + $0x1b0] sm:$0xf0] }
  0x35   :  { %v4595_v4 = vld [vmem:[#allocation9 + $0x320] sm:$0xf]  ;;  %1086 = vmatpush.bf16.msrb.mxu2 %v4484_v59  ;;  %v5942_v16 = vld [vmem:[#allocation9 + $0x20c] sm:$0xf0]  ;;  %v4324_v18 = vor.u32 %v5910_v6, %v4323_v3  ;;  %v5892_v46 = vld [vmem:[#allocation9 + $0x84] sm:$0xf]  ;;  %v4408_v49 = vor.u32 %v5928_v41, %v4405_v42 }
  0x36   :  { %1099 = vmatpush.bf16.msrb.mxu3 %v4612_v62  ;;  %v4596_v13 = vor.u32 %v5978_v5, %v4595_v4  ;;  %v4451_v15 = vld [vmem:[#allocation9 + $0x200] sm:$0xf]  ;;  %v5974_v20 = vld [vmem:[#allocation9 + $0x30c] sm:$0xf0]  ;;  %v5960_v47 = vld [vmem:[#allocation9 + $0x2a4] sm:$0xf] }
  0x37   :  { %1061 = vmatpush.bf16.msrb.mxu0 %v4212_v61  ;;  %v4579_v17 = vld [vmem:[#allocation9 + $0x300] sm:$0xf]  ;;  %v4452_v29 = vor.u32 %v5942_v16, %v4451_v15  ;;  %v4533_v48 = vld [vmem:[#allocation9 + $0x2b0] sm:$0xf0]  ;;  %v5992_v51 = vld [vmem:[#allocation9 + $0x3a4] sm:$0xf] }
  0x38   :  { %1074 = vmatpush.bf16.msrb.mxu1 %v4340_v2  ;;  %v4580_v30 = vor.u32 %v5974_v20, %v4579_v17  ;;  %v4261_v50 = vld [vmem:[#allocation9 + $0x90] sm:$0xf0]  ;;  %v5924_v53 = vld [vmem:[#allocation9 + $0x184] sm:$0xf]  ;;  %v4536_v55 = vor.u32 %v5960_v47, %v4533_v48  ;;  %vm1399_vm0 = vcmask 1041408  }
  0x39   :  { %1087 = vmatpush.bf16.msrb.mxu2 %v4468_v11  ;;  %v4661_v52 = vld [vmem:[#allocation9 + $0x3b0] sm:$0xf0]  ;;  %v4264_v56 = vor.u32 %v5892_v46, %v4261_v50  ;;  %v5888_v58 = vld [vmem:[#allocation9 + $0x64] sm:$0xf] }
  0x3a   :  { %1100 = vmatpush.bf16.msrb.mxu3 %v4596_v13  ;;  %v4389_v54 = vld [vmem:[#allocation9 + $0x190] sm:$0xf0]  ;;  %v4664_v57 = vor.u32 %v5992_v51, %v4661_v52  ;;  %v5956_v59 = vld [vmem:[#allocation9 + $0x284] sm:$0xf] }
  0x3b   :  { %1062 = vmatpush.bf16.msrb.mxu0 %v4196_v12  ;;  %v4517_v60 = vld [vmem:[#allocation9 + $0x290] sm:$0xf0]  ;;  %v4392_v61 = vor.u32 %v5924_v53, %v4389_v54  ;;  %v5988_v63 = vld [vmem:[#allocation9 + $0x384] sm:$0xf] }
  0x3c   :  { %1075 = vmatpush.bf16.msrb.mxu1 %v4324_v18  ;;  %v4245_v62 = vld [vmem:[#allocation9 + $0x70] sm:$0xf0]  ;;  %v5920_v1 = vld [vmem:[#allocation9 + $0x164] sm:$0xf]  ;;  %v4520_v3 = vor.u32 %v5956_v59, %v4517_v60  ;;  %v5939_v59 = vld [vmem:[#allocation9 + $0x1f4] sm:$0xf0] }
  0x3d   :  { %1088 = vmatpush.bf16.msrb.mxu2 %v4452_v29  ;;  %v4645_v0 = vld [vmem:[#allocation9 + $0x390] sm:$0xf0]  ;;  %v4248_v4 = vor.u32 %v5888_v58, %v4245_v62  ;;  %v5884_v7 = vld [vmem:[#allocation9 + $0x44] sm:$0xf]  ;;  %v4443_v58 = vld [vmem:[#allocation9 + $0x1e8] sm:$0xf] }
  0x3e   :  { %1101 = vmatpush.bf16.msrb.mxu3 %v4580_v30  ;;  %v4373_v2 = vld [vmem:[#allocation9 + $0x170] sm:$0xf0]  ;;  %v4648_v5 = vor.u32 %v5988_v63, %v4645_v0  ;;  %v5916_v9 = vld [vmem:[#allocation9 + $0x144] sm:$0xf] }
  0x3f   :  { %1107 = vmatpush.bf16.msra.mxu0 %v4312_v19  ;;  %v4376_v6 = vor.u32 %v5920_v1, %v4373_v2  ;;  %v4229_v8 = vld [vmem:[#allocation9 + $0x50] sm:$0xf0]  ;;  %v5952_v13 = vld [vmem:[#allocation9 + $0x264] sm:$0xf]  ;;  %v4444_v2 = vor.u32 %v5939_v59, %v4443_v58 }
  0x40   :  { %1120 = vmatpush.bf16.msra.mxu1 %v4440_v23  ;;  %v4357_v10 = vld [vmem:[#allocation9 + $0x150] sm:$0xf0]  ;;  %v4232_v11 = vor.u32 %v5884_v7, %v4229_v8  ;;  %v5984_v15 = vld [vmem:[#allocation9 + $0x364] sm:$0xf]  ;;  %v5935_v7 = vld [vmem:[#allocation9 + $0x1d4] sm:$0xf0] }
  0x41   :  { %1133 = vmatpush.bf16.msra.mxu2 %v4568_v31  ;;  %v4360_v12 = vor.u32 %v5916_v9, %v4357_v10  ;;  %v4501_v14 = vld [vmem:[#allocation9 + $0x270] sm:$0xf0]  ;;  %v5880_v19 = vld [vmem:[#allocation9 + $0x24] sm:$0xf] }
  0x42   :  { %1146 = vmatpush.bf16.msra.mxu3 %v4696_v33  ;;  %v4504_v16 = vor.u32 %v5952_v13, %v4501_v14  ;;  %v4629_v17 = vld [vmem:[#allocation9 + $0x370] sm:$0xf0]  ;;  %v5912_v22 = vld [vmem:[#allocation9 + $0x124] sm:$0xf]  ;;  %v4571_v13 = vld [vmem:[#allocation9 + $0x2e8] sm:$0xf] }
  0x43   :  { %1108 = vmatpush.bf16.msra.mxu0 %v4296_v32  ;;  %v4632_v18 = vor.u32 %v5984_v15, %v4629_v17  ;;  %v4213_v20 = vld [vmem:[#allocation9 + $0x30] sm:$0xf0]  ;;  %v5948_v25 = vld [vmem:[#allocation9 + $0x244] sm:$0xf]  ;;  %v5971_v14 = vld [vmem:[#allocation9 + $0x2f4] sm:$0xf0] }
  0x44   :  { %1121 = vmatpush.bf16.msra.mxu1 %v4424_v37  ;;  %v4216_v21 = vor.u32 %v5880_v19, %v4213_v20  ;;  %v4341_v23 = vld [vmem:[#allocation9 + $0x130] sm:$0xf0]  ;;  %v5980_v27 = vld [vmem:[#allocation9 + $0x344] sm:$0xf]  ;;  %v4699_v15 = vld [vmem:[#allocation9 + $0x3e8] sm:$0xf] }
  0x45   :  { %1134 = vmatpush.bf16.msra.mxu2 %v4552_v43  ;;  %v4344_v24 = vor.u32 %v5912_v22, %v4341_v23  ;;  %v4485_v26 = vld [vmem:[#allocation9 + $0x250] sm:$0xf0]  ;;  %v5876_v31 = vld [vmem:[#allocation9 + $0x4] sm:$0xf]  ;;  %v6003_v19 = vld [vmem:[#allocation9 + $0x3f4] sm:$0xf0] }
  0x46   :  { %1147 = vmatpush.bf16.msra.mxu3 %v4680_v45  ;;  %v4488_v28 = vor.u32 %v5948_v25, %v4485_v26  ;;  %v4613_v29 = vld [vmem:[#allocation9 + $0x350] sm:$0xf0]  ;;  %v5908_v33 = vld [vmem:[#allocation9 + $0x104] sm:$0xf]  ;;  %v4283_v20 = vld [vmem:[#allocation9 + $0xa8] sm:$0xf]  ;;  %v4572_v26 = vor.u32 %v5971_v14, %v4571_v13 }
  0x47   :  { %1109 = vmatpush.bf16.msra.mxu0 %v4280_v44  ;;  %v4616_v30 = vor.u32 %v5980_v27, %v4613_v29  ;;  %v4197_v32 = vld [vmem:[#allocation9 + $0x10] sm:$0xf0]  ;;  %v5944_v37 = vld [vmem:[#allocation9 + $0x224] sm:$0xf]  ;;  %v4411_v23 = vld [vmem:[#allocation9 + $0x1a8] sm:$0xf] }
  0x48   :  { %1122 = vmatpush.bf16.msra.mxu1 %v4408_v49  ;;  %v4200_v34 = vor.u32 %v5876_v31, %v4197_v32  ;;  %v4325_v35 = vld [vmem:[#allocation9 + $0x110] sm:$0xf0]  ;;  %v5976_v40 = vld [vmem:[#allocation9 + $0x324] sm:$0xf]  ;;  %v133_v49 = vld [vmem:[%s6893_s2] sm:$0xf] }
  0x49   :  { %1135 = vmatpush.bf16.msra.mxu2 %v4536_v55  ;;  %v4328_v36 = vor.u32 %v5908_v33, %v4325_v35  ;;  %v4469_v38 = vld [vmem:[#allocation9 + $0x230] sm:$0xf0]  ;;  %v5940_v43 = vld [vmem:[#allocation9 + $0x204] sm:$0xf]  ;;  %v135_v50 = vperm.slane %v133_v49, 0  ;;  %v136_v51 = vperm.slane %v133_v49, 1 }
  0x4a   :  { %1148 = vmatpush.bf16.msra.mxu3 %v4664_v57  ;;  %v4472_v39 = vor.u32 %v5944_v37, %v4469_v38  ;;  %v4597_v41 = vld [vmem:[#allocation9 + $0x330] sm:$0xf0]  ;;  %v5972_v46 = vld [vmem:[#allocation9 + $0x304] sm:$0xf]  ;;  %v4315_v55 = vld [vmem:[#allocation9 + $0xe8] sm:$0xf] }
  0x4b   :  { %1110 = vmatpush.bf16.msra.mxu0 %v4264_v56  ;;  %v4600_v42 = vor.u32 %v5976_v40, %v4597_v41  ;;  %v4453_v44 = vld [vmem:[#allocation9 + $0x210] sm:$0xf0]  ;;  %v5907_v56 = vld [vmem:[#allocation9 + $0xf4] sm:$0xf0]  ;;  %v137_v62 = vperm.slane %v133_v49, 2  ;;  %v138_v1 = vperm.slane %v133_v49, 3 }
  0x4c   :  { %1123 = vmatpush.bf16.msra.mxu1 %v4392_v61  ;;  %v4456_v45 = vor.u32 %v5940_v43, %v4453_v44  ;;  %v4581_v47 = vld [vmem:[#allocation9 + $0x310] sm:$0xf0]  ;;  %v4316_v63 = vor.u32 %v5907_v56, %v4315_v55  ;;  %v5967_v31 = vld [vmem:[#allocation9 + $0x2d4] sm:$0xf0]  ;;  %v4683_v32 = vld [vmem:[#allocation9 + $0x3c8] sm:$0xf] }
  0x4d   :  { %1136 = vmatpush.bf16.msra.mxu2 %v4520_v3  ;;  %v4584_v48 = vor.u32 %v5972_v46, %v4581_v47  ;;  %v4299_v3 = vld [vmem:[#allocation9 + $0xc8] sm:$0xf]  ;;  %v5999_v35 = vld [vmem:[#allocation9 + $0x3d4] sm:$0xf0] }
  0x4e   :  { %1149 = vmatpush.bf16.msra.mxu3 %v4648_v5  ;;  %v5895_v37 = vld [vmem:[#allocation9 + $0x94] sm:$0xf0]  ;;  %v4395_v38 = vld [vmem:[#allocation9 + $0x188] sm:$0xf]  ;;  %v4684_v43 = vor.u32 %v5999_v35, %v4683_v32  ;;  %v5937_v32 = vld [vmem:[#allocation9 + $0x1ec] sm:$0xf] }
  0x4f   :  { %1111 = vmatpush.bf16.msra.mxu0 %v4248_v4  ;;  %v5903_v4 = vld [vmem:[#allocation9 + $0xd4] sm:$0xf0]  ;;  %v4523_v56 = vld [vmem:[#allocation9 + $0x288] sm:$0xf] }
  0x50   :  { %1124 = vmatpush.bf16.msra.mxu1 %v4376_v6  ;;  %v4427_v6 = vld [vmem:[#allocation9 + $0x1c8] sm:$0xf]  ;;  %v5963_v46 = vld [vmem:[#allocation9 + $0x2b4] sm:$0xf0] }
  0x51   :  { %1137 = vmatpush.bf16.msra.mxu2 %v4504_v16  ;;  %v5995_v49 = vld [vmem:[#allocation9 + $0x3b4] sm:$0xf0]  ;;  %v4347_v14 = vld [vmem:[#allocation9 + $0x128] sm:$0xf] }
  0x52   :  { %1150 = vmatpush.bf16.msra.mxu3 %v4632_v18  ;;  %v4428_v18 = vor.u32 %v5935_v7, %v4427_v6  ;;  %v4507_v6 = vld [vmem:[#allocation9 + $0x268] sm:$0xf]  ;;  %v5955_v7 = vld [vmem:[#allocation9 + $0x274] sm:$0xf0] }
  0x53   :  { %1112 = vmatpush.bf16.msra.mxu0 %v4232_v11  ;;  %v5883_v13 = vld [vmem:[#allocation9 + $0x34] sm:$0xf0] }
  0x54   :  { %1125 = vmatpush.bf16.msra.mxu1 %v4360_v12  ;;  %v4300_v12 = vor.u32 %v5903_v4, %v4299_v3 }
  0x55   :  { %1138 = vmatpush.bf16.msra.mxu2 %v4488_v28  ;;  %v4700_v28 = vor.u32 %v6003_v19, %v4699_v15  ;;  %v5915_v15 = vld [vmem:[#allocation9 + $0x134] sm:$0xf0] }
  0x56   :  { %1151 = vmatpush.bf16.msra.mxu3 %v4616_v30  ;;  %v4555_v30 = vld [vmem:[#allocation9 + $0x2c8] sm:$0xf]  ;;  %v5951_v19 = vld [vmem:[#allocation9 + $0x254] sm:$0xf0] }
  0x57   :  { %1113 = vmatpush.bf16.msra.mxu0 %v4216_v21  ;;  %v5899_v21 = vld [vmem:[#allocation9 + $0xb4] sm:$0xf0]  ;;  %v4556_v41 = vor.u32 %v5967_v31, %v4555_v30  ;;  %v4317_v31 = vld [vmem:[#allocation9 + $0xf8] sm:$0xf0] }
  0x58   :  { %1126 = vmatpush.bf16.msra.mxu1 %v4344_v24  ;;  %v5931_v24 = vld [vmem:[#allocation9 + $0x1b4] sm:$0xf0]  ;;  %v4284_v29 = vor.u32 %v5899_v21, %v4283_v20  ;;  %v4619_v20 = vld [vmem:[#allocation9 + $0x348] sm:$0xf] }
  0x59   :  { %1139 = vmatpush.bf16.msra.mxu2 %v4472_v39  ;;  %v5927_v39 = vld [vmem:[#allocation9 + $0x194] sm:$0xf0] }
  0x5a   :  { %1152 = vmatpush.bf16.msra.mxu3 %v4600_v42  ;;  %v4396_v47 = vor.u32 %v5927_v39, %v4395_v38 }
  0x5b   :  { %1114 = vmatpush.bf16.msra.mxu0 %v4200_v34  ;;  %v4412_v34 = vor.u32 %v5931_v24, %v4411_v23  ;;  %v5983_v23 = vld [vmem:[#allocation9 + $0x354] sm:$0xf0]  ;;  %v4203_v24 = vld [vmem:[#allocation9 + $0x8] sm:$0xf] }
  0x5c   :  { %1127 = vmatpush.bf16.msra.mxu1 %v4328_v36  ;;  %v4267_v36 = vld [vmem:[#allocation9 + $0x88] sm:$0xf]  ;;  %v4620_v35 = vor.u32 %v5983_v23, %v4619_v20  ;;  %v4669_v23 = vld [vmem:[#allocation9 + $0x3b8] sm:$0xf0] }
  0x5d   :  { %1140 = vmatpush.bf16.msra.mxu2 %v4456_v45  ;;  %v4268_v44 = vor.u32 %v5895_v37, %v4267_v36  ;;  %v4539_v45 = vld [vmem:[#allocation9 + $0x2a8] sm:$0xf]  ;;  %v5947_v37 = vld [vmem:[#allocation9 + $0x234] sm:$0xf0] }
  0x5e   :  { %1153 = vmatpush.bf16.msra.mxu3 %v4584_v48  ;;  %v4667_v48 = vld [vmem:[#allocation9 + $0x3a8] sm:$0xf] }
  0x5f   :  { %v4668_v55 = vor.u32 %v5995_v49, %v4667_v48  ;;  %v4475_v36 = vld [vmem:[#allocation9 + $0x228] sm:$0xf]  ;;  %v4429_v48 = vld [vmem:[#allocation9 + $0x1d8] sm:$0xf0] }
  0x9b   :  { %v236_v52 = vpop.f32.mrf.mxu0 }
  0x9c   :  { %v237_v53 = vadd.f32 %v236_v52, %v135_v50  ;;  %v249_v54 = vpop.f32.mrf.mxu1  ;;  %v4251_v50 = vld [vmem:[#allocation9 + $0x68] sm:$0xf] }
  0x9d   :  { %v250_v57 = vadd.f32 %v249_v54, %v136_v51  ;;  %v5891_v51 = vld [vmem:[#allocation9 + $0x74] sm:$0xf0]  ;;  %v4379_v52 = vld [vmem:[#allocation9 + $0x168] sm:$0xf]  ;;  %v4540_v54 = vor.u32 %v5963_v46, %v4539_v45  ;;  %v4476_v45 = vor.u32 %v5947_v37, %v4475_v36  ;;  %v4301_v46 = vld [vmem:[#allocation9 + $0xd8] sm:$0xf0] }
  0x9e   :  { %v279_v60 = vmax.f32 %v237_v53, 0.0  ;;  %v5923_v53 = vld [vmem:[#allocation9 + $0x174] sm:$0xf0]  ;;  %v4252_v58 = vor.u32 %v5891_v51, %v4251_v50  ;;  %v4459_v50 = vld [vmem:[#allocation9 + $0x208] sm:$0xf] }
  0x9f   :  { %v280_v61 = vmax.f32 %v250_v57, 0.0  ;;  %v5959_v57 = vld [vmem:[#allocation9 + $0x294] sm:$0xf0]  ;;  %v4380_v59 = vor.u32 %v5923_v53, %v4379_v52  ;;  %v4587_v52 = vld [vmem:[#allocation9 + $0x308] sm:$0xf] }
  0xa0   :  { %v6584_v0 = vpack.c.bf16 %v279_v60, %v279_v60  ;;  %v4651_v60 = vld [vmem:[#allocation9 + $0x388] sm:$0xf]  ;;  %v4524_v3 = vor.u32 %v5959_v57, %v4523_v56  ;;  %v5943_v51 = vld [vmem:[#allocation9 + $0x214] sm:$0xf0]  ;;  %v5989_v36 = vld [vmem:[#allocation9 + $0x38c] sm:$0xf] }
  0xa1   :  { %v6586_v5 = vpack.c.bf16 %v280_v61, %v280_v61  ;;  %v5991_v61 = vld [vmem:[#allocation9 + $0x394] sm:$0xf0]  ;;  %v4653_v37 = vld [vmem:[#allocation9 + $0x398] sm:$0xf0] }
  0xa2   :  { %1063 = vmatmul.bf16.vlgmr.msrb.gmra.mxu0 %v6584_v0  ;;  %v4652_v4 = vor.u32 %v5991_v61, %v4651_v60  ;;  %v5975_v53 = vld [vmem:[#allocation9 + $0x314] sm:$0xf0]  ;;  %v5897_v60 = vld [vmem:[#allocation9 + $0xac] sm:$0xf]  ;;  %v4460_v61 = vor.u32 %v5943_v51, %v4459_v50  ;;  %v4221_v51 = vld [vmem:[#allocation9 + $0x38] sm:$0xf0] }
  0xa3   :  { %v262_v8 = vpop.f32.mrf.mxu2  ;;  %1076 = vmatmul.bf16.vlgmr.msrb.gmra.mxu1 %v6586_v5  ;;  %1159 = vmatpush.bf16.msrb.mxu0 %v4316_v63  ;;  %v238_v11 = vpop.f32.mrf.mxu0  ;;  %v5887_v63 = vld [vmem:[#allocation9 + $0x54] sm:$0xf0]  ;;  %v5881_v50 = vld [vmem:[#allocation9 + $0x2c] sm:$0xf] }
  0xa4   :  { %v263_v9 = vadd.f32 %v262_v8, %v137_v62  ;;  %v275_v10 = vpop.f32.mrf.mxu3  ;;  %1172 = vmatpush.bf16.msrb.mxu1 %v4444_v2  ;;  %v251_v17 = vpop.f32.mrf.mxu1  ;;  %v4235_v62 = vld [vmem:[#allocation9 + $0x48] sm:$0xf]  ;;  %v5919_v2 = vld [vmem:[#allocation9 + $0x154] sm:$0xf0] }
  0xa5   :  { %v276_v16 = vadd.f32 %v275_v10, %v138_v1  ;;  %v4363_v1 = vld [vmem:[#allocation9 + $0x148] sm:$0xf]  ;;  %v4236_v8 = vor.u32 %v5887_v63, %v4235_v62  ;;  %v5987_v11 = vld [vmem:[#allocation9 + $0x374] sm:$0xf0]  ;;  %v4285_v62 = vld [vmem:[#allocation9 + $0xb8] sm:$0xf0] }
  0xa6   :  { %v281_v22 = vmax.f32 %v263_v9, 0.0  ;;  %v4364_v9 = vor.u32 %v5919_v2, %v4363_v1  ;;  %v4635_v10 = vld [vmem:[#allocation9 + $0x368] sm:$0xf]  ;;  %v5929_v63 = vld [vmem:[#allocation9 + $0x1ac] sm:$0xf]  ;;  %v4588_v2 = vor.u32 %v5975_v53, %v4587_v52 }
  0xa7   :  { %v282_v25 = vmax.f32 %v276_v16, 0.0  ;;  %1160 = vmatpush.bf16.msrb.mxu0 %v4300_v12  ;;  %v4219_v12 = vld [vmem:[#allocation9 + $0x28] sm:$0xf]  ;;  %v4508_v16 = vor.u32 %v5955_v7, %v4507_v6  ;;  %v4636_v17 = vor.u32 %v5987_v11, %v4635_v10  ;;  %v4413_v1 = vld [vmem:[#allocation9 + $0x1b8] sm:$0xf0] }
  0xa8   :  { %v6590_v27 = vpack.c.bf16 %v281_v22, %v281_v22  ;;  %1173 = vmatpush.bf16.msrb.mxu1 %v4428_v18  ;;  %v4491_v18 = vld [vmem:[#allocation9 + $0x248] sm:$0xf]  ;;  %v4220_v21 = vor.u32 %v5883_v13, %v4219_v12  ;;  %v4348_v22 = vor.u32 %v5915_v15, %v4347_v14  ;;  %v5965_v6 = vld [vmem:[#allocation9 + $0x2cc] sm:$0xf]  ;;  %v4557_v7 = vld [vmem:[#allocation9 + $0x2d8] sm:$0xf0] }
  0xa9   :  { %v6592_v33 = vpack.c.bf16 %v282_v25, %v282_v25  ;;  %v5879_v25 = vld [vmem:[#allocation9 + $0x14] sm:$0xf0]  ;;  %v4492_v30 = vor.u32 %v5951_v19, %v4491_v18  ;;  %v5997_v10 = vld [vmem:[#allocation9 + $0x3cc] sm:$0xf]  ;;  %v4685_v11 = vld [vmem:[#allocation9 + $0x3d8] sm:$0xf0] }
  0xaa   :  { %1089 = vmatmul.bf16.vlgmr.msrb.gmra.mxu2 %v6590_v27  ;;  %v4204_v38 = vor.u32 %v5879_v25, %v4203_v24  ;;  %v5893_v12 = vld [vmem:[#allocation9 + $0x8c] sm:$0xf]  ;;  %v4269_v13 = vld [vmem:[#allocation9 + $0x98] sm:$0xf0] }
  0xab   :  { %1102 = vmatmul.bf16.vlgmr.msrb.gmra.mxu3 %v6592_v33  ;;  %1185 = vmatpush.bf16.msrb.mxu2 %v4572_v26  ;;  %v264_v40 = vpop.f32.mrf.mxu2  ;;  %v4331_v26 = vld [vmem:[#allocation9 + $0x108] sm:$0xf]  ;;  %v5925_v14 = vld [vmem:[#allocation9 + $0x18c] sm:$0xf]  ;;  %v4397_v15 = vld [vmem:[#allocation9 + $0x198] sm:$0xf0]  ;;  %v4272_v20 = vor.u32 %v5893_v12, %v4269_v13 }
  0xac   :  { %1198 = vmatpush.bf16.msrb.mxu3 %v4700_v28  ;;  %v277_v42 = vpop.f32.mrf.mxu3  ;;  %1161 = vmatpush.bf16.msrb.mxu0 %v4284_v29  ;;  %v5911_v28 = vld [vmem:[#allocation9 + $0x114] sm:$0xf0]  ;;  %v5905_v29 = vld [vmem:[#allocation9 + $0xec] sm:$0xf]  ;;  %v4603_v40 = vld [vmem:[#allocation9 + $0x328] sm:$0xf] }
  0xad   :  { %1174 = vmatpush.bf16.msrb.mxu1 %v4412_v34  ;;  %v4445_v34 = vld [vmem:[#allocation9 + $0x1f8] sm:$0xf0]  ;;  %v4332_v39 = vor.u32 %v5911_v28, %v4331_v26  ;;  %v4320_v42 = vor.u32 %v5905_v29, %v4317_v31  ;;  %v5961_v18 = vld [vmem:[#allocation9 + $0x2ac] sm:$0xf] }
  0xae   :  { %v4541_v19 = vld [vmem:[#allocation9 + $0x2b8] sm:$0xf0]  ;;  %v5889_v24 = vld [vmem:[#allocation9 + $0x6c] sm:$0xf] }
  0xaf   :  { %1186 = vmatpush.bf16.msrb.mxu2 %v4556_v41  ;;  %v5979_v41 = vld [vmem:[#allocation9 + $0x334] sm:$0xf0]  ;;  %v4253_v25 = vld [vmem:[#allocation9 + $0x78] sm:$0xf0]  ;;  %v5921_v26 = vld [vmem:[#allocation9 + $0x16c] sm:$0xf]  ;;  %v4544_v29 = vor.u32 %v5961_v18, %v4541_v19 }
  0xb0   :  { %1199 = vmatpush.bf16.msrb.mxu3 %v4684_v43  ;;  %1162 = vmatpush.bf16.msrb.mxu0 %v4268_v44  ;;  %v4448_v43 = vor.u32 %v5937_v32, %v4445_v34  ;;  %v5901_v44 = vld [vmem:[#allocation9 + $0xcc] sm:$0xf]  ;;  %v4604_v49 = vor.u32 %v5979_v41, %v4603_v40  ;;  %v4381_v28 = vld [vmem:[#allocation9 + $0x178] sm:$0xf0]  ;;  %v4256_v34 = vor.u32 %v5889_v24, %v4253_v25 }
  0xb1   :  { %1175 = vmatpush.bf16.msrb.mxu1 %v4396_v47  ;;  %v5933_v47 = vld [vmem:[#allocation9 + $0x1cc] sm:$0xf]  ;;  %v4304_v56 = vor.u32 %v5901_v44, %v4301_v46  ;;  %v4525_v32 = vld [vmem:[#allocation9 + $0x298] sm:$0xf0] }
  0xb2   :  { %1115 = vmatmul.bf16.vlgmr.msra.gmra.mxu0 %v6584_v0  ;;  %v4432_v57 = vor.u32 %v5933_v47, %v4429_v48  ;;  %v5957_v31 = vld [vmem:[#allocation9 + $0x28c] sm:$0xf]  ;;  %v4365_v41 = vld [vmem:[#allocation9 + $0x158] sm:$0xf0] }
  0xb3   :  { %1187 = vmatpush.bf16.msrb.mxu2 %v4540_v54  ;;  %1128 = vmatmul.bf16.vlgmr.msra.gmra.mxu1 %v6586_v5  ;;  %v5969_v54 = vld [vmem:[#allocation9 + $0x2ec] sm:$0xf]  ;;  %v4349_v53 = vld [vmem:[#allocation9 + $0x138] sm:$0xf0] }
  0xb4   :  { %1200 = vmatpush.bf16.msrb.mxu3 %v4668_v55  ;;  %1163 = vmatpush.bf16.msrb.mxu0 %v4252_v58  ;;  %v4573_v55 = vld [vmem:[#allocation9 + $0x2f8] sm:$0xf0]  ;;  %v6001_v58 = vld [vmem:[#allocation9 + $0x3ec] sm:$0xf] }
  0xb5   :  { %1176 = vmatpush.bf16.msrb.mxu1 %v4380_v59  ;;  %v4701_v59 = vld [vmem:[#allocation9 + $0x3f8] sm:$0xf0]  ;;  %v5917_v40 = vld [vmem:[#allocation9 + $0x14c] sm:$0xf] }
  0xb6   :  { %v5953_v44 = vld [vmem:[#allocation9 + $0x26c] sm:$0xf]  ;;  %v4368_v47 = vor.u32 %v5917_v40, %v4365_v41 }
  0xb7   :  { %1188 = vmatpush.bf16.msrb.mxu2 %v4524_v3  ;;  %v4576_v3 = vor.u32 %v5969_v54, %v4573_v55  ;;  %v5985_v48 = vld [vmem:[#allocation9 + $0x36c] sm:$0xf] }
  0xb8   :  { %1201 = vmatpush.bf16.msrb.mxu3 %v4652_v4  ;;  %1164 = vmatpush.bf16.msrb.mxu0 %v4236_v8  ;;  %v4704_v4 = vor.u32 %v6001_v58, %v4701_v59  ;;  %v4288_v8 = vor.u32 %v5897_v60, %v4285_v62  ;;  %v5913_v52 = vld [vmem:[#allocation9 + $0x12c] sm:$0xf]  ;;  %v4224_v58 = vor.u32 %v5881_v50, %v4221_v51 }
  0xb9   :  { %1177 = vmatpush.bf16.msrb.mxu1 %v4364_v9  ;;  %v4416_v9 = vor.u32 %v5929_v63, %v4413_v1  ;;  %v4352_v59 = vor.u32 %v5913_v52, %v4349_v53  ;;  %v5981_v60 = vld [vmem:[#allocation9 + $0x34c] sm:$0xf]  ;;  %v4205_v63 = vld [vmem:[#allocation9 + $0x18] sm:$0xf0] }
  0xba   :  { %1141 = vmatmul.bf16.vlgmr.msra.gmra.mxu2 %v6590_v27  ;;  %v5877_v62 = vld [vmem:[#allocation9 + $0xc] sm:$0xf] }
  0xbb   :  { %1154 = vmatmul.bf16.vlgmr.msra.gmra.mxu3 %v6592_v33  ;;  %1189 = vmatpush.bf16.msrb.mxu2 %v4508_v16  ;;  %v4560_v16 = vor.u32 %v5965_v6, %v4557_v7  ;;  %v5909_v1 = vld [vmem:[#allocation9 + $0x10c] sm:$0xf]  ;;  %v4477_v7 = vld [vmem:[#allocation9 + $0x238] sm:$0xf0] }
  0xbc   :  { %1202 = vmatpush.bf16.msrb.mxu3 %v4636_v17  ;;  %1165 = vmatpush.bf16.msrb.mxu0 %v4220_v21  ;;  %v4688_v17 = vor.u32 %v5997_v10, %v4685_v11  ;;  %v4400_v21 = vor.u32 %v5925_v14, %v4397_v15  ;;  %v5945_v6 = vld [vmem:[#allocation9 + $0x22c] sm:$0xf]  ;;  %v4605_v11 = vld [vmem:[#allocation9 + $0x338] sm:$0xf0] }
  0xbd   :  { %1178 = vmatpush.bf16.msrb.mxu1 %v4348_v22  ;;  %v5993_v22 = vld [vmem:[#allocation9 + $0x3ac] sm:$0xf]  ;;  %v4480_v12 = vor.u32 %v5945_v6, %v4477_v7  ;;  %v4461_v15 = vld [vmem:[#allocation9 + $0x218] sm:$0xf0] }
  0xbe   :  { %v5977_v10 = vld [vmem:[#allocation9 + $0x32c] sm:$0xf] }
  0xbf   :  { %1190 = vmatpush.bf16.msrb.mxu2 %v4492_v30  ;;  %v4672_v30 = vor.u32 %v5993_v22, %v4669_v23  ;;  %v4608_v13 = vor.u32 %v5977_v10, %v4605_v11  ;;  %v5941_v14 = vld [vmem:[#allocation9 + $0x20c] sm:$0xf] }
  0xc0   :  { %1203 = vmatpush.bf16.msrb.mxu3 %v4620_v35  ;;  %1166 = vmatpush.bf16.msrb.mxu0 %v4204_v38  ;;  %v4384_v35 = vor.u32 %v5921_v26, %v4381_v28  ;;  %v5885_v38 = vld [vmem:[#allocation9 + $0x4c] sm:$0xf]  ;;  %v4464_v18 = vor.u32 %v5941_v14, %v4461_v15 }
  0xc1   :  { %1179 = vmatpush.bf16.msrb.mxu1 %v4332_v39  ;;  %v4237_v39 = vld [vmem:[#allocation9 + $0x58] sm:$0xf0] }
  0xc2   :  { %v4240_v46 = vor.u32 %v5885_v38, %v4237_v39 }
  0xc3   :  { %1191 = vmatpush.bf16.msrb.mxu2 %v4476_v45  ;;  %1167 = vmatmul.bf16.vlgmr.msrb.gmra.mxu0 %v6584_v0  ;;  %v4509_v45 = vld [vmem:[#allocation9 + $0x278] sm:$0xf0] }
  0xc4   :  { %1211 = vmatpush.bf16.msra.mxu0 %v4320_v42  ;;  %1204 = vmatpush.bf16.msrb.mxu3 %v4604_v49  ;;  %v4528_v42 = vor.u32 %v5957_v31, %v4525_v32  ;;  %v4637_v49 = vld [vmem:[#allocation9 + $0x378] sm:$0xf0]  ;;  %v4512_v54 = vor.u32 %v5953_v44, %v4509_v45 }
  0xc5   :  { %1224 = vmatpush.bf16.msra.mxu1 %v4448_v43  ;;  %v4656_v43 = vor.u32 %v5989_v36, %v4653_v37  ;;  %v4640_v55 = vor.u32 %v5985_v48, %v4637_v49 }
  0xc6   :  { %1180 = vmatmul.bf16.vlgmr.msrb.gmra.mxu1 %v6586_v5 }
  0xc7   :  { %1192 = vmatpush.bf16.msrb.mxu2 %v4460_v61  ;;  %v4621_v61 = vld [vmem:[#allocation9 + $0x358] sm:$0xf0] }
  0xc8   :  { %1212 = vmatpush.bf16.msra.mxu0 %v4304_v56  ;;  %1205 = vmatpush.bf16.msrb.mxu3 %v4588_v2  ;;  %v5949_v56 = vld [vmem:[#allocation9 + $0x24c] sm:$0xf]  ;;  %v4333_v2 = vld [vmem:[#allocation9 + $0x118] sm:$0xf0] }
  0xc9   :  { %1225 = vmatpush.bf16.msra.mxu1 %v4432_v57  ;;  %v4493_v57 = vld [vmem:[#allocation9 + $0x258] sm:$0xf0] }
  0xca   :  { %1193 = vmatmul.bf16.vlgmr.msrb.gmra.mxu2 %v6590_v27 }
  0xcb   :  { %1237 = vmatpush.bf16.msra.mxu2 %v4576_v3  ;;  %1206 = vmatmul.bf16.vlgmr.msrb.gmra.mxu3 %v6592_v33  ;;  %v4496_v3 = vor.u32 %v5949_v56, %v4493_v57 }
  0xcc   :  { %1250 = vmatpush.bf16.msra.mxu3 %v4704_v4  ;;  %1213 = vmatpush.bf16.msra.mxu0 %v4288_v8  ;;  %v4624_v4 = vor.u32 %v5981_v60, %v4621_v61  ;;  %v4208_v8 = vor.u32 %v5877_v62, %v4205_v63 }
  0xcd   :  { %1226 = vmatpush.bf16.msra.mxu1 %v4416_v9  ;;  %v4336_v9 = vor.u32 %v5909_v1, %v4333_v2 }
  0xcf   :  { %1238 = vmatpush.bf16.msra.mxu2 %v4560_v16  ;;  %v5973_v16 = vld [vmem:[#allocation9 + $0x30c] sm:$0xf] }
  0xd0   :  { %1251 = vmatpush.bf16.msra.mxu3 %v4688_v17  ;;  %1214 = vmatpush.bf16.msra.mxu0 %v4272_v20  ;;  %v4589_v17 = vld [vmem:[#allocation9 + $0x318] sm:$0xf0] }
  0xd1   :  { %1227 = vmatpush.bf16.msra.mxu1 %v4400_v21  ;;  %v4592_v19 = vor.u32 %v5973_v16, %v4589_v17 }
  0xd3   :  { %1239 = vmatpush.bf16.msra.mxu2 %v4544_v29 }
  0xd4   :  { %1252 = vmatpush.bf16.msra.mxu3 %v4672_v30  ;;  %1215 = vmatpush.bf16.msra.mxu0 %v4256_v34 }
  0xd5   :  { %1228 = vmatpush.bf16.msra.mxu1 %v4384_v35 }
  0xd7   :  { %1240 = vmatpush.bf16.msra.mxu2 %v4528_v42  ;;  %v6491_v42 = vmov 8.0  }
  0xd8   :  { %1253 = vmatpush.bf16.msra.mxu3 %v4656_v43  ;;  %1216 = vmatpush.bf16.msra.mxu0 %v4240_v46  ;;  %6301 = vrcp.f32 %v6491_v42 }
  0xd9   :  { %1229 = vmatpush.bf16.msra.mxu1 %v4368_v47 }
  0xdb   :  { %1241 = vmatpush.bf16.msra.mxu2 %v4512_v54 }
  0xdc   :  { %1254 = vmatpush.bf16.msra.mxu3 %v4640_v55  ;;  %1217 = vmatpush.bf16.msra.mxu0 %v4224_v58 }
  0xdd   :  { %1230 = vmatpush.bf16.msra.mxu1 %v4352_v59 }
  0xde   :  { %v6302_v47 = vpop.eup %6301 }
  0xdf   :  { %1242 = vmatpush.bf16.msra.mxu2 %v4496_v3  ;;  %v1290_v56 = vmul.f32 8.0, %v6302_v47  ;;  %vm1294_vm1 = vweird.f32 %v6302_v47 }
  0xe0   :  { %1255 = vmatpush.bf16.msra.mxu3 %v4624_v4  ;;  %1218 = vmatpush.bf16.msra.mxu0 %v4208_v8 }
  0xe1   :  { %1231 = vmatpush.bf16.msra.mxu1 %v4336_v9  ;;  %v1291_v1 = vsub.f32 1.0, %v1290_v56 }
  0xe3   :  { %1243 = vmatpush.bf16.msra.mxu2 %v4480_v12  ;;  %1219 = vmatmul.bf16.vlgmr.msra.gmra.mxu0 %v6584_v0 }
  0xe4   :  { %1256 = vmatpush.bf16.msra.mxu3 %v4608_v13  ;;  %1232 = vmatmul.bf16.vlgmr.msra.gmra.mxu1 %v6586_v5  ;;  %v1292_v13 = vmul.f32 %v6302_v47, %v1291_v1 }
  0xe7   :  { %1244 = vmatpush.bf16.msra.mxu2 %v4464_v18 }
  0xe8   :  { %1257 = vmatpush.bf16.msra.mxu3 %v4592_v19 }
  0xea   :  { %1245 = vmatmul.bf16.vlgmr.msra.gmra.mxu2 %v6590_v27 }
  0xeb   :  { %1258 = vmatmul.bf16.vlgmr.msra.gmra.mxu3 %v6592_v33 }
 0x11f   :  { %v1064_v20 = vpop.f32.mrf.mxu0 }
 0x120   :  { %v1077_v21 = vpop.f32.mrf.mxu1 }
 0x121   :  { %v1078_v22 = vadd.f32 %v1077_v21, %v1064_v20 }
 0x127   :  { %v1066_v23 = vpop.f32.mrf.mxu0 }
 0x128   :  { %v1079_v24 = vpop.f32.mrf.mxu1 }
 0x12d   :  { %v1090_v0 = vpop.f32.mrf.mxu2 }
 0x12e   :  { %v1091_v5 = vadd.f32 %v1090_v0, %v1078_v22  ;;  %v1103_v27 = vpop.f32.mrf.mxu3  ;;  %v1293_v22 = vadd.f32 %v6302_v47, %v1292_v13 }
 0x12f   :  { %v1116_v25 = vpop.f32.mrf.mxu0 }
 0x130   :  { %v6617_v33 = vadd.f32 %v1103_v27, %v1091_v5  ;;  %v1129_v26 = vpop.f32.mrf.mxu1 }
 0x131   :  { %v1130_v35 = vadd.f32 %v1129_v26, %v1116_v25 }
 0x132   :  { %v1265_v51 = vrot.slane %v6617_v33, 4  ;;  %v1300_v52 = vmul.f32 %v6617_v33, %v6617_v33 }
 0x134   :  { %v1266_v60 = vadd.f32 %v1265_v51, %v6617_v33  ;;  %v1304_v61 = vrot.slane %v1300_v52, 4 }
 0x135   :  { %v1092_v28 = vpop.f32.mrf.mxu2 }
 0x136   :  { %v1105_v29 = vpop.f32.mrf.mxu3  ;;  %v1267_v7 = vrot.slane %v1266_v60, 2  ;;  %v1305_v8 = vadd.f32 %v1304_v61, %v1300_v52 }
 0x137   :  { %v1118_v30 = vpop.f32.mrf.mxu0  ;;  %v6635_v29 = vsel %vm1294_vm1, %v6302_v47, %v1293_v22 }
 0x138   :  { %v1131_v31 = vpop.f32.mrf.mxu1  ;;  %v1268_v18 = vadd.f32 %v1267_v7, %v1266_v60  ;;  %v1306_v19 = vrot.slane %v1305_v8, 2 }
 0x13a   :  { %v1269_v0 = vrot.slane %v1268_v18, 1  ;;  %v1307_v5 = vadd.f32 %v1306_v19, %v1305_v8 }
 0x13d   :  { %v1142_v32 = vpop.f32.mrf.mxu2 }
 0x13e   :  { %v1155_v34 = vpop.f32.mrf.mxu3  ;;  %v1143_v36 = vadd.f32 %v1142_v32, %v1130_v35  ;;  %v1270_v32 = vadd.f32 %v1269_v0, %v1268_v18 }
 0x140   :  { %v1168_v37 = vpop.f32.mrf.mxu0  ;;  %v6619_v39 = vadd.f32 %v1155_v34, %v1143_v36  ;;  %v1308_v34 = vrot.slane %v1307_v5, 1 }
 0x142   :  { %v1271_v43 = vrot.slane %v6619_v39, 4  ;;  %v1301_v44 = vmul.f32 %v6619_v39, %v6619_v39 }
 0x143   :  { %v1181_v38 = vpop.f32.mrf.mxu1 }
 0x144   :  { %v1272_v48 = vadd.f32 %v1271_v43, %v6619_v39  ;;  %v1310_v49 = vrot.slane %v1301_v44, 4  ;;  %v1182_v50 = vadd.f32 %v1181_v38, %v1168_v37 }
 0x145   :  { %v1144_v40 = vpop.f32.mrf.mxu2 }
 0x146   :  { %v1157_v41 = vpop.f32.mrf.mxu3  ;;  %v1273_v57 = vrot.slane %v1272_v48, 2  ;;  %v1311_v58 = vadd.f32 %v1310_v49, %v1301_v44  ;;  %v6647_v40 = vmul.f32 %v6635_v29, %v1270_v32 }
 0x147   :  { %v1309_v41 = vadd.f32 %v1308_v34, %v1307_v5 }
 0x148   :  { %v1170_v45 = vpop.f32.mrf.mxu0  ;;  %v1274_v2 = vadd.f32 %v1273_v57, %v1272_v48  ;;  %v1312_v3 = vrot.slane %v1311_v58, 2  ;;  %v1332_v49 = vmul.f32 %v6647_v40, %v6647_v40 }
 0x149   :  { %v1328_v48 = vmul.f32 %v1309_v41, %v6635_v29 }
 0x14a   :  { %v1275_v14 = vrot.slane %v1274_v2, 1  ;;  %v1313_v15 = vadd.f32 %v1312_v3, %v1311_v58 }
 0x14b   :  { %v1183_v46 = vpop.f32.mrf.mxu1  ;;  %v1336_v56 = vsub.f32 %v1328_v48, %v1332_v49 }
 0x14c   :  { %v1276_v23 = vadd.f32 %v1275_v14, %v1274_v2  ;;  %v1314_v24 = vrot.slane %v1313_v15, 1 }
 0x14d   :  { %v1194_v53 = vpop.f32.mrf.mxu2  ;;  %v1340_v1 = vmax.f32 %v1336_v56, 0.0 }
 0x14e   :  { %v1207_v54 = vpop.f32.mrf.mxu3  ;;  %v1195_v55 = vadd.f32 %v1194_v53, %v1182_v50  ;;  %v6638_v30 = vmul.f32 %v6635_v29, %v1276_v23  ;;  %v1315_v31 = vadd.f32 %v1314_v24, %v1313_v15 }
 0x150   :  { %v6628_v59 = vadd.f32 %v1207_v54, %v1195_v55  ;;  %v1329_v37 = vmul.f32 %v1315_v31, %v6635_v29  ;;  %v1333_v38 = vmul.f32 %v6638_v30, %v6638_v30 }
 0x152   :  { %v1277_v62 = vrot.slane %v6628_v59, 4  ;;  %v1302_v63 = vmul.f32 %v6628_v59, %v6628_v59  ;;  %v1337_v46 = vsub.f32 %v1329_v37, %v1333_v38 }
 0x154   :  { %v1278_v4 = vadd.f32 %v1277_v62, %v6628_v59  ;;  %v1316_v6 = vrot.slane %v1302_v63, 4  ;;  %v1341_v54 = vmax.f32 %v1337_v46, 0.0 }
 0x155   :  { %v1196_v9 = vpop.f32.mrf.mxu2 }
 0x156   :  { %v1209_v10 = vpop.f32.mrf.mxu3  ;;  %v1279_v11 = vrot.slane %v1278_v4, 2  ;;  %v1317_v12 = vadd.f32 %v1316_v6, %v1302_v63  ;;  %v1345_v61 = vadd.f32 1e-05, %v1341_v54 }
 0x157   :  { %v1344_v10 = vadd.f32 1e-05, %v1340_v1 }
 0x158   :  { %v1280_v16 = vadd.f32 %v1279_v11, %v1278_v4  ;;  %v1318_v17 = vrot.slane %v1317_v12, 2  ;;  %6303 = vrsqrt.f32 %v1345_v61  ;;  %vm1364_vm3 = vweird.f32 %v1345_v61 }
 0x159   :  { %vm1354_vm12 = vweird.f32 %v1344_v10 }
 0x15a   :  { %v1281_v20 = vrot.slane %v1280_v16, 1  ;;  %v1319_v21 = vadd.f32 %v1318_v17, %v1317_v12 }
 0x15c   :  { %v1282_v25 = vadd.f32 %v1281_v20, %v1280_v16  ;;  %v1320_v26 = vrot.slane %v1319_v21, 1 }
 0x15e   :  { %v6641_v35 = vmul.f32 %v6635_v29, %v1282_v25  ;;  %v1321_v36 = vadd.f32 %v1320_v26, %v1319_v21  ;;  %v6304_v15 = vpop.eup %6303 }
 0x15f   :  { %v1359_v21 = vmul.f32 %v6304_v15, %v1345_v61  ;;  %vm1365_vm2 = vweird.f32 %v6304_v15 }
 0x160   :  { %v1220_v27 = vpop.f32.mrf.mxu0  ;;  %v1330_v43 = vmul.f32 %v1321_v36, %v6635_v29  ;;  %v1334_v44 = vmul.f32 %v6641_v35, %v6641_v35  ;;  %vm1366_vm5 = vmor %vm1364_vm3, %vm1365_vm2 }
 0x161   :  { %v1233_v28 = vpop.f32.mrf.mxu1  ;;  %v1360_v5 = vmul.f32 %v6304_v15, %v1359_v21 }
 0x162   :  { %v1234_v47 = vadd.f32 %v1233_v28, %v1220_v27  ;;  %v1338_v51 = vsub.f32 %v1330_v43, %v1334_v44 }
 0x163   :  { %v1361_v28 = vmul.f32 0.5, %v1360_v5 }
 0x164   :  { %v1342_v57 = vmax.f32 %v1338_v51, 0.0 }
 0x165   :  { %v1362_v34 = vsub.f32 1.5, %v1361_v28 }
 0x166   :  { %v1346_v3 = vadd.f32 1e-05, %v1342_v57  ;;  %v1263_v57 = vld [vmem:[%s6895_s4] sm:$0xf] }
 0x168   :  { %v1222_v42 = vpop.f32.mrf.mxu0  ;;  %6305 = vrsqrt.f32 %v1346_v3  ;;  %vm1374_vm6 = vweird.f32 %v1346_v3 }
 0x169   :  { %v1235_v45 = vpop.f32.mrf.mxu1  ;;  %6307 = vrsqrt.f32 %v1344_v10  ;;  %v1363_v42 = vmul.f32 %v6304_v15, %v1362_v34 }
 0x16d   :  { %v1246_v50 = vpop.f32.mrf.mxu2 }
 0x16e   :  { %v1247_v52 = vadd.f32 %v1246_v50, %v1234_v47  ;;  %v1259_v53 = vpop.f32.mrf.mxu3  ;;  %v6306_v18 = vpop.eup %6305  ;;  %v1367_v47 = vsel %vm1366_vm5, %v6304_v15, %v1363_v42 }
 0x16f   :  { %v6308_v23 = vpop.eup %6307  ;;  %v1369_v24 = vmul.f32 %v6306_v18, %v1346_v3  ;;  %vm1375_vm4 = vweird.f32 %v6306_v18 }
 0x170   :  { %v6655_v55 = vadd.f32 %v1259_v53, %v1247_v52  ;;  %v1349_v27 = vmul.f32 %v6308_v23, %v1344_v10  ;;  %vm1355_vm8 = vweird.f32 %v6308_v23  ;;  %vm1376_vm9 = vmor %vm1374_vm6, %vm1375_vm4  ;;  %v1392_v52 = vrot.slane %v1367_v47, 7 }
 0x171   :  { %v1370_v26 = vmul.f32 %v6306_v18, %v1369_v24  ;;  %vm1356_vm15 = vmor %vm1354_vm12, %vm1355_vm8 }
 0x172   :  { %v1283_v58 = vrot.slane %v6655_v55, 4  ;;  %v1303_v60 = vmul.f32 %v6655_v55, %v6655_v55  ;;  %v1350_v31 = vmul.f32 %v6308_v23, %v1349_v27 }
 0x173   :  { %v1371_v32 = vmul.f32 0.5, %v1370_v26 }
 0x174   :  { %v1284_v62 = vadd.f32 %v1283_v58, %v6655_v55  ;;  %v1322_v63 = vrot.slane %v1303_v60, 4  ;;  %v1351_v37 = vmul.f32 0.5, %v1350_v31 }
 0x175   :  { %v1248_v2 = vpop.f32.mrf.mxu2  ;;  %v1372_v38 = vsub.f32 1.5, %v1371_v32 }
 0x176   :  { %v1285_v4 = vrot.slane %v1284_v62, 2  ;;  %v1323_v6 = vadd.f32 %v1322_v63, %v1303_v60  ;;  %v1261_v7 = vpop.f32.mrf.mxu3  ;;  %v1352_v44 = vsub.f32 1.5, %v1351_v37 }
 0x177   :  { %v1373_v45 = vmul.f32 %v6306_v18, %v1372_v38 }
 0x178   :  { %v1286_v8 = vadd.f32 %v1285_v4, %v1284_v62  ;;  %v1324_v9 = vrot.slane %v1323_v6, 2  ;;  %v1353_v49 = vmul.f32 %v6308_v23, %v1352_v44 }
 0x179   :  { %v1377_v50 = vsel %vm1376_vm9, %v6306_v18, %v1373_v45 }
 0x17a   :  { %v1287_v11 = vrot.slane %v1286_v8, 1  ;;  %v1325_v12 = vadd.f32 %v1324_v9, %v1323_v6  ;;  %v1393_v54 = vrot.slane %v1377_v50, 6  ;;  %v1357_v58 = vsel %vm1356_vm15, %v6308_v23, %v1353_v49 }
 0x17b   :  { %v1396_v60 = vsel %vm1395_vm13, %v1357_v58, %v1392_v52 }
 0x17c   :  { %v1288_v13 = vadd.f32 %v1287_v11, %v1286_v8  ;;  %v1326_v14 = vrot.slane %v1325_v12, 1 }
 0x17e   :  { %v6662_v16 = vmul.f32 %v6635_v29, %v1288_v13  ;;  %v1327_v17 = vadd.f32 %v1326_v14, %v1325_v12  ;;  %v1264_v13 = vld [vmem:[%s6896_s5] sm:$0xf] }
 0x180   :  { %v1331_v19 = vmul.f32 %v1327_v17, %v6635_v29  ;;  %v1335_v20 = vmul.f32 %v6662_v16, %v6662_v16 }
 0x182   :  { %v1339_v22 = vsub.f32 %v1331_v19, %v1335_v20 }
 0x184   :  { %v1343_v0 = vmax.f32 %v1339_v22, 0.0 }
 0x186   :  { %v1347_v25 = vadd.f32 1e-05, %v1343_v0 }
 0x188   :  { %6309 = vrsqrt.f32 %v1347_v25  ;;  %vm1384_vm10 = vweird.f32 %v1347_v25 }
 0x18e   :  { %v6310_v36 = vpop.eup %6309 }
 0x18f   :  { %v1379_v41 = vmul.f32 %v6310_v36, %v1347_v25  ;;  %vm1385_vm7 = vweird.f32 %v6310_v36 }
 0x190   :  { %vm1386_vm11 = vmor %vm1384_vm10, %vm1385_vm7 }
 0x191   :  { %v1380_v43 = vmul.f32 %v6310_v36, %v1379_v41 }
 0x193   :  { %v1381_v46 = vmul.f32 0.5, %v1380_v43 }
 0x195   :  { %v1382_v48 = vsub.f32 1.5, %v1381_v46 }
 0x197   :  { %v1383_v51 = vmul.f32 %v6310_v36, %v1382_v48 }
 0x199   :  { %v1387_v53 = vsel %vm1386_vm11, %v6310_v36, %v1383_v51 }
 0x19a   :  { %v1394_v56 = vrot.slane %v1387_v53, 5 }
 0x19c   :  { %v1398_v61 = vsel %vm1397_vm14, %v1393_v54, %v1394_v56 }
 0x19d   :  { %v1400_v62 = vsel %vm1399_vm0, %v1396_v60, %v1398_v61 }
 0x19e   :  { %v1402_v63 = vmul.f32 %v1400_v62, %v1263_v57 }
 0x1a0   :  { %v1404_v1 = vperm.slane %v1402_v63, 0  ;;  %v1405_v2 = vperm.slane %v1402_v63, 1  ;;  %v1406_v3 = vperm.slane %v1402_v63, 2  ;;  %v1407_v4 = vperm.slane %v1402_v63, 3 }
 0x1a2   :  { %v1413_v6 = vmul.f32 %v1405_v2, %v6638_v30  ;;  %v1414_v7 = vmul.f32 %v1406_v3, %v6641_v35  ;;  %v1415_v8 = vmul.f32 %v1407_v4, %v6662_v16  ;;  %v1412_v9 = vmul.f32 %v1404_v1, %v6647_v40 }
 0x1a3   :  { %v1428_v35 = vmul.f32 %v1404_v1, %v6617_v33  ;;  %v1429_v16 = vmul.f32 %v1405_v2, %v6619_v39  ;;  %v1430_v40 = vmul.f32 %v1406_v3, %v6628_v59  ;;  %v1431_v18 = vmul.f32 %v1407_v4, %v6655_v55 }
 0x1a4   :  { %v1420_v10 = vrot.slane %v1413_v6, 7  ;;  %v1421_v11 = vrot.slane %v1414_v7, 6  ;;  %v1422_v12 = vrot.slane %v1415_v8, 5 }
 0x1a6   :  { %v1423_v14 = vsel %vm1395_vm13, %v1412_v9, %v1420_v10  ;;  %v1424_v15 = vsel %vm1397_vm14, %v1421_v11, %v1422_v12 }
 0x1a7   :  { %v1425_v17 = vsel %vm1399_vm0, %v1423_v14, %v1424_v15 }
 0x1a8   :  { %v1427_v30 = vsub.f32 %v1264_v13, %v1425_v17 }
 0x1aa   :  { %v1433_v19 = vperm.slane %v1427_v30, 0  ;;  %v1434_v20 = vperm.slane %v1427_v30, 1  ;;  %v1435_v21 = vperm.slane %v1427_v30, 2  ;;  %v1436_v22 = vperm.slane %v1427_v30, 3 }
 0x1ac   :  { %v1441_v23 = vadd.f32 %v1433_v19, %v1428_v35  ;;  %v1442_v24 = vadd.f32 %v1434_v20, %v1429_v16  ;;  %v1443_v0 = vadd.f32 %v1435_v21, %v1430_v40  ;;  %v1444_v5 = vadd.f32 %v1436_v22, %v1431_v18 }
 0x1ae   :  { %v1445_v27 = vmax.f32 %v1441_v23, 0.0  ;;  %v1446_v25 = vmax.f32 %v1442_v24, 0.0  ;;  %v1447_v26 = vmax.f32 %v1443_v0, 0.0  ;;  %v1448_v28 = vmax.f32 %v1444_v5, 0.0 }
 0x1b0   :  { %v6687_v31 = vpack.c.bf16 %v1445_v27, %v1445_v27  ;;  %v6689_v33 = vpack.c.bf16 %v1446_v25, %v1446_v25  ;;  %v6691_v39 = vpack.c.bf16 %v1447_v26, %v1447_v26  ;;  %v6693_v59 = vpack.c.bf16 %v1448_v28, %v1448_v28 }
 0x1b1   :  { %6476 = dma.done.wait [#allocation5], 16384 }
 0x1b2   :  { %6477 = vsyncadd [#allocation5], 4294950912  ;;  %v4819_v55 = vld [vmem:[#allocation2 + $0xe0] sm:$0xf]  ;;  %v6034_v32 = vld [vmem:[#allocation2 + $0xec] sm:$0xf0] }
 0x1b3   :  { %v4947_v34 = vld [vmem:[#allocation2 + $0x1e0] sm:$0xf]  ;;  %v4820_v36 = vor.u32 %v6034_v32, %v4819_v55  ;;  %v6066_v37 = vld [vmem:[#allocation2 + $0x1ec] sm:$0xf0] }
 0x1b4   :  { %v5075_v38 = vld [vmem:[#allocation2 + $0x2e0] sm:$0xf]  ;;  %v6098_v41 = vld [vmem:[#allocation2 + $0x2ec] sm:$0xf0]  ;;  %v4948_v42 = vor.u32 %v6066_v37, %v4947_v34 }
 0x1b5   :  { %v5076_v43 = vor.u32 %v6098_v41, %v5075_v38  ;;  %v5203_v44 = vld [vmem:[#allocation2 + $0x3e0] sm:$0xf]  ;;  %v6130_v45 = vld [vmem:[#allocation2 + $0x3ec] sm:$0xf0]  ;;  %2225 = vmatpush.bf16.msrb.mxu0 %v4820_v36 }
 0x1b6   :  { %v4803_v46 = vld [vmem:[#allocation2 + $0xc0] sm:$0xf]  ;;  %v5204_v47 = vor.u32 %v6130_v45, %v5203_v44  ;;  %v6030_v48 = vld [vmem:[#allocation2 + $0xcc] sm:$0xf0]  ;;  %2238 = vmatpush.bf16.msrb.mxu1 %v4948_v42 }
 0x1b7   :  { %v4931_v49 = vld [vmem:[#allocation2 + $0x1c0] sm:$0xf]  ;;  %v6062_v50 = vld [vmem:[#allocation2 + $0x1cc] sm:$0xf0]  ;;  %2251 = vmatpush.bf16.msrb.mxu2 %v5076_v43  ;;  %v4804_v51 = vor.u32 %v6030_v48, %v4803_v46 }
 0x1b8   :  { %v4932_v52 = vor.u32 %v6062_v50, %v4931_v49  ;;  %v5059_v53 = vld [vmem:[#allocation2 + $0x2c0] sm:$0xf]  ;;  %v6094_v54 = vld [vmem:[#allocation2 + $0x2cc] sm:$0xf0]  ;;  %2264 = vmatpush.bf16.msrb.mxu3 %v5204_v47 }
 0x1b9   :  { %v5187_v56 = vld [vmem:[#allocation2 + $0x3c0] sm:$0xf]  ;;  %v5060_v57 = vor.u32 %v6094_v54, %v5059_v53  ;;  %v6126_v58 = vld [vmem:[#allocation2 + $0x3cc] sm:$0xf0]  ;;  %2226 = vmatpush.bf16.msrb.mxu0 %v4804_v51 }
 0x1ba   :  { %v4787_v60 = vld [vmem:[#allocation2 + $0xa0] sm:$0xf]  ;;  %v6026_v61 = vld [vmem:[#allocation2 + $0xac] sm:$0xf0]  ;;  %v5188_v62 = vor.u32 %v6126_v58, %v5187_v56  ;;  %2239 = vmatpush.bf16.msrb.mxu1 %v4932_v52 }
 0x1bb   :  { %v4915_v63 = vld [vmem:[#allocation2 + $0x1a0] sm:$0xf]  ;;  %v6058_v1 = vld [vmem:[#allocation2 + $0x1ac] sm:$0xf0]  ;;  %v4788_v3 = vor.u32 %v6026_v61, %v4787_v60  ;;  %2252 = vmatpush.bf16.msrb.mxu2 %v5060_v57 }
 0x1bc   :  { %v5043_v2 = vld [vmem:[#allocation2 + $0x2a0] sm:$0xf]  ;;  %v6090_v4 = vld [vmem:[#allocation2 + $0x2ac] sm:$0xf0]  ;;  %v4916_v8 = vor.u32 %v6058_v1, %v4915_v63  ;;  %2265 = vmatpush.bf16.msrb.mxu3 %v5188_v62 }
 0x1bd   :  { %v5171_v6 = vld [vmem:[#allocation2 + $0x3a0] sm:$0xf]  ;;  %v6122_v7 = vld [vmem:[#allocation2 + $0x3ac] sm:$0xf0]  ;;  %v5044_v9 = vor.u32 %v6090_v4, %v5043_v2  ;;  %2227 = vmatpush.bf16.msrb.mxu0 %v4788_v3 }
 0x1be   :  { %v4771_v10 = vld [vmem:[#allocation2 + $0x80] sm:$0xf]  ;;  %v6022_v11 = vld [vmem:[#allocation2 + $0x8c] sm:$0xf0]  ;;  %v5172_v13 = vor.u32 %v6122_v7, %v5171_v6  ;;  %2240 = vmatpush.bf16.msrb.mxu1 %v4916_v8  ;;  %v6032_v8 = vld [vmem:[#allocation2 + $0xe4] sm:$0xf] }
 0x1bf   :  { %v4899_v12 = vld [vmem:[#allocation2 + $0x180] sm:$0xf]  ;;  %v6054_v14 = vld [vmem:[#allocation2 + $0x18c] sm:$0xf0]  ;;  %v4772_v16 = vor.u32 %v6022_v11, %v4771_v10  ;;  %2253 = vmatpush.bf16.msrb.mxu2 %v5044_v9  ;;  %v4821_v9 = vld [vmem:[#allocation2 + $0xf0] sm:$0xf0] }
 0x1c0   :  { %v5027_v15 = vld [vmem:[#allocation2 + $0x280] sm:$0xf]  ;;  %v6086_v17 = vld [vmem:[#allocation2 + $0x28c] sm:$0xf0]  ;;  %v4900_v40 = vor.u32 %v6054_v14, %v4899_v12  ;;  %2266 = vmatpush.bf16.msrb.mxu3 %v5172_v13  ;;  %v6064_v10 = vld [vmem:[#allocation2 + $0x1e4] sm:$0xf] }
 0x1c1   :  { %v5155_v30 = vld [vmem:[#allocation2 + $0x380] sm:$0xf]  ;;  %v6118_v35 = vld [vmem:[#allocation2 + $0x38c] sm:$0xf0]  ;;  %v5028_v18 = vor.u32 %v6086_v17, %v5027_v15  ;;  %2228 = vmatpush.bf16.msrb.mxu0 %v4772_v16  ;;  %v4949_v12 = vld [vmem:[#allocation2 + $0x1f0] sm:$0xf0] }
 0x1c2   :  { %v4755_v19 = vld [vmem:[#allocation2 + $0x60] sm:$0xf]  ;;  %v6018_v20 = vld [vmem:[#allocation2 + $0x6c] sm:$0xf0]  ;;  %v5156_v22 = vor.u32 %v6118_v35, %v5155_v30  ;;  %2241 = vmatpush.bf16.msrb.mxu1 %v4900_v40  ;;  %v6096_v13 = vld [vmem:[#allocation2 + $0x2e4] sm:$0xf]  ;;  %v4824_v40 = vor.u32 %v6032_v8, %v4821_v9 }
 0x1c3   :  { %v4883_v21 = vld [vmem:[#allocation2 + $0x160] sm:$0xf]  ;;  %v6050_v23 = vld [vmem:[#allocation2 + $0x16c] sm:$0xf0]  ;;  %v4756_v25 = vor.u32 %v6018_v20, %v4755_v19  ;;  %2254 = vmatpush.bf16.msrb.mxu2 %v5028_v18  ;;  %v5077_v14 = vld [vmem:[#allocation2 + $0x2f0] sm:$0xf0]  ;;  %v4952_v18 = vor.u32 %v6064_v10, %v4949_v12 }
 0x1c4   :  { %v5011_v24 = vld [vmem:[#allocation2 + $0x260] sm:$0xf]  ;;  %v6082_v0 = vld [vmem:[#allocation2 + $0x26c] sm:$0xf0]  ;;  %v4884_v26 = vor.u32 %v6050_v23, %v4883_v21  ;;  %2267 = vmatpush.bf16.msrb.mxu3 %v5156_v22  ;;  %v6128_v30 = vld [vmem:[#allocation2 + $0x3e4] sm:$0xf]  ;;  %v5080_v19 = vor.u32 %v6096_v13, %v5077_v14 }
 0x1c5   :  { %v5139_v5 = vld [vmem:[#allocation2 + $0x360] sm:$0xf]  ;;  %v6114_v27 = vld [vmem:[#allocation2 + $0x36c] sm:$0xf0]  ;;  %v5012_v28 = vor.u32 %v6082_v0, %v5011_v24  ;;  %2229 = vmatpush.bf16.msrb.mxu0 %v4756_v25  ;;  %v5205_v35 = vld [vmem:[#allocation2 + $0x3f0] sm:$0xf0] }
 0x1c6   :  { %v4739_v55 = vld [vmem:[#allocation2 + $0x40] sm:$0xf]  ;;  %v6014_v32 = vld [vmem:[#allocation2 + $0x4c] sm:$0xf0]  ;;  %v5140_v36 = vor.u32 %v6114_v27, %v5139_v5  ;;  %2242 = vmatpush.bf16.msrb.mxu1 %v4884_v26  ;;  %v6028_v20 = vld [vmem:[#allocation2 + $0xc4] sm:$0xf]  ;;  %v5208_v23 = vor.u32 %v6128_v30, %v5205_v35 }
 0x1c7   :  { %v4867_v34 = vld [vmem:[#allocation2 + $0x140] sm:$0xf]  ;;  %v6046_v37 = vld [vmem:[#allocation2 + $0x14c] sm:$0xf0]  ;;  %v4740_v44 = vor.u32 %v6014_v32, %v4739_v55  ;;  %2255 = vmatpush.bf16.msrb.mxu2 %v5012_v28  ;;  %v4805_v21 = vld [vmem:[#allocation2 + $0xd0] sm:$0xf0] }
 0x1c8   :  { %v4995_v38 = vld [vmem:[#allocation2 + $0x240] sm:$0xf]  ;;  %v6078_v41 = vld [vmem:[#allocation2 + $0x24c] sm:$0xf0]  ;;  %v4868_v45 = vor.u32 %v6046_v37, %v4867_v34  ;;  %2268 = vmatpush.bf16.msrb.mxu3 %v5140_v36  ;;  %v6060_v22 = vld [vmem:[#allocation2 + $0x1c4] sm:$0xf]  ;;  %v4808_v26 = vor.u32 %v6028_v20, %v4805_v21 }
 0x1c9   :  { %v5123_v42 = vld [vmem:[#allocation2 + $0x340] sm:$0xf]  ;;  %v6110_v43 = vld [vmem:[#allocation2 + $0x34c] sm:$0xf0]  ;;  %v4996_v46 = vor.u32 %v6078_v41, %v4995_v38  ;;  %2230 = vmatpush.bf16.msrb.mxu0 %v4740_v44  ;;  %v4933_v24 = vld [vmem:[#allocation2 + $0x1d0] sm:$0xf0] }
 0x1ca   :  { %v4723_v47 = vld [vmem:[#allocation2 + $0x20] sm:$0xf]  ;;  %v6010_v48 = vld [vmem:[#allocation2 + $0x2c] sm:$0xf0]  ;;  %v5124_v50 = vor.u32 %v6110_v43, %v5123_v42  ;;  %2243 = vmatpush.bf16.msrb.mxu1 %v4868_v45  ;;  %v6092_v0 = vld [vmem:[#allocation2 + $0x2c4] sm:$0xf]  ;;  %v4936_v28 = vor.u32 %v6060_v22, %v4933_v24 }
 0x1cb   :  { %v4851_v49 = vld [vmem:[#allocation2 + $0x120] sm:$0xf]  ;;  %v6042_v51 = vld [vmem:[#allocation2 + $0x12c] sm:$0xf0]  ;;  %v4724_v57 = vor.u32 %v6010_v48, %v4723_v47  ;;  %2256 = vmatpush.bf16.msrb.mxu2 %v4996_v46  ;;  %v5061_v5 = vld [vmem:[#allocation2 + $0x2d0] sm:$0xf0] }
 0x1cc   :  { %v4979_v52 = vld [vmem:[#allocation2 + $0x220] sm:$0xf]  ;;  %v6074_v53 = vld [vmem:[#allocation2 + $0x22c] sm:$0xf0]  ;;  %v4852_v61 = vor.u32 %v6042_v51, %v4851_v49  ;;  %2269 = vmatpush.bf16.msrb.mxu3 %v5124_v50  ;;  %v6124_v27 = vld [vmem:[#allocation2 + $0x3c4] sm:$0xf]  ;;  %v5064_v55 = vor.u32 %v6092_v0, %v5061_v5 }
 0x1cd   :  { %v5107_v54 = vld [vmem:[#allocation2 + $0x320] sm:$0xf]  ;;  %v6106_v56 = vld [vmem:[#allocation2 + $0x32c] sm:$0xf0]  ;;  %v4980_v62 = vor.u32 %v6074_v53, %v4979_v52  ;;  %2231 = vmatpush.bf16.msrb.mxu0 %v4724_v57  ;;  %v5189_v25 = vld [vmem:[#allocation2 + $0x3d0] sm:$0xf0] }
 0x1ce   :  { %v4707_v58 = vld [vmem:[#allocation2] sm:$0xf]  ;;  %v6006_v60 = vld [vmem:[#allocation2 + $0xc] sm:$0xf0]  ;;  %v5108_v3 = vor.u32 %v6106_v56, %v5107_v54  ;;  %2244 = vmatpush.bf16.msrb.mxu1 %v4852_v61  ;;  %v6024_v32 = vld [vmem:[#allocation2 + $0xa4] sm:$0xf]  ;;  %v5192_v37 = vor.u32 %v6124_v27, %v5189_v25 }
 0x1cf   :  { %v4835_v63 = vld [vmem:[#allocation2 + $0x100] sm:$0xf]  ;;  %v6038_v1 = vld [vmem:[#allocation2 + $0x10c] sm:$0xf0]  ;;  %v4708_v11 = vor.u32 %v6006_v60, %v4707_v58  ;;  %2257 = vmatpush.bf16.msrb.mxu2 %v4980_v62  ;;  %v4789_v34 = vld [vmem:[#allocation2 + $0xb0] sm:$0xf0] }
 0x1d0   :  { %v4963_v2 = vld [vmem:[#allocation2 + $0x200] sm:$0xf]  ;;  %v6070_v4 = vld [vmem:[#allocation2 + $0x20c] sm:$0xf0]  ;;  %v4836_v15 = vor.u32 %v6038_v1, %v4835_v63  ;;  %2270 = vmatpush.bf16.msrb.mxu3 %v5108_v3  ;;  %v6056_v36 = vld [vmem:[#allocation2 + $0x1a4] sm:$0xf]  ;;  %v4792_v45 = vor.u32 %v6024_v32, %v4789_v34 }
 0x1d1   :  { %v5091_v6 = vld [vmem:[#allocation2 + $0x300] sm:$0xf]  ;;  %v6102_v7 = vld [vmem:[#allocation2 + $0x30c] sm:$0xf0]  ;;  %v4964_v17 = vor.u32 %v6070_v4, %v4963_v2  ;;  %2232 = vmatpush.bf16.msrb.mxu0 %v4708_v11  ;;  %v4917_v38 = vld [vmem:[#allocation2 + $0x1b0] sm:$0xf0] }
 0x1d2   :  { %v5092_v16 = vor.u32 %v6102_v7, %v5091_v6  ;;  %2245 = vmatpush.bf16.msrb.mxu1 %v4836_v15  ;;  %v6088_v41 = vld [vmem:[#allocation2 + $0x2a4] sm:$0xf]  ;;  %v5045_v42 = vld [vmem:[#allocation2 + $0x2b0] sm:$0xf0]  ;;  %v4920_v46 = vor.u32 %v6056_v36, %v4917_v38 }
 0x1d3   :  { %2258 = vmatpush.bf16.msrb.mxu2 %v4964_v17  ;;  %v6120_v43 = vld [vmem:[#allocation2 + $0x3a4] sm:$0xf]  ;;  %v5173_v44 = vld [vmem:[#allocation2 + $0x3b0] sm:$0xf0]  ;;  %v5048_v47 = vor.u32 %v6088_v41, %v5045_v42 }
 0x1d4   :  { %2271 = vmatpush.bf16.msrb.mxu3 %v5092_v16  ;;  %2233 = vmatmul.bf16.vlgmr.msrb.gmra.mxu0 %v6687_v31  ;;  %v6020_v48 = vld [vmem:[#allocation2 + $0x84] sm:$0xf]  ;;  %v4773_v49 = vld [vmem:[#allocation2 + $0x90] sm:$0xf0]  ;;  %v5176_v51 = vor.u32 %v6120_v43, %v5173_v44 }
 0x1d5   :  { %2277 = vmatpush.bf16.msra.mxu0 %v4824_v40  ;;  %2246 = vmatmul.bf16.vlgmr.msrb.gmra.mxu1 %v6689_v33  ;;  %v6052_v50 = vld [vmem:[#allocation2 + $0x184] sm:$0xf]  ;;  %v4901_v52 = vld [vmem:[#allocation2 + $0x190] sm:$0xf0]  ;;  %v4776_v58 = vor.u32 %v6020_v48, %v4773_v49  ;;  %v4955_v48 = vld [vmem:[#allocation2 + $0x1e8] sm:$0xf] }
 0x1d6   :  { %2290 = vmatpush.bf16.msra.mxu1 %v4952_v18  ;;  %2259 = vmatmul.bf16.vlgmr.msrb.gmra.mxu2 %v6691_v39  ;;  %v6084_v53 = vld [vmem:[#allocation2 + $0x284] sm:$0xf]  ;;  %v5029_v54 = vld [vmem:[#allocation2 + $0x290] sm:$0xf0]  ;;  %v4904_v60 = vor.u32 %v6052_v50, %v4901_v52  ;;  %v6067_v50 = vld [vmem:[#allocation2 + $0x1f4] sm:$0xf0] }
 0x1d7   :  { %2303 = vmatpush.bf16.msra.mxu2 %v5080_v19  ;;  %2272 = vmatmul.bf16.vlgmr.msrb.gmra.mxu3 %v6693_v59  ;;  %v6116_v56 = vld [vmem:[#allocation2 + $0x384] sm:$0xf]  ;;  %v5157_v57 = vld [vmem:[#allocation2 + $0x390] sm:$0xf0]  ;;  %v5032_v61 = vor.u32 %v6084_v53, %v5029_v54  ;;  %v6099_v52 = vld [vmem:[#allocation2 + $0x2f4] sm:$0xf0] }
 0x1d8   :  { %2316 = vmatpush.bf16.msra.mxu3 %v5208_v23  ;;  %v6016_v62 = vld [vmem:[#allocation2 + $0x64] sm:$0xf]  ;;  %v4757_v63 = vld [vmem:[#allocation2 + $0x70] sm:$0xf0]  ;;  %v5160_v2 = vor.u32 %v6116_v56, %v5157_v57  ;;  %v5211_v56 = vld [vmem:[#allocation2 + $0x3e8] sm:$0xf] }
 0x1d9   :  { %2278 = vmatpush.bf16.msra.mxu0 %v4808_v26  ;;  %v6048_v1 = vld [vmem:[#allocation2 + $0x164] sm:$0xf]  ;;  %v4885_v3 = vld [vmem:[#allocation2 + $0x170] sm:$0xf0]  ;;  %v4760_v9 = vor.u32 %v6016_v62, %v4757_v63  ;;  %v6131_v57 = vld [vmem:[#allocation2 + $0x3f4] sm:$0xf0] }
 0x1da   :  { %2291 = vmatpush.bf16.msra.mxu1 %v4936_v28  ;;  %v6080_v4 = vld [vmem:[#allocation2 + $0x264] sm:$0xf]  ;;  %v5013_v6 = vld [vmem:[#allocation2 + $0x270] sm:$0xf0]  ;;  %v4888_v10 = vor.u32 %v6048_v1, %v4885_v3  ;;  %v4811_v63 = vld [vmem:[#allocation2 + $0xc8] sm:$0xf]  ;;  %v5212_v3 = vor.u32 %v6131_v57, %v5211_v56 }
 0x1db   :  { %2304 = vmatpush.bf16.msra.mxu2 %v5064_v55  ;;  %v6112_v7 = vld [vmem:[#allocation2 + $0x364] sm:$0xf]  ;;  %v5141_v8 = vld [vmem:[#allocation2 + $0x370] sm:$0xf0]  ;;  %v5016_v11 = vor.u32 %v6080_v4, %v5013_v6  ;;  %v6031_v1 = vld [vmem:[#allocation2 + $0xd4] sm:$0xf0] }
 0x1dc   :  { %2317 = vmatpush.bf16.msra.mxu3 %v5192_v37  ;;  %v6012_v12 = vld [vmem:[#allocation2 + $0x44] sm:$0xf]  ;;  %v4741_v13 = vld [vmem:[#allocation2 + $0x50] sm:$0xf0]  ;;  %v5144_v15 = vor.u32 %v6112_v7, %v5141_v8  ;;  %v6063_v4 = vld [vmem:[#allocation2 + $0x1d4] sm:$0xf0] }
 0x1dd   :  { %2279 = vmatpush.bf16.msra.mxu0 %v4792_v45  ;;  %v6044_v14 = vld [vmem:[#allocation2 + $0x144] sm:$0xf]  ;;  %v4869_v17 = vld [vmem:[#allocation2 + $0x150] sm:$0xf0]  ;;  %v4744_v18 = vor.u32 %v6012_v12, %v4741_v13  ;;  %v5067_v6 = vld [vmem:[#allocation2 + $0x2c8] sm:$0xf] }
 0x1de   :  { %2292 = vmatpush.bf16.msra.mxu1 %v4920_v46  ;;  %v6076_v30 = vld [vmem:[#allocation2 + $0x244] sm:$0xf]  ;;  %v4997_v35 = vld [vmem:[#allocation2 + $0x250] sm:$0xf0]  ;;  %v4872_v19 = vor.u32 %v6044_v14, %v4869_v17  ;;  %v4827_v46 = vld [vmem:[#allocation2 + $0xe8] sm:$0xf] }
 0x1df   :  { %2305 = vmatpush.bf16.msra.mxu2 %v5048_v47  ;;  %v6108_v16 = vld [vmem:[#allocation2 + $0x344] sm:$0xf]  ;;  %v5125_v40 = vld [vmem:[#allocation2 + $0x350] sm:$0xf0]  ;;  %v5000_v20 = vor.u32 %v6076_v30, %v4997_v35  ;;  %v6035_v47 = vld [vmem:[#allocation2 + $0xf4] sm:$0xf0] }
 0x1e0   :  { %2318 = vmatpush.bf16.msra.mxu3 %v5176_v51  ;;  %v6008_v21 = vld [vmem:[#allocation2 + $0x24] sm:$0xf]  ;;  %v4725_v22 = vld [vmem:[#allocation2 + $0x30] sm:$0xf0]  ;;  %v5128_v24 = vor.u32 %v6108_v16, %v5125_v40  ;;  %v5083_v51 = vld [vmem:[#allocation2 + $0x2e8] sm:$0xf] }
 0x1e1   :  { %2280 = vmatpush.bf16.msra.mxu0 %v4776_v58  ;;  %v6040_v23 = vld [vmem:[#allocation2 + $0x124] sm:$0xf]  ;;  %v4853_v0 = vld [vmem:[#allocation2 + $0x130] sm:$0xf0]  ;;  %v4728_v28 = vor.u32 %v6008_v21, %v4725_v22  ;;  %v5084_v62 = vor.u32 %v6099_v52, %v5083_v51  ;;  %v6095_v7 = vld [vmem:[#allocation2 + $0x2d4] sm:$0xf0] }
 0x1e2   :  { %2293 = vmatpush.bf16.msra.mxu1 %v4904_v60  ;;  %v6072_v5 = vld [vmem:[#allocation2 + $0x224] sm:$0xf]  ;;  %v4981_v27 = vld [vmem:[#allocation2 + $0x230] sm:$0xf0]  ;;  %v4856_v34 = vor.u32 %v6040_v23, %v4853_v0  ;;  %v4828_v60 = vor.u32 %v6035_v47, %v4827_v46  ;;  %v5195_v8 = vld [vmem:[#allocation2 + $0x3c8] sm:$0xf]  ;;  %v5068_v12 = vor.u32 %v6095_v7, %v5067_v6 }
 0x1e3   :  { %2306 = vmatpush.bf16.msra.mxu2 %v5032_v61  ;;  %v6104_v25 = vld [vmem:[#allocation2 + $0x324] sm:$0xf]  ;;  %v5109_v26 = vld [vmem:[#allocation2 + $0x330] sm:$0xf0]  ;;  %v4984_v36 = vor.u32 %v6072_v5, %v4981_v27  ;;  %v4956_v61 = vor.u32 %v6067_v50, %v4955_v48  ;;  %v4795_v13 = vld [vmem:[#allocation2 + $0xa8] sm:$0xf] }
 0x1e4   :  { %2319 = vmatpush.bf16.msra.mxu3 %v5160_v2  ;;  %v6004_v55 = vld [vmem:[#allocation2 + $0x4] sm:$0xf]  ;;  %v4709_v32 = vld [vmem:[#allocation2 + $0x10] sm:$0xf0]  ;;  %v5112_v42 = vor.u32 %v6104_v25, %v5109_v26  ;;  %v4939_v2 = vld [vmem:[#allocation2 + $0x1c8] sm:$0xf] }
 0x1e5   :  { %2281 = vmatpush.bf16.msra.mxu0 %v4760_v9  ;;  %v6036_v37 = vld [vmem:[#allocation2 + $0x104] sm:$0xf]  ;;  %v4837_v38 = vld [vmem:[#allocation2 + $0x110] sm:$0xf0]  ;;  %v4712_v49 = vor.u32 %v6004_v55, %v4709_v32  ;;  %v6127_v9 = vld [vmem:[#allocation2 + $0x3d4] sm:$0xf0] }
 0x1e6   :  { %2294 = vmatpush.bf16.msra.mxu1 %v4888_v10  ;;  %v6068_v41 = vld [vmem:[#allocation2 + $0x204] sm:$0xf]  ;;  %v4965_v43 = vld [vmem:[#allocation2 + $0x210] sm:$0xf0]  ;;  %v4840_v53 = vor.u32 %v6036_v37, %v4837_v38  ;;  %v4812_v10 = vor.u32 %v6031_v1, %v4811_v63  ;;  %v6027_v14 = vld [vmem:[#allocation2 + $0xb4] sm:$0xf0]  ;;  %v5196_v17 = vor.u32 %v6127_v9, %v5195_v8 }
 0x1e7   :  { %2307 = vmatpush.bf16.msra.mxu2 %v5016_v11  ;;  %v6100_v44 = vld [vmem:[#allocation2 + $0x304] sm:$0xf]  ;;  %v5093_v45 = vld [vmem:[#allocation2 + $0x310] sm:$0xf0]  ;;  %v4968_v54 = vor.u32 %v6068_v41, %v4965_v43  ;;  %v4940_v11 = vor.u32 %v6063_v4, %v4939_v2  ;;  %v6059_v30 = vld [vmem:[#allocation2 + $0x1b4] sm:$0xf0] }
 0x1e8   :  { %2320 = vmatpush.bf16.msra.mxu3 %v5144_v15  ;;  %v5096_v58 = vor.u32 %v6100_v44, %v5093_v45  ;;  %v4923_v15 = vld [vmem:[#allocation2 + $0x1a8] sm:$0xf]  ;;  %v6091_v16 = vld [vmem:[#allocation2 + $0x2b4] sm:$0xf0] }
 0x1e9   :  { %2282 = vmatpush.bf16.msra.mxu0 %v4744_v18  ;;  %v5051_v35 = vld [vmem:[#allocation2 + $0x2a8] sm:$0xf]  ;;  %v6123_v18 = vld [vmem:[#allocation2 + $0x3b4] sm:$0xf0] }
 0x1ea   :  { %2295 = vmatpush.bf16.msra.mxu1 %v4872_v19  ;;  %v5179_v40 = vld [vmem:[#allocation2 + $0x3a8] sm:$0xf]  ;;  %v4796_v19 = vor.u32 %v6027_v14, %v4795_v13  ;;  %v5052_v21 = vor.u32 %v6091_v16, %v5051_v35  ;;  %v6023_v23 = vld [vmem:[#allocation2 + $0x94] sm:$0xf0] }
 0x1eb   :  { %2308 = vmatpush.bf16.msra.mxu2 %v5000_v20  ;;  %v4924_v20 = vor.u32 %v6059_v30, %v4923_v15  ;;  %v4779_v22 = vld [vmem:[#allocation2 + $0x88] sm:$0xf]  ;;  %v5180_v0 = vor.u32 %v6123_v18, %v5179_v40  ;;  %v6055_v5 = vld [vmem:[#allocation2 + $0x194] sm:$0xf0] }
 0x1ec   :  { %2321 = vmatpush.bf16.msra.mxu3 %v5128_v24  ;;  %v4907_v24 = vld [vmem:[#allocation2 + $0x188] sm:$0xf]  ;;  %v6087_v25 = vld [vmem:[#allocation2 + $0x294] sm:$0xf0]  ;;  %v4780_v55 = vor.u32 %v6023_v23, %v4779_v22  ;;  %v6065_v22 = vld [vmem:[#allocation2 + $0x1ec] sm:$0xf] }
 0x1ed   :  { %2283 = vmatpush.bf16.msra.mxu0 %v4728_v28  ;;  %v5035_v27 = vld [vmem:[#allocation2 + $0x288] sm:$0xf]  ;;  %v6119_v28 = vld [vmem:[#allocation2 + $0x394] sm:$0xf0]  ;;  %v4908_v32 = vor.u32 %v6055_v5, %v4907_v24  ;;  %v4957_v24 = vld [vmem:[#allocation2 + $0x1f8] sm:$0xf0] }
 0x1ee   :  { %2296 = vmatpush.bf16.msra.mxu1 %v4856_v34  ;;  %v5163_v26 = vld [vmem:[#allocation2 + $0x388] sm:$0xf]  ;;  %v5036_v34 = vor.u32 %v6087_v25, %v5035_v27  ;;  %v6019_v37 = vld [vmem:[#allocation2 + $0x74] sm:$0xf0]  ;;  %v5085_v5 = vld [vmem:[#allocation2 + $0x2f8] sm:$0xf0] }
 0x1ef   :  { %2309 = vmatpush.bf16.msra.mxu2 %v4984_v36  ;;  %v4763_v36 = vld [vmem:[#allocation2 + $0x68] sm:$0xf]  ;;  %v5164_v41 = vor.u32 %v6119_v28, %v5163_v26  ;;  %v6083_v44 = vld [vmem:[#allocation2 + $0x274] sm:$0xf0]  ;;  %v6129_v26 = vld [vmem:[#allocation2 + $0x3ec] sm:$0xf] }
 0x1f0   :  { %2322 = vmatpush.bf16.msra.mxu3 %v5112_v42  ;;  %v4891_v38 = vld [vmem:[#allocation2 + $0x168] sm:$0xf]  ;;  %v6051_v42 = vld [vmem:[#allocation2 + $0x174] sm:$0xf0]  ;;  %v4764_v47 = vor.u32 %v6019_v37, %v4763_v36  ;;  %v5213_v28 = vld [vmem:[#allocation2 + $0x3f8] sm:$0xf0] }
 0x1f1   :  { %2284 = vmatpush.bf16.msra.mxu0 %v4712_v49  ;;  %v5019_v43 = vld [vmem:[#allocation2 + $0x268] sm:$0xf]  ;;  %v6115_v46 = vld [vmem:[#allocation2 + $0x374] sm:$0xf0]  ;;  %v4892_v48 = vor.u32 %v6051_v42, %v4891_v38  ;;  %v6029_v37 = vld [vmem:[#allocation2 + $0xcc] sm:$0xf]  ;;  %v5216_v42 = vor.u32 %v6129_v26, %v5213_v28 }
 0x1f2   :  { %2297 = vmatpush.bf16.msra.mxu1 %v4840_v53  ;;  %v5147_v45 = vld [vmem:[#allocation2 + $0x368] sm:$0xf]  ;;  %v5020_v49 = vor.u32 %v6083_v44, %v5019_v43  ;;  %v6015_v51 = vld [vmem:[#allocation2 + $0x54] sm:$0xf0]  ;;  %v4813_v38 = vld [vmem:[#allocation2 + $0xd8] sm:$0xf0] }
 0x1f3   :  { %2310 = vmatpush.bf16.msra.mxu2 %v4968_v54  ;;  %v4747_v50 = vld [vmem:[#allocation2 + $0x48] sm:$0xf]  ;;  %v5148_v53 = vor.u32 %v6115_v46, %v5147_v45  ;;  %v6047_v54 = vld [vmem:[#allocation2 + $0x154] sm:$0xf0]  ;;  %v4941_v43 = vld [vmem:[#allocation2 + $0x1d8] sm:$0xf0] }
 0x1f4   :  { %2323 = vmatpush.bf16.msra.mxu3 %v5096_v58  ;;  %2285 = vmatmul.bf16.vlgmr.msra.gmra.mxu0 %v6687_v31  ;;  %v4875_v52 = vld [vmem:[#allocation2 + $0x148] sm:$0xf]  ;;  %v6079_v57 = vld [vmem:[#allocation2 + $0x254] sm:$0xf0]  ;;  %v6093_v44 = vld [vmem:[#allocation2 + $0x2cc] sm:$0xf] }
 0x1f5   :  { %2329 = vmatpush.bf16.msrb.mxu0 %v4828_v60  ;;  %2298 = vmatmul.bf16.vlgmr.msra.gmra.mxu1 %v6689_v33  ;;  %v5003_v56 = vld [vmem:[#allocation2 + $0x248] sm:$0xf]  ;;  %v6111_v60 = vld [vmem:[#allocation2 + $0x354] sm:$0xf0]  ;;  %v5069_v45 = vld [vmem:[#allocation2 + $0x2d8] sm:$0xf0] }
 0x1f6   :  { %2342 = vmatpush.bf16.msrb.mxu1 %v4956_v61  ;;  %2311 = vmatmul.bf16.vlgmr.msra.gmra.mxu2 %v6691_v39  ;;  %v5131_v58 = vld [vmem:[#allocation2 + $0x348] sm:$0xf]  ;;  %v4748_v61 = vor.u32 %v6015_v51, %v4747_v50  ;;  %v5004_v63 = vor.u32 %v6079_v57, %v5003_v56  ;;  %v6011_v2 = vld [vmem:[#allocation2 + $0x34] sm:$0xf0]  ;;  %v6125_v46 = vld [vmem:[#allocation2 + $0x3cc] sm:$0xf]  ;;  %v5072_v50 = vor.u32 %v6093_v44, %v5069_v45 }
 0x1f7   :  { %2355 = vmatpush.bf16.msrb.mxu2 %v5084_v62  ;;  %2324 = vmatmul.bf16.vlgmr.msra.gmra.mxu3 %v6693_v59  ;;  %v4876_v62 = vor.u32 %v6047_v54, %v4875_v52  ;;  %v4731_v1 = vld [vmem:[#allocation2 + $0x28] sm:$0xf]  ;;  %v5132_v4 = vor.u32 %v6111_v60, %v5131_v58  ;;  %v6043_v6 = vld [vmem:[#allocation2 + $0x134] sm:$0xf0]  ;;  %v6025_v51 = vld [vmem:[#allocation2 + $0xac] sm:$0xf] }
 0x1f8   :  { %2368 = vmatpush.bf16.msrb.mxu3 %v5212_v3  ;;  %v4859_v3 = vld [vmem:[#allocation2 + $0x128] sm:$0xf]  ;;  %v6075_v8 = vld [vmem:[#allocation2 + $0x234] sm:$0xf0]  ;;  %v4797_v52 = vld [vmem:[#allocation2 + $0xb8] sm:$0xf0] }
 0x1f9   :  { %2330 = vmatpush.bf16.msrb.mxu0 %v4812_v10  ;;  %v4987_v7 = vld [vmem:[#allocation2 + $0x228] sm:$0xf]  ;;  %v6107_v10 = vld [vmem:[#allocation2 + $0x334] sm:$0xf0]  ;;  %v4860_v14 = vor.u32 %v6043_v6, %v4859_v3  ;;  %v4925_v56 = vld [vmem:[#allocation2 + $0x1b8] sm:$0xf0] }
 0x1fa   :  { %2343 = vmatpush.bf16.msrb.mxu1 %v4940_v11  ;;  %v5115_v9 = vld [vmem:[#allocation2 + $0x328] sm:$0xf]  ;;  %v4732_v11 = vor.u32 %v6011_v2, %v4731_v1  ;;  %v6007_v13 = vld [vmem:[#allocation2 + $0x14] sm:$0xf0]  ;;  %v4988_v15 = vor.u32 %v6075_v8, %v4987_v7  ;;  %v6089_v57 = vld [vmem:[#allocation2 + $0x2ac] sm:$0xf] }
 0x1fb   :  { %2356 = vmatpush.bf16.msrb.mxu2 %v5068_v12  ;;  %v4715_v12 = vld [vmem:[#allocation2 + $0x8] sm:$0xf]  ;;  %v6039_v30 = vld [vmem:[#allocation2 + $0x114] sm:$0xf0]  ;;  %v5116_v16 = vor.u32 %v6107_v10, %v5115_v9  ;;  %v5053_v58 = vld [vmem:[#allocation2 + $0x2b8] sm:$0xf0] }
 0x1fc   :  { %2369 = vmatpush.bf16.msrb.mxu3 %v5196_v17  ;;  %v4843_v17 = vld [vmem:[#allocation2 + $0x108] sm:$0xf]  ;;  %v6071_v40 = vld [vmem:[#allocation2 + $0x214] sm:$0xf0]  ;;  %v4716_v23 = vor.u32 %v6007_v13, %v4715_v12  ;;  %v6121_v60 = vld [vmem:[#allocation2 + $0x3ac] sm:$0xf]  ;;  %v5056_v1 = vor.u32 %v6089_v57, %v5053_v58 }
 0x1fd   :  { %2331 = vmatpush.bf16.msrb.mxu0 %v4796_v19  ;;  %v4971_v35 = vld [vmem:[#allocation2 + $0x208] sm:$0xf]  ;;  %v6103_v19 = vld [vmem:[#allocation2 + $0x314] sm:$0xf0]  ;;  %v4844_v27 = vor.u32 %v6039_v30, %v4843_v17  ;;  %v6021_v2 = vld [vmem:[#allocation2 + $0x8c] sm:$0xf] }
 0x1fe   :  { %2344 = vmatpush.bf16.msrb.mxu1 %v4924_v20  ;;  %v5099_v18 = vld [vmem:[#allocation2 + $0x308] sm:$0xf]  ;;  %v6033_v20 = vld [vmem:[#allocation2 + $0xec] sm:$0xf]  ;;  %v4972_v25 = vor.u32 %v6071_v40, %v4971_v35  ;;  %v4781_v3 = vld [vmem:[#allocation2 + $0x98] sm:$0xf0] }
 0x1ff   :  { %2357 = vmatpush.bf16.msrb.mxu2 %v5052_v21  ;;  %v4829_v21 = vld [vmem:[#allocation2 + $0xf8] sm:$0xf0]  ;;  %v6085_v8 = vld [vmem:[#allocation2 + $0x28c] sm:$0xf]  ;;  %v4784_v12 = vor.u32 %v6021_v2, %v4781_v3 }
 0x200   :  { %2370 = vmatpush.bf16.msrb.mxu3 %v5180_v0  ;;  %v6097_v0 = vld [vmem:[#allocation2 + $0x2ec] sm:$0xf]  ;;  %v4909_v7 = vld [vmem:[#allocation2 + $0x198] sm:$0xf0] }
 0x201   :  { %2332 = vmatpush.bf16.msrb.mxu0 %v4780_v55  ;;  %v5100_v55 = vor.u32 %v6103_v19, %v5099_v18  ;;  %v5088_v36 = vor.u32 %v6097_v0, %v5085_v5  ;;  %v5037_v9 = vld [vmem:[#allocation2 + $0x298] sm:$0xf0]  ;;  %v6117_v10 = vld [vmem:[#allocation2 + $0x38c] sm:$0xf] }
 0x202   :  { %2345 = vmatpush.bf16.msrb.mxu1 %v4908_v32  ;;  %v4832_v32 = vor.u32 %v6033_v20, %v4829_v21  ;;  %v4765_v17 = vld [vmem:[#allocation2 + $0x78] sm:$0xf0]  ;;  %v6049_v30 = vld [vmem:[#allocation2 + $0x16c] sm:$0xf] }
 0x203   :  { %2358 = vmatpush.bf16.msrb.mxu2 %v5036_v34  ;;  %v4960_v34 = vor.u32 %v6065_v22, %v4957_v24  ;;  %v6081_v40 = vld [vmem:[#allocation2 + $0x26c] sm:$0xf]  ;;  %v5021_v18 = vld [vmem:[#allocation2 + $0x278] sm:$0xf0] }
 0x204   :  { %2371 = vmatpush.bf16.msrb.mxu3 %v5164_v41  ;;  %v6061_v41 = vld [vmem:[#allocation2 + $0x1cc] sm:$0xf]  ;;  %v5149_v20 = vld [vmem:[#allocation2 + $0x378] sm:$0xf0] }
 0x205   :  { %2333 = vmatpush.bf16.msrb.mxu0 %v4764_v47  ;;  %v5197_v47 = vld [vmem:[#allocation2 + $0x3d8] sm:$0xf0]  ;;  %v6113_v19 = vld [vmem:[#allocation2 + $0x36c] sm:$0xf] }
 0x206   :  { %2346 = vmatpush.bf16.msrb.mxu1 %v4892_v48  ;;  %v4816_v48 = vor.u32 %v6029_v37, %v4813_v38  ;;  %v5200_v54 = vor.u32 %v6125_v46, %v5197_v47  ;;  %v6013_v24 = vld [vmem:[#allocation2 + $0x4c] sm:$0xf]  ;;  %v4749_v0 = vld [vmem:[#allocation2 + $0x58] sm:$0xf0] }
 0x207   :  { %2359 = vmatpush.bf16.msrb.mxu2 %v5020_v49  ;;  %v4944_v49 = vor.u32 %v6061_v41, %v4941_v43  ;;  %v6045_v5 = vld [vmem:[#allocation2 + $0x14c] sm:$0xf]  ;;  %v5005_v28 = vld [vmem:[#allocation2 + $0x258] sm:$0xf0] }
 0x208   :  { %2372 = vmatpush.bf16.msrb.mxu3 %v5148_v53  ;;  %v6057_v53 = vld [vmem:[#allocation2 + $0x1ac] sm:$0xf]  ;;  %v4733_v41 = vld [vmem:[#allocation2 + $0x38] sm:$0xf0] }
 0x209   :  { %2334 = vmatpush.bf16.msrb.mxu0 %v4748_v61  ;;  %v5181_v61 = vld [vmem:[#allocation2 + $0x3b8] sm:$0xf0]  ;;  %v6077_v26 = vld [vmem:[#allocation2 + $0x24c] sm:$0xf] }
 0x20a   :  { %2347 = vmatpush.bf16.msrb.mxu1 %v4876_v62  ;;  %v4800_v62 = vor.u32 %v6025_v51, %v4797_v52  ;;  %v5184_v6 = vor.u32 %v6121_v60, %v5181_v61  ;;  %v5008_v37 = vor.u32 %v6077_v26, %v5005_v28  ;;  %v6009_v38 = vld [vmem:[#allocation2 + $0x2c] sm:$0xf]  ;;  %v4861_v44 = vld [vmem:[#allocation2 + $0x138] sm:$0xf0] }
 0x20b   :  { %2360 = vmatpush.bf16.msrb.mxu2 %v5004_v63  ;;  %v4928_v63 = vor.u32 %v6057_v53, %v4925_v56  ;;  %v6073_v45 = vld [vmem:[#allocation2 + $0x22c] sm:$0xf]  ;;  %v4989_v46 = vld [vmem:[#allocation2 + $0x238] sm:$0xf0] }
 0x20c   :  { %2373 = vmatpush.bf16.msrb.mxu3 %v5132_v4  ;;  %v6053_v4 = vld [vmem:[#allocation2 + $0x18c] sm:$0xf]  ;;  %v4992_v51 = vor.u32 %v6073_v45, %v4989_v46  ;;  %v4717_v53 = vld [vmem:[#allocation2 + $0x18] sm:$0xf0] }
 0x20d   :  { %2335 = vmatpush.bf16.msrb.mxu0 %v4732_v11  ;;  %v5165_v11 = vld [vmem:[#allocation2 + $0x398] sm:$0xf0]  ;;  %v4912_v13 = vor.u32 %v6053_v4, %v4909_v7  ;;  %v6105_v47 = vld [vmem:[#allocation2 + $0x32c] sm:$0xf] }
 0x20e   :  { %2348 = vmatpush.bf16.msrb.mxu1 %v4860_v14  ;;  %v5040_v14 = vor.u32 %v6085_v8, %v5037_v9  ;;  %v5168_v35 = vor.u32 %v6117_v10, %v5165_v11  ;;  %v6005_v52 = vld [vmem:[#allocation2 + $0xc] sm:$0xf]  ;;  %v4845_v57 = vld [vmem:[#allocation2 + $0x118] sm:$0xf0] }
 0x20f   :  { %2361 = vmatpush.bf16.msrb.mxu2 %v4988_v15  ;;  %v6017_v15 = vld [vmem:[#allocation2 + $0x6c] sm:$0xf]  ;;  %v4973_v60 = vld [vmem:[#allocation2 + $0x218] sm:$0xf0] }
 0x210   :  { %2374 = vmatpush.bf16.msrb.mxu3 %v5116_v16  ;;  %v4893_v16 = vld [vmem:[#allocation2 + $0x178] sm:$0xf0]  ;;  %v4768_v21 = vor.u32 %v6017_v15, %v4765_v17  ;;  %v6069_v58 = vld [vmem:[#allocation2 + $0x20c] sm:$0xf] }
 0x211   :  { %2336 = vmatpush.bf16.msrb.mxu0 %v4716_v23  ;;  %v4896_v22 = vor.u32 %v6049_v30, %v4893_v16  ;;  %v5024_v23 = vor.u32 %v6081_v40, %v5021_v18  ;;  %v6101_v61 = vld [vmem:[#allocation2 + $0x30c] sm:$0xf]  ;;  %v4976_v2 = vor.u32 %v6069_v58, %v4973_v60 }
 0x212   :  { %2349 = vmatpush.bf16.msrb.mxu1 %v4844_v27  ;;  %v5152_v27 = vor.u32 %v6113_v19, %v5149_v20 }
 0x213   :  { %2362 = vmatpush.bf16.msrb.mxu2 %v4972_v25  ;;  %v4877_v25 = vld [vmem:[#allocation2 + $0x158] sm:$0xf0] }
 0x214   :  { %2375 = vmatpush.bf16.msrb.mxu3 %v5100_v55  ;;  %2337 = vmatmul.bf16.vlgmr.msrb.gmra.mxu0 %v6687_v31  ;;  %v6109_v55 = vld [vmem:[#allocation2 + $0x34c] sm:$0xf] }
 0x215   :  { %2381 = vmatpush.bf16.msra.mxu0 %v4832_v32  ;;  %2350 = vmatmul.bf16.vlgmr.msrb.gmra.mxu1 %v6689_v33  ;;  %v5133_v32 = vld [vmem:[#allocation2 + $0x358] sm:$0xf0] }
 0x216   :  { %2394 = vmatpush.bf16.msra.mxu1 %v4960_v34  ;;  %2363 = vmatmul.bf16.vlgmr.msrb.gmra.mxu2 %v6691_v39  ;;  %v4752_v34 = vor.u32 %v6013_v24, %v4749_v0  ;;  %v5136_v43 = vor.u32 %v6109_v55, %v5133_v32 }
 0x217   :  { %2407 = vmatpush.bf16.msra.mxu2 %v5088_v36  ;;  %2376 = vmatmul.bf16.vlgmr.msrb.gmra.mxu3 %v6693_v59  ;;  %v4880_v36 = vor.u32 %v6045_v5, %v4877_v25 }
 0x218   :  { %2420 = vmatpush.bf16.msra.mxu3 %v5216_v42  ;;  %v6041_v42 = vld [vmem:[#allocation2 + $0x12c] sm:$0xf] }
 0x219   :  { %2382 = vmatpush.bf16.msra.mxu0 %v4816_v48  ;;  %v5117_v48 = vld [vmem:[#allocation2 + $0x338] sm:$0xf0] }
 0x21a   :  { %2395 = vmatpush.bf16.msra.mxu1 %v4944_v49  ;;  %v4736_v49 = vor.u32 %v6009_v38, %v4733_v41  ;;  %v5120_v56 = vor.u32 %v6105_v47, %v5117_v48 }
 0x21b   :  { %2408 = vmatpush.bf16.msra.mxu2 %v5072_v50  ;;  %v4864_v50 = vor.u32 %v6041_v42, %v4861_v44 }
 0x21c   :  { %2421 = vmatpush.bf16.msra.mxu3 %v5200_v54  ;;  %v6037_v54 = vld [vmem:[#allocation2 + $0x10c] sm:$0xf] }
 0x21d   :  { %2383 = vmatpush.bf16.msra.mxu0 %v4800_v62  ;;  %v5101_v62 = vld [vmem:[#allocation2 + $0x318] sm:$0xf0] }
 0x21e   :  { %2396 = vmatpush.bf16.msra.mxu1 %v4928_v63  ;;  %v4720_v63 = vor.u32 %v6005_v52, %v4717_v53  ;;  %v5104_v3 = vor.u32 %v6101_v61, %v5101_v62 }
 0x21f   :  { %2409 = vmatpush.bf16.msra.mxu2 %v5056_v1  ;;  %v4848_v1 = vor.u32 %v6037_v54, %v4845_v57 }
 0x220   :  { %2422 = vmatpush.bf16.msra.mxu3 %v5184_v6 }
 0x221   :  { %2384 = vmatpush.bf16.msra.mxu0 %v4784_v12 }
 0x222   :  { %2397 = vmatpush.bf16.msra.mxu1 %v4912_v13 }
 0x223   :  { %2410 = vmatpush.bf16.msra.mxu2 %v5040_v14 }
 0x224   :  { %2423 = vmatpush.bf16.msra.mxu3 %v5168_v35 }
 0x225   :  { %2385 = vmatpush.bf16.msra.mxu0 %v4768_v21 }
 0x226   :  { %2398 = vmatpush.bf16.msra.mxu1 %v4896_v22 }
 0x227   :  { %2411 = vmatpush.bf16.msra.mxu2 %v5024_v23 }
 0x228   :  { %2424 = vmatpush.bf16.msra.mxu3 %v5152_v27 }
 0x229   :  { %2386 = vmatpush.bf16.msra.mxu0 %v4752_v34 }
 0x22a   :  { %2399 = vmatpush.bf16.msra.mxu1 %v4880_v36 }
 0x22b   :  { %2412 = vmatpush.bf16.msra.mxu2 %v5008_v37 }
 0x22c   :  { %2425 = vmatpush.bf16.msra.mxu3 %v5136_v43 }
 0x22d   :  { %2387 = vmatpush.bf16.msra.mxu0 %v4736_v49 }
 0x22e   :  { %2400 = vmatpush.bf16.msra.mxu1 %v4864_v50 }
 0x22f   :  { %2413 = vmatpush.bf16.msra.mxu2 %v4992_v51 }
 0x230   :  { %2426 = vmatpush.bf16.msra.mxu3 %v5120_v56 }
 0x231   :  { %2388 = vmatpush.bf16.msra.mxu0 %v4720_v63 }
 0x232   :  { %2401 = vmatpush.bf16.msra.mxu1 %v4848_v1 }
 0x233   :  { %2414 = vmatpush.bf16.msra.mxu2 %v4976_v2 }
 0x234   :  { %2427 = vmatpush.bf16.msra.mxu3 %v5104_v3  ;;  %2389 = vmatmul.bf16.vlgmr.msra.gmra.mxu0 %v6687_v31 }
 0x235   :  { %2402 = vmatmul.bf16.vlgmr.msra.gmra.mxu1 %v6689_v33 }
 0x236   :  { %2415 = vmatmul.bf16.vlgmr.msra.gmra.mxu2 %v6691_v39 }
 0x237   :  { %2428 = vmatmul.bf16.vlgmr.msra.gmra.mxu3 %v6693_v59 }
 0x251   :  { %v2234_v4 = vpop.f32.mrf.mxu0 }
 0x252   :  { %v2247_v6 = vpop.f32.mrf.mxu1 }
 0x253   :  { %v2248_v7 = vadd.f32 %v2247_v6, %v2234_v4 }
 0x259   :  { %v2260_v8 = vpop.f32.mrf.mxu2  ;;  %v2236_v12 = vpop.f32.mrf.mxu0 }
 0x25a   :  { %v2261_v9 = vadd.f32 %v2260_v8, %v2248_v7  ;;  %v2273_v10 = vpop.f32.mrf.mxu3  ;;  %v2249_v13 = vpop.f32.mrf.mxu1 }
 0x25c   :  { %v6711_v11 = vadd.f32 %v2273_v10, %v2261_v9 }
 0x25e   :  { %v2435_v28 = vrot.slane %v6711_v11, 4  ;;  %v2463_v55 = vmul.f32 %v6711_v11, %v6711_v11 }
 0x260   :  { %v2436_v43 = vadd.f32 %v2435_v28, %v6711_v11  ;;  %v2467_v44 = vrot.slane %v2463_v55, 4 }
 0x261   :  { %v2262_v14 = vpop.f32.mrf.mxu2 }
 0x262   :  { %v2275_v15 = vpop.f32.mrf.mxu3  ;;  %v2437_v53 = vrot.slane %v2436_v43, 2  ;;  %v2468_v54 = vadd.f32 %v2467_v44, %v2463_v55 }
 0x264   :  { %v2438_v61 = vadd.f32 %v2437_v53, %v2436_v43  ;;  %v2469_v62 = vrot.slane %v2468_v54, 2 }
 0x266   :  { %v2439_v4 = vrot.slane %v2438_v61, 1  ;;  %v2470_v6 = vadd.f32 %v2469_v62, %v2468_v54 }
 0x268   :  { %v2440_v12 = vadd.f32 %v2439_v4, %v2438_v61  ;;  %v2471_v13 = vrot.slane %v2470_v6, 1 }
 0x271   :  { %v2286_v17 = vpop.f32.mrf.mxu0 }
 0x272   :  { %v2299_v31 = vpop.f32.mrf.mxu1 }
 0x273   :  { %v2300_v40 = vadd.f32 %v2299_v31, %v2286_v17 }
 0x279   :  { %v2312_v30 = vpop.f32.mrf.mxu2  ;;  %v2288_v35 = vpop.f32.mrf.mxu0 }
 0x27a   :  { %v2325_v33 = vpop.f32.mrf.mxu3  ;;  %v2301_v39 = vpop.f32.mrf.mxu1  ;;  %v2313_v18 = vadd.f32 %v2312_v30, %v2300_v40  ;;  %v6739_v35 = vmul.f32 %v2440_v12, %v6635_v29 }
 0x27b   :  { %v2472_v39 = vadd.f32 %v2471_v13, %v2470_v6 }
 0x27c   :  { %v6713_v19 = vadd.f32 %v2325_v33, %v2313_v18 }
 0x27e   :  { %v2441_v22 = vrot.slane %v6713_v19, 4  ;;  %v2464_v23 = vmul.f32 %v6713_v19, %v6713_v19 }
 0x280   :  { %v2442_v5 = vadd.f32 %v2441_v22, %v6713_v19  ;;  %v2473_v27 = vrot.slane %v2464_v23, 4 }
 0x281   :  { %v2314_v16 = vpop.f32.mrf.mxu2 }
 0x282   :  { %v2327_v59 = vpop.f32.mrf.mxu3  ;;  %v2443_v37 = vrot.slane %v2442_v5, 2  ;;  %v2474_v38 = vadd.f32 %v2473_v27, %v2464_v23 }
 0x284   :  { %v2444_v48 = vadd.f32 %v2443_v37, %v2442_v5  ;;  %v2475_v49 = vrot.slane %v2474_v38, 2 }
 0x286   :  { %v2445_v58 = vrot.slane %v2444_v48, 1  ;;  %v2476_v60 = vadd.f32 %v2475_v49, %v2474_v38 }
 0x288   :  { %v2446_v2 = vadd.f32 %v2445_v58, %v2444_v48  ;;  %v2477_v3 = vrot.slane %v2476_v60, 1 }
 0x28a   :  { %v6730_v9 = vmul.f32 %v2446_v2, %v6635_v29  ;;  %v2478_v10 = vadd.f32 %v2477_v3, %v2476_v60 }
 0x28c   :  { %v2492_v30 = vmul.f32 %v2478_v10, %v6635_v29  ;;  %v2496_v33 = vmul.f32 %v6730_v9, %v6730_v9 }
 0x28e   :  { %v2500_v18 = vsub.f32 %v2492_v30, %v2496_v33 }
 0x291   :  { %v2338_v20 = vpop.f32.mrf.mxu0 }
 0x292   :  { %v2351_v21 = vpop.f32.mrf.mxu1 }
 0x293   :  { %v2352_v24 = vadd.f32 %v2351_v21, %v2338_v20  ;;  %v2491_v20 = vmul.f32 %v2472_v39, %v6635_v29  ;;  %v2495_v21 = vmul.f32 %v6739_v35, %v6739_v35 }
 0x295   :  { %v2499_v28 = vsub.f32 %v2491_v20, %v2495_v21 }
 0x299   :  { %v2364_v0 = vpop.f32.mrf.mxu2  ;;  %v2340_v34 = vpop.f32.mrf.mxu0 }
 0x29a   :  { %v2365_v25 = vadd.f32 %v2364_v0, %v2352_v24  ;;  %v2377_v26 = vpop.f32.mrf.mxu3  ;;  %v2353_v36 = vpop.f32.mrf.mxu1 }
 0x29c   :  { %v6722_v32 = vadd.f32 %v2377_v26, %v2365_v25  ;;  %v2504_v25 = vmax.f32 %v2500_v18, 0.0 }
 0x29e   :  { %v2447_v41 = vrot.slane %v6722_v32, 4  ;;  %v2465_v42 = vmul.f32 %v6722_v32, %v6722_v32  ;;  %v2508_v37 = vadd.f32 1e-05, %v2504_v25 }
 0x2a0   :  { %v2448_v45 = vadd.f32 %v2447_v41, %v6722_v32  ;;  %v2479_v46 = vrot.slane %v2465_v42, 4  ;;  %6311 = vrsqrt.f32 %v2508_v37  ;;  %vm2527_vm1 = vweird.f32 %v2508_v37 }
 0x2a1   :  { %v2366_v47 = vpop.f32.mrf.mxu2 }
 0x2a2   :  { %v2449_v50 = vrot.slane %v2448_v45, 2  ;;  %v2480_v51 = vadd.f32 %v2479_v46, %v2465_v42  ;;  %v2379_v52 = vpop.f32.mrf.mxu3  ;;  %v2503_v42 = vmax.f32 %v2499_v28, 0.0 }
 0x2a4   :  { %v2450_v56 = vadd.f32 %v2449_v50, %v2448_v45  ;;  %v2481_v57 = vrot.slane %v2480_v51, 2  ;;  %v2507_v50 = vadd.f32 1e-05, %v2503_v42 }
 0x2a6   :  { %v2451_v63 = vrot.slane %v2450_v56, 1  ;;  %v2482_v1 = vadd.f32 %v2481_v57, %v2480_v51  ;;  %vm2517_vm6 = vweird.f32 %v2507_v50 }
 0x2a8   :  { %v2452_v7 = vadd.f32 %v2451_v63, %v2450_v56  ;;  %v2483_v8 = vrot.slane %v2482_v1, 1  ;;  %v6312_v56 = vpop.eup %6311 }
 0x2a9   :  { %v2522_v63 = vmul.f32 %v6312_v56, %v2508_v37  ;;  %vm2528_vm2 = vweird.f32 %v6312_v56 }
 0x2aa   :  { %v6733_v14 = vmul.f32 %v2452_v7, %v6635_v29  ;;  %v2484_v15 = vadd.f32 %v2483_v8, %v2482_v1  ;;  %vm6755_vm3 = vmor %vm2527_vm1, %vm2528_vm2 }
 0x2ab   :  { %v2523_v6 = vmul.f32 %v6312_v56, %v2522_v63 }
 0x2ac   :  { %v2493_v16 = vmul.f32 %v2484_v15, %v6635_v29  ;;  %v2497_v59 = vmul.f32 %v6733_v14, %v6733_v14 }
 0x2ad   :  { %v2524_v12 = vmul.f32 0.5, %v2523_v6 }
 0x2ae   :  { %v2501_v23 = vsub.f32 %v2493_v16, %v2497_v59 }
 0x2b0   :  { %v2505_v55 = vmax.f32 %v2501_v23, 0.0 }
 0x2b1   :  { %v2390_v17 = vpop.f32.mrf.mxu0 }
 0x2b2   :  { %v2403_v31 = vpop.f32.mrf.mxu1  ;;  %v2509_v44 = vadd.f32 1e-05, %v2505_v55 }
 0x2b3   :  { %v2404_v40 = vadd.f32 %v2403_v31, %v2390_v17  ;;  %v2525_v17 = vsub.f32 1.5, %v2524_v12 }
 0x2b4   :  { %6313 = vrsqrt.f32 %v2509_v44  ;;  %vm2537_vm4 = vweird.f32 %v2509_v44 }
 0x2b5   :  { %6315 = vrsqrt.f32 %v2507_v50  ;;  %v2526_v16 = vmul.f32 %v6312_v56, %v2525_v17 }
 0x2b9   :  { %v2416_v22 = vpop.f32.mrf.mxu2  ;;  %v2392_v5 = vpop.f32.mrf.mxu0 }
 0x2ba   :  { %v2417_v24 = vadd.f32 %v2416_v22, %v2404_v40  ;;  %v2429_v0 = vpop.f32.mrf.mxu3  ;;  %v2405_v27 = vpop.f32.mrf.mxu1  ;;  %v2530_v22 = vsel %vm6755_vm3, %v6312_v56, %v2526_v16 }
 0x2bb   :  { %v6314_v60 = vpop.eup %6313  ;;  %v2555_v27 = vrot.slane %v2530_v22, 7 }
 0x2bc   :  { %v6747_v26 = vadd.f32 %v2429_v0, %v2417_v24  ;;  %v6316_v2 = vpop.eup %6315  ;;  %v2532_v3 = vmul.f32 %v6314_v60, %v2509_v44  ;;  %vm2538_vm5 = vweird.f32 %v6314_v60 }
 0x2bd   :  { %v2512_v7 = vmul.f32 %v6316_v2, %v2507_v50  ;;  %vm2518_vm7 = vweird.f32 %v6316_v2  ;;  %vm2539_vm9 = vmor %vm2537_vm4, %vm2538_vm5 }
 0x2be   :  { %v2453_v34 = vrot.slane %v6747_v26, 4  ;;  %v2466_v36 = vmul.f32 %v6747_v26, %v6747_v26  ;;  %v2533_v10 = vmul.f32 %v6314_v60, %v2532_v3  ;;  %vm2519_vm10 = vmor %vm2517_vm6, %vm2518_vm7 }
 0x2bf   :  { %v2513_v13 = vmul.f32 %v6316_v2, %v2512_v7 }
 0x2c0   :  { %v2454_v38 = vadd.f32 %v2453_v34, %v6747_v26  ;;  %v2485_v41 = vrot.slane %v2466_v36, 4  ;;  %v2534_v15 = vmul.f32 0.5, %v2533_v10  ;;  %v2433_v34 = vld [vmem:[%s6897_s6] sm:$0xf] }
 0x2c1   :  { %v2418_v43 = vpop.f32.mrf.mxu2  ;;  %v2514_v30 = vmul.f32 0.5, %v2513_v13 }
 0x2c2   :  { %v2455_v45 = vrot.slane %v2454_v38, 2  ;;  %v2486_v46 = vadd.f32 %v2485_v41, %v2466_v36  ;;  %v2431_v47 = vpop.f32.mrf.mxu3  ;;  %v2535_v33 = vsub.f32 1.5, %v2534_v15 }
 0x2c3   :  { %v2515_v40 = vsub.f32 1.5, %v2514_v30 }
 0x2c4   :  { %v2456_v48 = vadd.f32 %v2455_v45, %v2454_v38  ;;  %v2487_v49 = vrot.slane %v2486_v46, 2  ;;  %v2536_v20 = vmul.f32 %v6314_v60, %v2535_v33 }
 0x2c5   :  { %v2516_v24 = vmul.f32 %v6316_v2, %v2515_v40 }
 0x2c6   :  { %v2457_v51 = vrot.slane %v2456_v48, 1  ;;  %v2488_v52 = vadd.f32 %v2487_v49, %v2486_v46  ;;  %v2540_v0 = vsel %vm2539_vm9, %v6314_v60, %v2536_v20 }
 0x2c7   :  { %v2556_v28 = vrot.slane %v2540_v0, 6  ;;  %v2520_v36 = vsel %vm2519_vm10, %v6316_v2, %v2516_v24 }
 0x2c8   :  { %v2458_v53 = vadd.f32 %v2457_v51, %v2456_v48  ;;  %v2489_v54 = vrot.slane %v2488_v52, 1  ;;  %v2558_v37 = vsel %vm1395_vm13, %v2520_v36, %v2555_v27 }
 0x2ca   :  { %v2462_v57 = vmul.f32 %v2458_v53, %v6635_v29  ;;  %v2490_v58 = vadd.f32 %v2489_v54, %v2488_v52  ;;  %v2434_v54 = vld [vmem:[%s6898_s7] sm:$0xf] }
 0x2cc   :  { %v2494_v61 = vmul.f32 %v2490_v58, %v6635_v29  ;;  %v2498_v62 = vmul.f32 %v2462_v57, %v2462_v57 }
 0x2ce   :  { %v2502_v1 = vsub.f32 %v2494_v61, %v2498_v62 }
 0x2d0   :  { %v2506_v4 = vmax.f32 %v2502_v1, 0.0 }
 0x2d2   :  { %v2510_v8 = vadd.f32 1e-05, %v2506_v4 }
 0x2d4   :  { %6317 = vrsqrt.f32 %v2510_v8  ;;  %vm2547_vm11 = vweird.f32 %v2510_v8 }
 0x2da   :  { %v6318_v31 = vpop.eup %6317 }
 0x2db   :  { %v2542_v39 = vmul.f32 %v6318_v31, %v2510_v8  ;;  %vm2548_vm8 = vweird.f32 %v6318_v31 }
 0x2dc   :  { %vm2549_vm12 = vmor %vm2547_vm11, %vm2548_vm8 }
 0x2dd   :  { %v2543_v59 = vmul.f32 %v6318_v31, %v2542_v39 }
 0x2df   :  { %v2544_v21 = vmul.f32 0.5, %v2543_v59 }
 0x2e1   :  { %v2545_v23 = vsub.f32 1.5, %v2544_v21 }
 0x2e3   :  { %v2546_v5 = vmul.f32 %v6318_v31, %v2545_v23 }
 0x2e5   :  { %v2550_v25 = vsel %vm2549_vm12, %v6318_v31, %v2546_v5 }
 0x2e6   :  { %v2557_v55 = vrot.slane %v2550_v25, 5 }
 0x2e8   :  { %v2559_v38 = vsel %vm1397_vm14, %v2556_v28, %v2557_v55 }
 0x2e9   :  { %v2560_v41 = vsel %vm1399_vm0, %v2558_v37, %v2559_v38 }
 0x2ea   :  { %v2562_v42 = vmul.f32 %v2560_v41, %v2433_v34 }
 0x2ec   :  { %v2564_v43 = vperm.slane %v2562_v42, 0  ;;  %v2565_v44 = vperm.slane %v2562_v42, 1  ;;  %v2566_v45 = vperm.slane %v2562_v42, 2  ;;  %v2567_v46 = vperm.slane %v2562_v42, 3 }
 0x2ee   :  { %v2573_v47 = vmul.f32 %v2565_v44, %v6730_v9  ;;  %v2574_v48 = vmul.f32 %v2566_v45, %v6733_v14  ;;  %v2575_v49 = vmul.f32 %v2567_v46, %v2462_v57  ;;  %v2572_v50 = vmul.f32 %v2564_v43, %v6739_v35 }
 0x2ef   :  { %v2588_v9 = vmul.f32 %v2564_v43, %v6711_v11  ;;  %v2589_v14 = vmul.f32 %v2565_v44, %v6713_v19  ;;  %v2590_v35 = vmul.f32 %v2566_v45, %v6722_v32  ;;  %v2591_v57 = vmul.f32 %v2567_v46, %v6747_v26 }
 0x2f0   :  { %v2580_v51 = vrot.slane %v2573_v47, 7  ;;  %v2581_v52 = vrot.slane %v2574_v48, 6  ;;  %v2582_v53 = vrot.slane %v2575_v49, 5 }
 0x2f2   :  { %v2583_v56 = vsel %vm1395_vm13, %v2572_v50, %v2580_v51  ;;  %v2584_v58 = vsel %vm1397_vm14, %v2581_v52, %v2582_v53 }
 0x2f3   :  { %v2585_v60 = vsel %vm1399_vm0, %v2583_v56, %v2584_v58 }
 0x2f4   :  { %v2587_v61 = vsub.f32 %v2434_v54, %v2585_v60 }
 0x2f6   :  { %v2593_v62 = vperm.slane %v2587_v61, 0  ;;  %v2594_v63 = vperm.slane %v2587_v61, 1  ;;  %v2595_v1 = vperm.slane %v2587_v61, 2  ;;  %v2596_v2 = vperm.slane %v2587_v61, 3 }
 0x2f8   :  { %v2601_v3 = vadd.f32 %v2593_v62, %v2588_v9  ;;  %v2602_v4 = vadd.f32 %v2594_v63, %v2589_v14  ;;  %v2603_v6 = vadd.f32 %v2595_v1, %v2590_v35  ;;  %v2604_v7 = vadd.f32 %v2596_v2, %v2591_v57 }
 0x2fa   :  { %v2605_v8 = vmax.f32 %v2601_v3, 0.0  ;;  %v2606_v10 = vmax.f32 %v2602_v4, 0.0  ;;  %v2607_v12 = vmax.f32 %v2603_v6, 0.0  ;;  %v2608_v13 = vmax.f32 %v2604_v7, 0.0 }
 0x2fc   :  { %v6780_v15 = vpack.c.bf16 %v2605_v8, %v2605_v8  ;;  %v6782_v11 = vpack.c.bf16 %v2606_v10, %v2606_v10  ;;  %v6784_v19 = vpack.c.bf16 %v2607_v12, %v2607_v12  ;;  %v6786_v32 = vpack.c.bf16 %v2608_v13, %v2608_v13 }
 0x2fd   :  { %6478 = dma.done.wait [#allocation5 + $0x1], 16384 }
 0x2fe   :  { %6479 = vsyncadd [#allocation5 + $0x1], 4294950912  ;;  %v5331_v26 = vld [vmem:[#allocation3 + $0xe0] sm:$0xf]  ;;  %v6162_v17 = vld [vmem:[#allocation3 + $0xec] sm:$0xf0] }
 0x2ff   :  { %v5459_v31 = vld [vmem:[#allocation3 + $0x1e0] sm:$0xf]  ;;  %v5332_v30 = vor.u32 %v6162_v17, %v5331_v26  ;;  %v6194_v33 = vld [vmem:[#allocation3 + $0x1ec] sm:$0xf0] }
 0x300   :  { %v5587_v39 = vld [vmem:[#allocation3 + $0x2e0] sm:$0xf]  ;;  %v6226_v16 = vld [vmem:[#allocation3 + $0x2ec] sm:$0xf0]  ;;  %v5460_v59 = vor.u32 %v6194_v33, %v5459_v31 }
 0x301   :  { %v5588_v40 = vor.u32 %v6226_v16, %v5587_v39  ;;  %v5715_v18 = vld [vmem:[#allocation3 + $0x3e0] sm:$0xf]  ;;  %v6258_v20 = vld [vmem:[#allocation3 + $0x3ec] sm:$0xf0]  ;;  %3383 = vmatpush.bf16.msrb.mxu0 %v5332_v30 }
 0x302   :  { %v5315_v21 = vld [vmem:[#allocation3 + $0xc0] sm:$0xf]  ;;  %v5716_v22 = vor.u32 %v6258_v20, %v5715_v18  ;;  %v6158_v23 = vld [vmem:[#allocation3 + $0xcc] sm:$0xf0]  ;;  %3396 = vmatpush.bf16.msrb.mxu1 %v5460_v59 }
 0x303   :  { %v5443_v24 = vld [vmem:[#allocation3 + $0x1c0] sm:$0xf]  ;;  %v6190_v0 = vld [vmem:[#allocation3 + $0x1cc] sm:$0xf0]  ;;  %3409 = vmatpush.bf16.msrb.mxu2 %v5588_v40  ;;  %v5316_v5 = vor.u32 %v6158_v23, %v5315_v21 }
 0x304   :  { %v5444_v27 = vor.u32 %v6190_v0, %v5443_v24  ;;  %v5571_v25 = vld [vmem:[#allocation3 + $0x2c0] sm:$0xf]  ;;  %v6222_v28 = vld [vmem:[#allocation3 + $0x2cc] sm:$0xf0]  ;;  %3422 = vmatpush.bf16.msrb.mxu3 %v5716_v22 }
 0x305   :  { %v5699_v55 = vld [vmem:[#allocation3 + $0x3c0] sm:$0xf]  ;;  %v5572_v34 = vor.u32 %v6222_v28, %v5571_v25  ;;  %v6254_v36 = vld [vmem:[#allocation3 + $0x3cc] sm:$0xf0]  ;;  %3384 = vmatpush.bf16.msrb.mxu0 %v5316_v5 }
 0x306   :  { %v5299_v37 = vld [vmem:[#allocation3 + $0xa0] sm:$0xf]  ;;  %v6154_v38 = vld [vmem:[#allocation3 + $0xac] sm:$0xf0]  ;;  %v5700_v41 = vor.u32 %v6254_v36, %v5699_v55  ;;  %3397 = vmatpush.bf16.msrb.mxu1 %v5444_v27 }
 0x307   :  { %v5427_v42 = vld [vmem:[#allocation3 + $0x1a0] sm:$0xf]  ;;  %v6186_v43 = vld [vmem:[#allocation3 + $0x1ac] sm:$0xf0]  ;;  %v5300_v45 = vor.u32 %v6154_v38, %v5299_v37  ;;  %3410 = vmatpush.bf16.msrb.mxu2 %v5572_v34 }
 0x308   :  { %v5555_v44 = vld [vmem:[#allocation3 + $0x2a0] sm:$0xf]  ;;  %v6218_v46 = vld [vmem:[#allocation3 + $0x2ac] sm:$0xf0]  ;;  %v5428_v49 = vor.u32 %v6186_v43, %v5427_v42  ;;  %3423 = vmatpush.bf16.msrb.mxu3 %v5700_v41 }
 0x309   :  { %v5683_v47 = vld [vmem:[#allocation3 + $0x3a0] sm:$0xf]  ;;  %v6250_v48 = vld [vmem:[#allocation3 + $0x3ac] sm:$0xf0]  ;;  %v5556_v50 = vor.u32 %v6218_v46, %v5555_v44  ;;  %3385 = vmatpush.bf16.msrb.mxu0 %v5300_v45 }
 0x30a   :  { %v5283_v51 = vld [vmem:[#allocation3 + $0x80] sm:$0xf]  ;;  %v6150_v52 = vld [vmem:[#allocation3 + $0x8c] sm:$0xf0]  ;;  %v5684_v54 = vor.u32 %v6250_v48, %v5683_v47  ;;  %3398 = vmatpush.bf16.msrb.mxu1 %v5428_v49  ;;  %v6160_v49 = vld [vmem:[#allocation3 + $0xe4] sm:$0xf] }
 0x30b   :  { %v5411_v53 = vld [vmem:[#allocation3 + $0x180] sm:$0xf]  ;;  %v6182_v56 = vld [vmem:[#allocation3 + $0x18c] sm:$0xf0]  ;;  %v5284_v14 = vor.u32 %v6150_v52, %v5283_v51  ;;  %3411 = vmatpush.bf16.msrb.mxu2 %v5556_v50  ;;  %v5333_v50 = vld [vmem:[#allocation3 + $0xf0] sm:$0xf0] }
 0x30c   :  { %v5539_v58 = vld [vmem:[#allocation3 + $0x280] sm:$0xf]  ;;  %v6214_v60 = vld [vmem:[#allocation3 + $0x28c] sm:$0xf0]  ;;  %v5412_v35 = vor.u32 %v6182_v56, %v5411_v53  ;;  %3424 = vmatpush.bf16.msrb.mxu3 %v5684_v54  ;;  %v6192_v51 = vld [vmem:[#allocation3 + $0x1e4] sm:$0xf] }
 0x30d   :  { %v5667_v61 = vld [vmem:[#allocation3 + $0x380] sm:$0xf]  ;;  %v6246_v9 = vld [vmem:[#allocation3 + $0x38c] sm:$0xf0]  ;;  %v5540_v57 = vor.u32 %v6214_v60, %v5539_v58  ;;  %3386 = vmatpush.bf16.msrb.mxu0 %v5284_v14  ;;  %v5461_v53 = vld [vmem:[#allocation3 + $0x1f0] sm:$0xf0] }
 0x30e   :  { %v5267_v62 = vld [vmem:[#allocation3 + $0x60] sm:$0xf]  ;;  %v6146_v63 = vld [vmem:[#allocation3 + $0x6c] sm:$0xf0]  ;;  %v5668_v2 = vor.u32 %v6246_v9, %v5667_v61  ;;  %3399 = vmatpush.bf16.msrb.mxu1 %v5412_v35  ;;  %v6224_v54 = vld [vmem:[#allocation3 + $0x2e4] sm:$0xf]  ;;  %v5336_v35 = vor.u32 %v6160_v49, %v5333_v50 }
 0x30f   :  { %v5395_v1 = vld [vmem:[#allocation3 + $0x160] sm:$0xf]  ;;  %v6178_v3 = vld [vmem:[#allocation3 + $0x16c] sm:$0xf0]  ;;  %v5268_v10 = vor.u32 %v6146_v63, %v5267_v62  ;;  %3412 = vmatpush.bf16.msrb.mxu2 %v5540_v57  ;;  %v5589_v56 = vld [vmem:[#allocation3 + $0x2f0] sm:$0xf0]  ;;  %v5464_v57 = vor.u32 %v6192_v51, %v5461_v53 }
 0x310   :  { %v5523_v4 = vld [vmem:[#allocation3 + $0x260] sm:$0xf]  ;;  %v6210_v6 = vld [vmem:[#allocation3 + $0x26c] sm:$0xf0]  ;;  %v5396_v12 = vor.u32 %v6178_v3, %v5395_v1  ;;  %3425 = vmatpush.bf16.msrb.mxu3 %v5668_v2  ;;  %v6256_v61 = vld [vmem:[#allocation3 + $0x3e4] sm:$0xf]  ;;  %v5592_v62 = vor.u32 %v6224_v54, %v5589_v56 }
 0x311   :  { %v5651_v7 = vld [vmem:[#allocation3 + $0x360] sm:$0xf]  ;;  %v6242_v8 = vld [vmem:[#allocation3 + $0x36c] sm:$0xf0]  ;;  %v5524_v13 = vor.u32 %v6210_v6, %v5523_v4  ;;  %3387 = vmatpush.bf16.msrb.mxu0 %v5268_v10  ;;  %v5717_v9 = vld [vmem:[#allocation3 + $0x3f0] sm:$0xf0] }
 0x312   :  { %v5251_v26 = vld [vmem:[#allocation3 + $0x40] sm:$0xf]  ;;  %v6142_v17 = vld [vmem:[#allocation3 + $0x4c] sm:$0xf0]  ;;  %v5652_v30 = vor.u32 %v6242_v8, %v5651_v7  ;;  %3400 = vmatpush.bf16.msrb.mxu1 %v5396_v12  ;;  %v6156_v63 = vld [vmem:[#allocation3 + $0xc4] sm:$0xf]  ;;  %v5720_v3 = vor.u32 %v6256_v61, %v5717_v9 }
 0x313   :  { %v5379_v31 = vld [vmem:[#allocation3 + $0x140] sm:$0xf]  ;;  %v6174_v33 = vld [vmem:[#allocation3 + $0x14c] sm:$0xf0]  ;;  %v5252_v18 = vor.u32 %v6142_v17, %v5251_v26  ;;  %3413 = vmatpush.bf16.msrb.mxu2 %v5524_v13  ;;  %v5317_v1 = vld [vmem:[#allocation3 + $0xd0] sm:$0xf0] }
 0x314   :  { %v5507_v39 = vld [vmem:[#allocation3 + $0x240] sm:$0xf]  ;;  %v6206_v16 = vld [vmem:[#allocation3 + $0x24c] sm:$0xf0]  ;;  %v5380_v20 = vor.u32 %v6174_v33, %v5379_v31  ;;  %3426 = vmatpush.bf16.msrb.mxu3 %v5652_v30  ;;  %v6188_v2 = vld [vmem:[#allocation3 + $0x1c4] sm:$0xf]  ;;  %v5320_v12 = vor.u32 %v6156_v63, %v5317_v1 }
 0x315   :  { %v5635_v59 = vld [vmem:[#allocation3 + $0x340] sm:$0xf]  ;;  %v6238_v40 = vld [vmem:[#allocation3 + $0x34c] sm:$0xf0]  ;;  %v5508_v21 = vor.u32 %v6206_v16, %v5507_v39  ;;  %3388 = vmatpush.bf16.msrb.mxu0 %v5252_v18  ;;  %v5445_v4 = vld [vmem:[#allocation3 + $0x1d0] sm:$0xf0] }
 0x316   :  { %v5235_v22 = vld [vmem:[#allocation3 + $0x20] sm:$0xf]  ;;  %v6138_v23 = vld [vmem:[#allocation3 + $0x2c] sm:$0xf0]  ;;  %v5636_v0 = vor.u32 %v6238_v40, %v5635_v59  ;;  %3401 = vmatpush.bf16.msrb.mxu1 %v5380_v20  ;;  %v6220_v6 = vld [vmem:[#allocation3 + $0x2c4] sm:$0xf]  ;;  %v5448_v13 = vor.u32 %v6188_v2, %v5445_v4 }
 0x317   :  { %v5363_v24 = vld [vmem:[#allocation3 + $0x120] sm:$0xf]  ;;  %v6170_v5 = vld [vmem:[#allocation3 + $0x12c] sm:$0xf0]  ;;  %v5236_v34 = vor.u32 %v6138_v23, %v5235_v22  ;;  %3414 = vmatpush.bf16.msrb.mxu2 %v5508_v21  ;;  %v5573_v7 = vld [vmem:[#allocation3 + $0x2d0] sm:$0xf0] }
 0x318   :  { %v5491_v27 = vld [vmem:[#allocation3 + $0x220] sm:$0xf]  ;;  %v6202_v25 = vld [vmem:[#allocation3 + $0x22c] sm:$0xf0]  ;;  %v5364_v38 = vor.u32 %v6170_v5, %v5363_v24  ;;  %3427 = vmatpush.bf16.msrb.mxu3 %v5636_v0  ;;  %v6252_v8 = vld [vmem:[#allocation3 + $0x3c4] sm:$0xf]  ;;  %v5576_v26 = vor.u32 %v6220_v6, %v5573_v7 }
 0x319   :  { %v5619_v28 = vld [vmem:[#allocation3 + $0x320] sm:$0xf]  ;;  %v6234_v55 = vld [vmem:[#allocation3 + $0x32c] sm:$0xf0]  ;;  %v5492_v41 = vor.u32 %v6202_v25, %v5491_v27  ;;  %3389 = vmatpush.bf16.msrb.mxu0 %v5236_v34  ;;  %v5701_v10 = vld [vmem:[#allocation3 + $0x3d0] sm:$0xf0] }
 0x31a   :  { %v5219_v36 = vld [vmem:[#allocation3] sm:$0xf]  ;;  %v6134_v37 = vld [vmem:[#allocation3 + $0xc] sm:$0xf0]  ;;  %v5620_v45 = vor.u32 %v6234_v55, %v5619_v28  ;;  %3402 = vmatpush.bf16.msrb.mxu1 %v5364_v38  ;;  %v6152_v17 = vld [vmem:[#allocation3 + $0xa4] sm:$0xf]  ;;  %v5704_v33 = vor.u32 %v6252_v8, %v5701_v10 }
 0x31b   :  { %v5347_v42 = vld [vmem:[#allocation3 + $0x100] sm:$0xf]  ;;  %v6166_v43 = vld [vmem:[#allocation3 + $0x10c] sm:$0xf0]  ;;  %v5220_v52 = vor.u32 %v6134_v37, %v5219_v36  ;;  %3415 = vmatpush.bf16.msrb.mxu2 %v5492_v41  ;;  %v5301_v31 = vld [vmem:[#allocation3 + $0xb0] sm:$0xf0] }
 0x31c   :  { %v5475_v44 = vld [vmem:[#allocation3 + $0x200] sm:$0xf]  ;;  %v6198_v46 = vld [vmem:[#allocation3 + $0x20c] sm:$0xf0]  ;;  %v5348_v58 = vor.u32 %v6166_v43, %v5347_v42  ;;  %3428 = vmatpush.bf16.msrb.mxu3 %v5620_v45  ;;  %v6184_v30 = vld [vmem:[#allocation3 + $0x1a4] sm:$0xf]  ;;  %v5304_v20 = vor.u32 %v6152_v17, %v5301_v31 }
 0x31d   :  { %v5603_v47 = vld [vmem:[#allocation3 + $0x300] sm:$0xf]  ;;  %v6230_v48 = vld [vmem:[#allocation3 + $0x30c] sm:$0xf0]  ;;  %v5476_v60 = vor.u32 %v6198_v46, %v5475_v44  ;;  %3390 = vmatpush.bf16.msrb.mxu0 %v5220_v52  ;;  %v5429_v39 = vld [vmem:[#allocation3 + $0x1b0] sm:$0xf0] }
 0x31e   :  { %v5604_v14 = vor.u32 %v6230_v48, %v5603_v47  ;;  %3403 = vmatpush.bf16.msrb.mxu1 %v5348_v58  ;;  %v6216_v16 = vld [vmem:[#allocation3 + $0x2a4] sm:$0xf]  ;;  %v5557_v59 = vld [vmem:[#allocation3 + $0x2b0] sm:$0xf0]  ;;  %v5432_v21 = vor.u32 %v6184_v30, %v5429_v39 }
 0x31f   :  { %3416 = vmatpush.bf16.msrb.mxu2 %v5476_v60  ;;  %v6248_v40 = vld [vmem:[#allocation3 + $0x3a4] sm:$0xf]  ;;  %v5685_v18 = vld [vmem:[#allocation3 + $0x3b0] sm:$0xf0]  ;;  %v5560_v22 = vor.u32 %v6216_v16, %v5557_v59 }
 0x320   :  { %3429 = vmatpush.bf16.msrb.mxu3 %v5604_v14  ;;  %3391 = vmatmul.bf16.vlgmr.msrb.gmra.mxu0 %v6780_v15  ;;  %v6148_v23 = vld [vmem:[#allocation3 + $0x84] sm:$0xf]  ;;  %v5285_v24 = vld [vmem:[#allocation3 + $0x90] sm:$0xf0]  ;;  %v5688_v5 = vor.u32 %v6248_v40, %v5685_v18 }
 0x321   :  { %3435 = vmatpush.bf16.msra.mxu0 %v5336_v35  ;;  %3404 = vmatmul.bf16.vlgmr.msrb.gmra.mxu1 %v6782_v11  ;;  %v6180_v0 = vld [vmem:[#allocation3 + $0x184] sm:$0xf]  ;;  %v5413_v27 = vld [vmem:[#allocation3 + $0x190] sm:$0xf0]  ;;  %v5288_v36 = vor.u32 %v6148_v23, %v5285_v24  ;;  %v5467_v23 = vld [vmem:[#allocation3 + $0x1e8] sm:$0xf] }
 0x322   :  { %3448 = vmatpush.bf16.msra.mxu1 %v5464_v57  ;;  %3417 = vmatmul.bf16.vlgmr.msrb.gmra.mxu2 %v6784_v19  ;;  %v6212_v25 = vld [vmem:[#allocation3 + $0x284] sm:$0xf]  ;;  %v5541_v28 = vld [vmem:[#allocation3 + $0x290] sm:$0xf0]  ;;  %v5416_v37 = vor.u32 %v6180_v0, %v5413_v27  ;;  %v6195_v0 = vld [vmem:[#allocation3 + $0x1f4] sm:$0xf0] }
 0x323   :  { %3461 = vmatpush.bf16.msra.mxu2 %v5592_v62  ;;  %3430 = vmatmul.bf16.vlgmr.msrb.gmra.mxu3 %v6786_v32  ;;  %v6244_v55 = vld [vmem:[#allocation3 + $0x384] sm:$0xf]  ;;  %v5669_v34 = vld [vmem:[#allocation3 + $0x390] sm:$0xf0]  ;;  %v5544_v38 = vor.u32 %v6212_v25, %v5541_v28  ;;  %v6227_v27 = vld [vmem:[#allocation3 + $0x2f4] sm:$0xf0] }
 0x324   :  { %3474 = vmatpush.bf16.msra.mxu3 %v5720_v3  ;;  %v6144_v41 = vld [vmem:[#allocation3 + $0x64] sm:$0xf]  ;;  %v5269_v42 = vld [vmem:[#allocation3 + $0x70] sm:$0xf0]  ;;  %v5672_v44 = vor.u32 %v6244_v55, %v5669_v34  ;;  %v5723_v55 = vld [vmem:[#allocation3 + $0x3e8] sm:$0xf] }
 0x325   :  { %3436 = vmatpush.bf16.msra.mxu0 %v5320_v12  ;;  %v6176_v43 = vld [vmem:[#allocation3 + $0x164] sm:$0xf]  ;;  %v5397_v45 = vld [vmem:[#allocation3 + $0x170] sm:$0xf0]  ;;  %v5272_v50 = vor.u32 %v6144_v41, %v5269_v42  ;;  %v6259_v34 = vld [vmem:[#allocation3 + $0x3f4] sm:$0xf0] }
 0x326   :  { %3449 = vmatpush.bf16.msra.mxu1 %v5448_v13  ;;  %v6208_v46 = vld [vmem:[#allocation3 + $0x264] sm:$0xf]  ;;  %v5525_v47 = vld [vmem:[#allocation3 + $0x270] sm:$0xf0]  ;;  %v5400_v51 = vor.u32 %v6176_v43, %v5397_v45  ;;  %v5323_v42 = vld [vmem:[#allocation3 + $0xc8] sm:$0xf]  ;;  %v5724_v45 = vor.u32 %v6259_v34, %v5723_v55 }
 0x327   :  { %3462 = vmatpush.bf16.msra.mxu2 %v5576_v26  ;;  %v6240_v48 = vld [vmem:[#allocation3 + $0x364] sm:$0xf]  ;;  %v5653_v49 = vld [vmem:[#allocation3 + $0x370] sm:$0xf0]  ;;  %v5528_v52 = vor.u32 %v6208_v46, %v5525_v47  ;;  %v6159_v43 = vld [vmem:[#allocation3 + $0xd4] sm:$0xf0] }
 0x328   :  { %3475 = vmatpush.bf16.msra.mxu3 %v5704_v33  ;;  %v6140_v53 = vld [vmem:[#allocation3 + $0x44] sm:$0xf]  ;;  %v5253_v54 = vld [vmem:[#allocation3 + $0x50] sm:$0xf0]  ;;  %v5656_v58 = vor.u32 %v6240_v48, %v5653_v49  ;;  %v6191_v46 = vld [vmem:[#allocation3 + $0x1d4] sm:$0xf0] }
 0x329   :  { %3437 = vmatpush.bf16.msra.mxu0 %v5304_v20  ;;  %v6172_v56 = vld [vmem:[#allocation3 + $0x144] sm:$0xf]  ;;  %v5381_v60 = vld [vmem:[#allocation3 + $0x150] sm:$0xf0]  ;;  %v5256_v57 = vor.u32 %v6140_v53, %v5253_v54  ;;  %v5579_v47 = vld [vmem:[#allocation3 + $0x2c8] sm:$0xf] }
 0x32a   :  { %3450 = vmatpush.bf16.msra.mxu1 %v5432_v21  ;;  %v6204_v61 = vld [vmem:[#allocation3 + $0x244] sm:$0xf]  ;;  %v5509_v9 = vld [vmem:[#allocation3 + $0x250] sm:$0xf0]  ;;  %v5384_v62 = vor.u32 %v6172_v56, %v5381_v60  ;;  %v5339_v21 = vld [vmem:[#allocation3 + $0xe8] sm:$0xf] }
 0x32b   :  { %3463 = vmatpush.bf16.msra.mxu2 %v5560_v22  ;;  %v6236_v14 = vld [vmem:[#allocation3 + $0x344] sm:$0xf]  ;;  %v5637_v35 = vld [vmem:[#allocation3 + $0x350] sm:$0xf0]  ;;  %v5512_v63 = vor.u32 %v6204_v61, %v5509_v9  ;;  %v6163_v22 = vld [vmem:[#allocation3 + $0xf4] sm:$0xf0] }
 0x32c   :  { %3476 = vmatpush.bf16.msra.mxu3 %v5688_v5  ;;  %v6136_v1 = vld [vmem:[#allocation3 + $0x24] sm:$0xf]  ;;  %v5237_v2 = vld [vmem:[#allocation3 + $0x30] sm:$0xf0]  ;;  %v5640_v4 = vor.u32 %v6236_v14, %v5637_v35  ;;  %v5595_v5 = vld [vmem:[#allocation3 + $0x2e8] sm:$0xf] }
 0x32d   :  { %3438 = vmatpush.bf16.msra.mxu0 %v5288_v36  ;;  %v6168_v3 = vld [vmem:[#allocation3 + $0x124] sm:$0xf]  ;;  %v5365_v6 = vld [vmem:[#allocation3 + $0x130] sm:$0xf0]  ;;  %v5240_v13 = vor.u32 %v6136_v1, %v5237_v2  ;;  %v5596_v41 = vor.u32 %v6227_v27, %v5595_v5  ;;  %v6223_v48 = vld [vmem:[#allocation3 + $0x2d4] sm:$0xf0] }
 0x32e   :  { %3451 = vmatpush.bf16.msra.mxu1 %v5416_v37  ;;  %v6200_v7 = vld [vmem:[#allocation3 + $0x224] sm:$0xf]  ;;  %v5493_v8 = vld [vmem:[#allocation3 + $0x230] sm:$0xf0]  ;;  %v5368_v31 = vor.u32 %v6168_v3, %v5365_v6  ;;  %v5340_v37 = vor.u32 %v6163_v22, %v5339_v21  ;;  %v5707_v49 = vld [vmem:[#allocation3 + $0x3c8] sm:$0xf]  ;;  %v5580_v53 = vor.u32 %v6223_v48, %v5579_v47 }
 0x32f   :  { %3464 = vmatpush.bf16.msra.mxu2 %v5544_v38  ;;  %v6232_v10 = vld [vmem:[#allocation3 + $0x324] sm:$0xf]  ;;  %v5621_v12 = vld [vmem:[#allocation3 + $0x330] sm:$0xf0]  ;;  %v5496_v30 = vor.u32 %v6200_v7, %v5493_v8  ;;  %v5468_v38 = vor.u32 %v6195_v0, %v5467_v23  ;;  %v5307_v54 = vld [vmem:[#allocation3 + $0xa8] sm:$0xf] }
 0x330   :  { %3477 = vmatpush.bf16.msra.mxu3 %v5672_v44  ;;  %v6132_v26 = vld [vmem:[#allocation3 + $0x4] sm:$0xf]  ;;  %v5221_v17 = vld [vmem:[#allocation3 + $0x10] sm:$0xf0]  ;;  %v5624_v59 = vor.u32 %v6232_v10, %v5621_v12  ;;  %v5451_v44 = vld [vmem:[#allocation3 + $0x1c8] sm:$0xf] }
 0x331   :  { %3439 = vmatpush.bf16.msra.mxu0 %v5272_v50  ;;  %v6164_v33 = vld [vmem:[#allocation3 + $0x104] sm:$0xf]  ;;  %v5349_v39 = vld [vmem:[#allocation3 + $0x110] sm:$0xf0]  ;;  %v5224_v24 = vor.u32 %v6132_v26, %v5221_v17  ;;  %v6255_v50 = vld [vmem:[#allocation3 + $0x3d4] sm:$0xf0] }
 0x332   :  { %3452 = vmatpush.bf16.msra.mxu1 %v5400_v51  ;;  %v6196_v16 = vld [vmem:[#allocation3 + $0x204] sm:$0xf]  ;;  %v5477_v40 = vld [vmem:[#allocation3 + $0x210] sm:$0xf0]  ;;  %v5352_v25 = vor.u32 %v6164_v33, %v5349_v39  ;;  %v5324_v51 = vor.u32 %v6159_v43, %v5323_v42  ;;  %v6155_v56 = vld [vmem:[#allocation3 + $0xb4] sm:$0xf0]  ;;  %v5708_v60 = vor.u32 %v6255_v50, %v5707_v49 }
 0x333   :  { %3465 = vmatpush.bf16.msra.mxu2 %v5528_v52  ;;  %v6228_v18 = vld [vmem:[#allocation3 + $0x304] sm:$0xf]  ;;  %v5605_v20 = vld [vmem:[#allocation3 + $0x310] sm:$0xf0]  ;;  %v5480_v28 = vor.u32 %v6196_v16, %v5477_v40  ;;  %v5452_v52 = vor.u32 %v6191_v46, %v5451_v44  ;;  %v6187_v61 = vld [vmem:[#allocation3 + $0x1b4] sm:$0xf0] }
 0x334   :  { %3478 = vmatpush.bf16.msra.mxu3 %v5656_v58  ;;  %v5608_v36 = vor.u32 %v6228_v18, %v5605_v20  ;;  %v5435_v58 = vld [vmem:[#allocation3 + $0x1a8] sm:$0xf]  ;;  %v6219_v14 = vld [vmem:[#allocation3 + $0x2b4] sm:$0xf0] }
 0x335   :  { %3440 = vmatpush.bf16.msra.mxu0 %v5256_v57  ;;  %v5563_v9 = vld [vmem:[#allocation3 + $0x2a8] sm:$0xf]  ;;  %v6251_v57 = vld [vmem:[#allocation3 + $0x3b4] sm:$0xf0] }
 0x336   :  { %3453 = vmatpush.bf16.msra.mxu1 %v5384_v62  ;;  %v5691_v35 = vld [vmem:[#allocation3 + $0x3a8] sm:$0xf]  ;;  %v5308_v62 = vor.u32 %v6155_v56, %v5307_v54  ;;  %v5564_v1 = vor.u32 %v6219_v14, %v5563_v9  ;;  %v6151_v3 = vld [vmem:[#allocation3 + $0x94] sm:$0xf0] }
 0x337   :  { %3466 = vmatpush.bf16.msra.mxu2 %v5512_v63  ;;  %v5436_v63 = vor.u32 %v6187_v61, %v5435_v58  ;;  %v5291_v2 = vld [vmem:[#allocation3 + $0x88] sm:$0xf]  ;;  %v5692_v6 = vor.u32 %v6251_v57, %v5691_v35  ;;  %v6183_v7 = vld [vmem:[#allocation3 + $0x194] sm:$0xf0] }
 0x338   :  { %3479 = vmatpush.bf16.msra.mxu3 %v5640_v4  ;;  %v5419_v4 = vld [vmem:[#allocation3 + $0x188] sm:$0xf]  ;;  %v6215_v10 = vld [vmem:[#allocation3 + $0x294] sm:$0xf0]  ;;  %v5292_v26 = vor.u32 %v6151_v3, %v5291_v2  ;;  %v6193_v2 = vld [vmem:[#allocation3 + $0x1ec] sm:$0xf] }
 0x339   :  { %3441 = vmatpush.bf16.msra.mxu0 %v5240_v13  ;;  %v5547_v8 = vld [vmem:[#allocation3 + $0x288] sm:$0xf]  ;;  %v6247_v13 = vld [vmem:[#allocation3 + $0x394] sm:$0xf0]  ;;  %v5420_v17 = vor.u32 %v6183_v7, %v5419_v4  ;;  %v5469_v4 = vld [vmem:[#allocation3 + $0x1f8] sm:$0xf0] }
 0x33a   :  { %3454 = vmatpush.bf16.msra.mxu1 %v5368_v31  ;;  %v5675_v12 = vld [vmem:[#allocation3 + $0x388] sm:$0xf]  ;;  %v5548_v31 = vor.u32 %v6215_v10, %v5547_v8  ;;  %v6147_v33 = vld [vmem:[#allocation3 + $0x74] sm:$0xf0]  ;;  %v5597_v7 = vld [vmem:[#allocation3 + $0x2f8] sm:$0xf0] }
 0x33b   :  { %3467 = vmatpush.bf16.msra.mxu2 %v5496_v30  ;;  %v5275_v30 = vld [vmem:[#allocation3 + $0x68] sm:$0xf]  ;;  %v5676_v16 = vor.u32 %v6247_v13, %v5675_v12  ;;  %v6211_v18 = vld [vmem:[#allocation3 + $0x274] sm:$0xf0]  ;;  %v6257_v12 = vld [vmem:[#allocation3 + $0x3ec] sm:$0xf] }
 0x33c   :  { %3480 = vmatpush.bf16.msra.mxu3 %v5624_v59  ;;  %v5403_v39 = vld [vmem:[#allocation3 + $0x168] sm:$0xf]  ;;  %v6179_v59 = vld [vmem:[#allocation3 + $0x174] sm:$0xf0]  ;;  %v5276_v22 = vor.u32 %v6147_v33, %v5275_v30  ;;  %v5725_v13 = vld [vmem:[#allocation3 + $0x3f8] sm:$0xf0] }
 0x33d   :  { %3442 = vmatpush.bf16.msra.mxu0 %v5224_v24  ;;  %v5531_v40 = vld [vmem:[#allocation3 + $0x268] sm:$0xf]  ;;  %v6243_v21 = vld [vmem:[#allocation3 + $0x374] sm:$0xf0]  ;;  %v5404_v23 = vor.u32 %v6179_v59, %v5403_v39  ;;  %v6157_v33 = vld [vmem:[#allocation3 + $0xcc] sm:$0xf]  ;;  %v5728_v59 = vor.u32 %v6257_v12, %v5725_v13 }
 0x33e   :  { %3455 = vmatpush.bf16.msra.mxu1 %v5352_v25  ;;  %v5659_v20 = vld [vmem:[#allocation3 + $0x368] sm:$0xf]  ;;  %v5532_v24 = vor.u32 %v6211_v18, %v5531_v40  ;;  %v6143_v5 = vld [vmem:[#allocation3 + $0x54] sm:$0xf0]  ;;  %v5325_v39 = vld [vmem:[#allocation3 + $0xd8] sm:$0xf0] }
 0x33f   :  { %3468 = vmatpush.bf16.msra.mxu2 %v5480_v28  ;;  %v5259_v0 = vld [vmem:[#allocation3 + $0x48] sm:$0xf]  ;;  %v5660_v25 = vor.u32 %v6243_v21, %v5659_v20  ;;  %v6175_v28 = vld [vmem:[#allocation3 + $0x154] sm:$0xf0]  ;;  %v5453_v40 = vld [vmem:[#allocation3 + $0x1d8] sm:$0xf0] }
 0x340   :  { %3481 = vmatpush.bf16.msra.mxu3 %v5608_v36  ;;  %3443 = vmatmul.bf16.vlgmr.msra.gmra.mxu0 %v6780_v15  ;;  %v5387_v27 = vld [vmem:[#allocation3 + $0x148] sm:$0xf]  ;;  %v6207_v34 = vld [vmem:[#allocation3 + $0x254] sm:$0xf0]  ;;  %v6221_v18 = vld [vmem:[#allocation3 + $0x2cc] sm:$0xf] }
 0x341   :  { %3487 = vmatpush.bf16.msrb.mxu0 %v5340_v37  ;;  %3456 = vmatmul.bf16.vlgmr.msra.gmra.mxu1 %v6782_v11  ;;  %v5515_v55 = vld [vmem:[#allocation3 + $0x248] sm:$0xf]  ;;  %v6239_v37 = vld [vmem:[#allocation3 + $0x354] sm:$0xf0]  ;;  %v5581_v20 = vld [vmem:[#allocation3 + $0x2d8] sm:$0xf0] }
 0x342   :  { %3500 = vmatpush.bf16.msrb.mxu1 %v5468_v38  ;;  %3469 = vmatmul.bf16.vlgmr.msra.gmra.mxu2 %v6784_v19  ;;  %v5643_v36 = vld [vmem:[#allocation3 + $0x348] sm:$0xf]  ;;  %v5260_v38 = vor.u32 %v6143_v5, %v5259_v0  ;;  %v5516_v42 = vor.u32 %v6207_v34, %v5515_v55  ;;  %v6139_v44 = vld [vmem:[#allocation3 + $0x34] sm:$0xf0]  ;;  %v6253_v21 = vld [vmem:[#allocation3 + $0x3cc] sm:$0xf]  ;;  %v5584_v0 = vor.u32 %v6221_v18, %v5581_v20 }
 0x343   :  { %3513 = vmatpush.bf16.msrb.mxu2 %v5596_v41  ;;  %3482 = vmatmul.bf16.vlgmr.msra.gmra.mxu3 %v6786_v32  ;;  %v5388_v41 = vor.u32 %v6175_v28, %v5387_v27  ;;  %v5243_v43 = vld [vmem:[#allocation3 + $0x28] sm:$0xf]  ;;  %v5644_v46 = vor.u32 %v6239_v37, %v5643_v36  ;;  %v6171_v47 = vld [vmem:[#allocation3 + $0x134] sm:$0xf0]  ;;  %v6153_v5 = vld [vmem:[#allocation3 + $0xac] sm:$0xf] }
 0x344   :  { %3526 = vmatpush.bf16.msrb.mxu3 %v5724_v45  ;;  %v5371_v45 = vld [vmem:[#allocation3 + $0x128] sm:$0xf]  ;;  %v6203_v49 = vld [vmem:[#allocation3 + $0x234] sm:$0xf0]  ;;  %v5309_v27 = vld [vmem:[#allocation3 + $0xb8] sm:$0xf0] }
 0x345   :  { %3488 = vmatpush.bf16.msrb.mxu0 %v5324_v51  ;;  %v5499_v48 = vld [vmem:[#allocation3 + $0x228] sm:$0xf]  ;;  %v6235_v51 = vld [vmem:[#allocation3 + $0x334] sm:$0xf0]  ;;  %v5372_v56 = vor.u32 %v6171_v47, %v5371_v45  ;;  %v5437_v55 = vld [vmem:[#allocation3 + $0x1b8] sm:$0xf0] }
 0x346   :  { %3501 = vmatpush.bf16.msrb.mxu1 %v5452_v52  ;;  %v5627_v50 = vld [vmem:[#allocation3 + $0x328] sm:$0xf]  ;;  %v5244_v52 = vor.u32 %v6139_v44, %v5243_v43  ;;  %v6135_v54 = vld [vmem:[#allocation3 + $0x14] sm:$0xf0]  ;;  %v5500_v58 = vor.u32 %v6203_v49, %v5499_v48  ;;  %v6217_v34 = vld [vmem:[#allocation3 + $0x2ac] sm:$0xf] }
 0x347   :  { %3514 = vmatpush.bf16.msrb.mxu2 %v5580_v53  ;;  %v5227_v53 = vld [vmem:[#allocation3 + $0x8] sm:$0xf]  ;;  %v6167_v61 = vld [vmem:[#allocation3 + $0x114] sm:$0xf0]  ;;  %v5628_v14 = vor.u32 %v6235_v51, %v5627_v50  ;;  %v5565_v36 = vld [vmem:[#allocation3 + $0x2b8] sm:$0xf0] }
 0x348   :  { %3527 = vmatpush.bf16.msrb.mxu3 %v5708_v60  ;;  %v5355_v60 = vld [vmem:[#allocation3 + $0x108] sm:$0xf]  ;;  %v6199_v35 = vld [vmem:[#allocation3 + $0x214] sm:$0xf0]  ;;  %v5228_v3 = vor.u32 %v6135_v54, %v5227_v53  ;;  %v6249_v37 = vld [vmem:[#allocation3 + $0x3ac] sm:$0xf]  ;;  %v5568_v43 = vor.u32 %v6217_v34, %v5565_v36 }
 0x349   :  { %3489 = vmatpush.bf16.msrb.mxu0 %v5308_v62  ;;  %v5483_v9 = vld [vmem:[#allocation3 + $0x208] sm:$0xf]  ;;  %v6231_v62 = vld [vmem:[#allocation3 + $0x314] sm:$0xf0]  ;;  %v5356_v8 = vor.u32 %v6167_v61, %v5355_v60  ;;  %v6149_v44 = vld [vmem:[#allocation3 + $0x8c] sm:$0xf] }
 0x34a   :  { %3502 = vmatpush.bf16.msrb.mxu1 %v5436_v63  ;;  %v5611_v57 = vld [vmem:[#allocation3 + $0x308] sm:$0xf]  ;;  %v6161_v63 = vld [vmem:[#allocation3 + $0xec] sm:$0xf]  ;;  %v5484_v10 = vor.u32 %v6199_v35, %v5483_v9  ;;  %v5293_v45 = vld [vmem:[#allocation3 + $0x98] sm:$0xf0] }
 0x34b   :  { %3515 = vmatpush.bf16.msrb.mxu2 %v5564_v1  ;;  %v5341_v1 = vld [vmem:[#allocation3 + $0xf8] sm:$0xf0]  ;;  %v6213_v49 = vld [vmem:[#allocation3 + $0x28c] sm:$0xf]  ;;  %v5296_v53 = vor.u32 %v6149_v44, %v5293_v45 }
 0x34c   :  { %3528 = vmatpush.bf16.msrb.mxu3 %v5692_v6  ;;  %v6225_v6 = vld [vmem:[#allocation3 + $0x2ec] sm:$0xf]  ;;  %v5421_v48 = vld [vmem:[#allocation3 + $0x198] sm:$0xf0] }
 0x34d   :  { %3490 = vmatpush.bf16.msrb.mxu0 %v5292_v26  ;;  %v5612_v26 = vor.u32 %v6231_v62, %v5611_v57  ;;  %v5600_v30 = vor.u32 %v6225_v6, %v5597_v7  ;;  %v5549_v50 = vld [vmem:[#allocation3 + $0x298] sm:$0xf0]  ;;  %v6245_v51 = vld [vmem:[#allocation3 + $0x38c] sm:$0xf] }
 0x34e   :  { %3503 = vmatpush.bf16.msrb.mxu1 %v5420_v17  ;;  %v5344_v17 = vor.u32 %v6161_v63, %v5341_v1  ;;  %v5277_v60 = vld [vmem:[#allocation3 + $0x78] sm:$0xf0]  ;;  %v6177_v61 = vld [vmem:[#allocation3 + $0x16c] sm:$0xf] }
 0x34f   :  { %3516 = vmatpush.bf16.msrb.mxu2 %v5548_v31  ;;  %v5472_v31 = vor.u32 %v6193_v2, %v5469_v4  ;;  %v6209_v35 = vld [vmem:[#allocation3 + $0x26c] sm:$0xf]  ;;  %v5533_v57 = vld [vmem:[#allocation3 + $0x278] sm:$0xf0] }
 0x350   :  { %3529 = vmatpush.bf16.msrb.mxu3 %v5676_v16  ;;  %v6189_v16 = vld [vmem:[#allocation3 + $0x1cc] sm:$0xf]  ;;  %v5661_v63 = vld [vmem:[#allocation3 + $0x378] sm:$0xf0] }
 0x351   :  { %3491 = vmatpush.bf16.msrb.mxu0 %v5276_v22  ;;  %v5709_v22 = vld [vmem:[#allocation3 + $0x3d8] sm:$0xf0]  ;;  %v6241_v62 = vld [vmem:[#allocation3 + $0x36c] sm:$0xf] }
 0x352   :  { %3504 = vmatpush.bf16.msrb.mxu1 %v5404_v23  ;;  %v5328_v23 = vor.u32 %v6157_v33, %v5325_v39  ;;  %v5712_v28 = vor.u32 %v6253_v21, %v5709_v22  ;;  %v6141_v4 = vld [vmem:[#allocation3 + $0x4c] sm:$0xf]  ;;  %v5261_v6 = vld [vmem:[#allocation3 + $0x58] sm:$0xf0] }
 0x353   :  { %3517 = vmatpush.bf16.msrb.mxu2 %v5532_v24  ;;  %v5456_v24 = vor.u32 %v6189_v16, %v5453_v40  ;;  %v6173_v7 = vld [vmem:[#allocation3 + $0x14c] sm:$0xf]  ;;  %v5517_v13 = vld [vmem:[#allocation3 + $0x258] sm:$0xf0] }
 0x354   :  { %3530 = vmatpush.bf16.msrb.mxu3 %v5660_v25  ;;  %v6185_v25 = vld [vmem:[#allocation3 + $0x1ac] sm:$0xf]  ;;  %v5245_v16 = vld [vmem:[#allocation3 + $0x38] sm:$0xf0] }
 0x355   :  { %3492 = vmatpush.bf16.msrb.mxu0 %v5260_v38  ;;  %v5693_v38 = vld [vmem:[#allocation3 + $0x3b8] sm:$0xf0]  ;;  %v6205_v12 = vld [vmem:[#allocation3 + $0x24c] sm:$0xf] }
 0x356   :  { %3505 = vmatpush.bf16.msrb.mxu1 %v5388_v41  ;;  %v5312_v41 = vor.u32 %v6153_v5, %v5309_v27  ;;  %v5696_v47 = vor.u32 %v6249_v37, %v5693_v38  ;;  %v5520_v33 = vor.u32 %v6205_v12, %v5517_v13  ;;  %v6137_v39 = vld [vmem:[#allocation3 + $0x2c] sm:$0xf]  ;;  %v5373_v18 = vld [vmem:[#allocation3 + $0x138] sm:$0xf0] }
 0x357   :  { %3518 = vmatpush.bf16.msrb.mxu2 %v5516_v42  ;;  %v5440_v42 = vor.u32 %v6185_v25, %v5437_v55  ;;  %v6201_v20 = vld [vmem:[#allocation3 + $0x22c] sm:$0xf]  ;;  %v5501_v21 = vld [vmem:[#allocation3 + $0x238] sm:$0xf0] }
 0x358   :  { %3531 = vmatpush.bf16.msrb.mxu3 %v5644_v46  ;;  %v6181_v46 = vld [vmem:[#allocation3 + $0x18c] sm:$0xf]  ;;  %v5504_v5 = vor.u32 %v6201_v20, %v5501_v21  ;;  %v5229_v25 = vld [vmem:[#allocation3 + $0x18] sm:$0xf0] }
 0x359   :  { %3493 = vmatpush.bf16.msrb.mxu0 %v5244_v52  ;;  %v5677_v52 = vld [vmem:[#allocation3 + $0x398] sm:$0xf0]  ;;  %v5424_v54 = vor.u32 %v6181_v46, %v5421_v48  ;;  %v6233_v22 = vld [vmem:[#allocation3 + $0x32c] sm:$0xf] }
 0x35a   :  { %3506 = vmatpush.bf16.msrb.mxu1 %v5372_v56  ;;  %v5552_v56 = vor.u32 %v6213_v49, %v5549_v50  ;;  %v5680_v9 = vor.u32 %v6245_v51, %v5677_v52  ;;  %v6133_v27 = vld [vmem:[#allocation3 + $0xc] sm:$0xf]  ;;  %v5357_v34 = vld [vmem:[#allocation3 + $0x118] sm:$0xf0] }
 0x35b   :  { %3519 = vmatpush.bf16.msrb.mxu2 %v5500_v58  ;;  %v6145_v58 = vld [vmem:[#allocation3 + $0x6c] sm:$0xf]  ;;  %v5485_v37 = vld [vmem:[#allocation3 + $0x218] sm:$0xf0] }
 0x35c   :  { %3532 = vmatpush.bf16.msrb.mxu3 %v5628_v14  ;;  %v5405_v14 = vld [vmem:[#allocation3 + $0x178] sm:$0xf0]  ;;  %v5280_v1 = vor.u32 %v6145_v58, %v5277_v60  ;;  %v6197_v36 = vld [vmem:[#allocation3 + $0x20c] sm:$0xf] }
 0x35d   :  { %3494 = vmatpush.bf16.msrb.mxu0 %v5228_v3  ;;  %v5408_v2 = vor.u32 %v6177_v61, %v5405_v14  ;;  %v5536_v3 = vor.u32 %v6209_v35, %v5533_v57  ;;  %v6229_v38 = vld [vmem:[#allocation3 + $0x30c] sm:$0xf]  ;;  %v5488_v44 = vor.u32 %v6197_v36, %v5485_v37 }
 0x35e   :  { %3507 = vmatpush.bf16.msrb.mxu1 %v5356_v8  ;;  %v5664_v8 = vor.u32 %v6241_v62, %v5661_v63 }
 0x35f   :  { %3520 = vmatpush.bf16.msrb.mxu2 %v5484_v10  ;;  %v5389_v10 = vld [vmem:[#allocation3 + $0x158] sm:$0xf0] }
 0x360   :  { %3533 = vmatpush.bf16.msrb.mxu3 %v5612_v26  ;;  %3495 = vmatmul.bf16.vlgmr.msrb.gmra.mxu0 %v6780_v15  ;;  %v6237_v26 = vld [vmem:[#allocation3 + $0x34c] sm:$0xf] }
 0x361   :  { %3539 = vmatpush.bf16.msra.mxu0 %v5344_v17  ;;  %3508 = vmatmul.bf16.vlgmr.msrb.gmra.mxu1 %v6782_v11  ;;  %v5645_v17 = vld [vmem:[#allocation3 + $0x358] sm:$0xf0] }
 0x362   :  { %3552 = vmatpush.bf16.msra.mxu1 %v5472_v31  ;;  %3521 = vmatmul.bf16.vlgmr.msrb.gmra.mxu2 %v6784_v19  ;;  %v5264_v31 = vor.u32 %v6141_v4, %v5261_v6  ;;  %v5648_v40 = vor.u32 %v6237_v26, %v5645_v17 }
 0x363   :  { %3565 = vmatpush.bf16.msra.mxu2 %v5600_v30  ;;  %3534 = vmatmul.bf16.vlgmr.msrb.gmra.mxu3 %v6786_v32  ;;  %v5392_v30 = vor.u32 %v6173_v7, %v5389_v10 }
 0x364   :  { %3578 = vmatpush.bf16.msra.mxu3 %v5728_v59  ;;  %v6169_v59 = vld [vmem:[#allocation3 + $0x12c] sm:$0xf] }
 0x365   :  { %3540 = vmatpush.bf16.msra.mxu0 %v5328_v23  ;;  %v5629_v23 = vld [vmem:[#allocation3 + $0x338] sm:$0xf0] }
 0x366   :  { %3553 = vmatpush.bf16.msra.mxu1 %v5456_v24  ;;  %v5248_v24 = vor.u32 %v6137_v39, %v5245_v16  ;;  %v5632_v55 = vor.u32 %v6233_v22, %v5629_v23 }
 0x367   :  { %3566 = vmatpush.bf16.msra.mxu2 %v5584_v0  ;;  %v5376_v0 = vor.u32 %v6169_v59, %v5373_v18 }
 0x368   :  { %3579 = vmatpush.bf16.msra.mxu3 %v5712_v28  ;;  %v6165_v28 = vld [vmem:[#allocation3 + $0x10c] sm:$0xf] }
 0x369   :  { %3541 = vmatpush.bf16.msra.mxu0 %v5312_v41  ;;  %v5613_v41 = vld [vmem:[#allocation3 + $0x318] sm:$0xf0] }
 0x36a   :  { %3554 = vmatpush.bf16.msra.mxu1 %v5440_v42  ;;  %v5232_v42 = vor.u32 %v6133_v27, %v5229_v25  ;;  %v5616_v45 = vor.u32 %v6229_v38, %v5613_v41 }
 0x36b   :  { %3567 = vmatpush.bf16.msra.mxu2 %v5568_v43  ;;  %v5360_v43 = vor.u32 %v6165_v28, %v5357_v34 }
 0x36c   :  { %3580 = vmatpush.bf16.msra.mxu3 %v5696_v47 }
 0x36d   :  { %3542 = vmatpush.bf16.msra.mxu0 %v5296_v53 }
 0x36e   :  { %3555 = vmatpush.bf16.msra.mxu1 %v5424_v54 }
 0x36f   :  { %3568 = vmatpush.bf16.msra.mxu2 %v5552_v56 }
 0x370   :  { %3581 = vmatpush.bf16.msra.mxu3 %v5680_v9 }
 0x371   :  { %3543 = vmatpush.bf16.msra.mxu0 %v5280_v1 }
 0x372   :  { %3556 = vmatpush.bf16.msra.mxu1 %v5408_v2 }
 0x373   :  { %3569 = vmatpush.bf16.msra.mxu2 %v5536_v3 }
 0x374   :  { %3582 = vmatpush.bf16.msra.mxu3 %v5664_v8 }
 0x375   :  { %3544 = vmatpush.bf16.msra.mxu0 %v5264_v31 }
 0x376   :  { %3557 = vmatpush.bf16.msra.mxu1 %v5392_v30 }
 0x377   :  { %3570 = vmatpush.bf16.msra.mxu2 %v5520_v33 }
 0x378   :  { %3583 = vmatpush.bf16.msra.mxu3 %v5648_v40 }
 0x379   :  { %3545 = vmatpush.bf16.msra.mxu0 %v5248_v24 }
 0x37a   :  { %3558 = vmatpush.bf16.msra.mxu1 %v5376_v0 }
 0x37b   :  { %3571 = vmatpush.bf16.msra.mxu2 %v5504_v5 }
 0x37c   :  { %3584 = vmatpush.bf16.msra.mxu3 %v5632_v55 }
 0x37d   :  { %3546 = vmatpush.bf16.msra.mxu0 %v5232_v42 }
 0x37e   :  { %3559 = vmatpush.bf16.msra.mxu1 %v5360_v43 }
 0x37f   :  { %3572 = vmatpush.bf16.msra.mxu2 %v5488_v44 }
 0x380   :  { %3585 = vmatpush.bf16.msra.mxu3 %v5616_v45  ;;  %3547 = vmatmul.bf16.vlgmr.msra.gmra.mxu0 %v6780_v15 }
 0x381   :  { %3560 = vmatmul.bf16.vlgmr.msra.gmra.mxu1 %v6782_v11 }
 0x382   :  { %3573 = vmatmul.bf16.vlgmr.msra.gmra.mxu2 %v6784_v19 }
 0x383   :  { %3586 = vmatmul.bf16.vlgmr.msra.gmra.mxu3 %v6786_v32 }
 0x39d   :  { %v3392_v46 = vpop.f32.mrf.mxu0 }
 0x39e   :  { %v3405_v47 = vpop.f32.mrf.mxu1 }
 0x39f   :  { %v3406_v48 = vadd.f32 %v3405_v47, %v3392_v46 }
 0x3a5   :  { %v3418_v49 = vpop.f32.mrf.mxu2  ;;  %v3394_v53 = vpop.f32.mrf.mxu0 }
 0x3a6   :  { %v3419_v50 = vadd.f32 %v3418_v49, %v3406_v48  ;;  %v3431_v51 = vpop.f32.mrf.mxu3  ;;  %v3407_v54 = vpop.f32.mrf.mxu1 }
 0x3a8   :  { %v6804_v52 = vadd.f32 %v3431_v51, %v3419_v50 }
 0x3aa   :  { %v3593_v13 = vrot.slane %v6804_v52, 4  ;;  %v3621_v26 = vmul.f32 %v6804_v52, %v6804_v52 }
 0x3ac   :  { %v3594_v40 = vadd.f32 %v3593_v13, %v6804_v52  ;;  %v3625_v18 = vrot.slane %v3621_v26, 4 }
 0x3ad   :  { %v3420_v56 = vpop.f32.mrf.mxu2 }
 0x3ae   :  { %v3433_v58 = vpop.f32.mrf.mxu3  ;;  %v3595_v25 = vrot.slane %v3594_v40, 2  ;;  %v3626_v28 = vadd.f32 %v3625_v18, %v3621_v26 }
 0x3b0   :  { %v3596_v38 = vadd.f32 %v3595_v25, %v3594_v40  ;;  %v3627_v41 = vrot.slane %v3626_v28, 2 }
 0x3b2   :  { %v3597_v46 = vrot.slane %v3596_v38, 1  ;;  %v3628_v47 = vadd.f32 %v3627_v41, %v3626_v28 }
 0x3b4   :  { %v3598_v53 = vadd.f32 %v3597_v46, %v3596_v38  ;;  %v3629_v54 = vrot.slane %v3628_v47, 1 }
 0x3bd   :  { %v3444_v60 = vpop.f32.mrf.mxu0 }
 0x3be   :  { %v3457_v15 = vpop.f32.mrf.mxu1 }
 0x3bf   :  { %v3458_v35 = vadd.f32 %v3457_v15, %v3444_v60 }
 0x3c5   :  { %v3470_v61 = vpop.f32.mrf.mxu2  ;;  %v3446_v9 = vpop.f32.mrf.mxu0 }
 0x3c6   :  { %v3483_v11 = vpop.f32.mrf.mxu3  ;;  %v3459_v19 = vpop.f32.mrf.mxu1  ;;  %v3471_v57 = vadd.f32 %v3470_v61, %v3458_v35  ;;  %v6832_v9 = vmul.f32 %v3598_v53, %v6635_v29 }
 0x3c7   :  { %v3630_v19 = vadd.f32 %v3629_v54, %v3628_v47 }
 0x3c8   :  { %v6806_v62 = vadd.f32 %v3483_v11, %v3471_v57 }
 0x3ca   :  { %v3599_v2 = vrot.slane %v6806_v62, 4  ;;  %v3622_v3 = vmul.f32 %v6806_v62, %v6806_v62 }
 0x3cc   :  { %v3600_v7 = vadd.f32 %v3599_v2, %v6806_v62  ;;  %v3631_v8 = vrot.slane %v3622_v3, 4 }
 0x3cd   :  { %v3472_v14 = vpop.f32.mrf.mxu2 }
 0x3ce   :  { %v3485_v32 = vpop.f32.mrf.mxu3  ;;  %v3601_v33 = vrot.slane %v3600_v7, 2  ;;  %v3632_v39 = vadd.f32 %v3631_v8, %v3622_v3 }
 0x3d0   :  { %v3602_v23 = vadd.f32 %v3601_v33, %v3600_v7  ;;  %v3633_v24 = vrot.slane %v3632_v39, 2 }
 0x3d2   :  { %v3603_v36 = vrot.slane %v3602_v23, 1  ;;  %v3634_v37 = vadd.f32 %v3633_v24, %v3632_v39 }
 0x3d4   :  { %v3604_v44 = vadd.f32 %v3603_v36, %v3602_v23  ;;  %v3635_v45 = vrot.slane %v3634_v37, 1 }
 0x3d6   :  { %v6823_v50 = vmul.f32 %v3604_v44, %v6635_v29  ;;  %v3636_v51 = vadd.f32 %v3635_v45, %v3634_v37 }
 0x3d8   :  { %v3650_v61 = vmul.f32 %v3636_v51, %v6635_v29  ;;  %v3654_v11 = vmul.f32 %v6823_v50, %v6823_v50 }
 0x3da   :  { %v3658_v57 = vsub.f32 %v3650_v61, %v3654_v11 }
 0x3dd   :  { %v3496_v63 = vpop.f32.mrf.mxu0 }
 0x3de   :  { %v3509_v1 = vpop.f32.mrf.mxu1 }
 0x3df   :  { %v3510_v4 = vadd.f32 %v3509_v1, %v3496_v63  ;;  %v3649_v63 = vmul.f32 %v3630_v19, %v6635_v29  ;;  %v3653_v1 = vmul.f32 %v6832_v9, %v6832_v9 }
 0x3e1   :  { %v3657_v13 = vsub.f32 %v3649_v63, %v3653_v1 }
 0x3e5   :  { %v3522_v6 = vpop.f32.mrf.mxu2  ;;  %v3498_v31 = vpop.f32.mrf.mxu0 }
 0x3e6   :  { %v3523_v10 = vadd.f32 %v3522_v6, %v3510_v4  ;;  %v3535_v12 = vpop.f32.mrf.mxu3  ;;  %v3511_v30 = vpop.f32.mrf.mxu1 }
 0x3e8   :  { %v6815_v17 = vadd.f32 %v3535_v12, %v3523_v10  ;;  %v3662_v10 = vmax.f32 %v3658_v57, 0.0 }
 0x3ea   :  { %v3605_v16 = vrot.slane %v6815_v17, 4  ;;  %v3623_v59 = vmul.f32 %v6815_v17, %v6815_v17  ;;  %v3666_v33 = vadd.f32 1e-05, %v3662_v10 }
 0x3ec   :  { %v3606_v20 = vadd.f32 %v3605_v16, %v6815_v17  ;;  %v3637_v21 = vrot.slane %v3623_v59, 4  ;;  %6319 = vrsqrt.f32 %v3666_v33  ;;  %vm3685_vm15 = vweird.f32 %v3666_v33 }
 0x3ed   :  { %v3524_v22 = vpop.f32.mrf.mxu2 }
 0x3ee   :  { %v3607_v0 = vrot.slane %v3606_v20, 2  ;;  %v3638_v5 = vadd.f32 %v3637_v21, %v3623_v59  ;;  %v3537_v27 = vpop.f32.mrf.mxu3  ;;  %v3661_v59 = vmax.f32 %v3657_v13, 0.0 }
 0x3f0   :  { %v3608_v55 = vadd.f32 %v3607_v0, %v3606_v20  ;;  %v3639_v34 = vrot.slane %v3638_v5, 2  ;;  %v3665_v0 = vadd.f32 1e-05, %v3661_v59 }
 0x3f2   :  { %v3609_v42 = vrot.slane %v3608_v55, 1  ;;  %v3640_v43 = vadd.f32 %v3639_v34, %v3638_v5  ;;  %vm3675_vm5 = vweird.f32 %v3665_v0 }
 0x3f4   :  { %v3610_v48 = vadd.f32 %v3609_v42, %v3608_v55  ;;  %v3641_v49 = vrot.slane %v3640_v43, 1  ;;  %v6320_v55 = vpop.eup %6319 }
 0x3f5   :  { %v3680_v42 = vmul.f32 %v6320_v55, %v3666_v33  ;;  %vm3686_vm1 = vweird.f32 %v6320_v55 }
 0x3f6   :  { %v6826_v56 = vmul.f32 %v3610_v48, %v6635_v29  ;;  %v3642_v58 = vadd.f32 %v3641_v49, %v3640_v43  ;;  %vm6848_vm2 = vmor %vm3685_vm15, %vm3686_vm1 }
 0x3f7   :  { %v3681_v47 = vmul.f32 %v6320_v55, %v3680_v42 }
 0x3f8   :  { %v3651_v14 = vmul.f32 %v3642_v58, %v6635_v29  ;;  %v3655_v32 = vmul.f32 %v6826_v56, %v6826_v56 }
 0x3f9   :  { %v3682_v53 = vmul.f32 0.5, %v3681_v47 }
 0x3fa   :  { %v3659_v3 = vsub.f32 %v3651_v14, %v3655_v32 }
 0x3fc   :  { %v3663_v26 = vmax.f32 %v3659_v3, 0.0 }
 0x3fd   :  { %v3548_v60 = vpop.f32.mrf.mxu0 }
 0x3fe   :  { %v3561_v15 = vpop.f32.mrf.mxu1  ;;  %v3667_v18 = vadd.f32 1e-05, %v3663_v26  ;;  %v3591_v26 = vld [vmem:[%s6899_s8] sm:$0xf] }
 0x3ff   :  { %v3562_v35 = vadd.f32 %v3561_v15, %v3548_v60  ;;  %v3683_v60 = vsub.f32 1.5, %v3682_v53 }
 0x400   :  { %6321 = vrsqrt.f32 %v3667_v18  ;;  %vm3695_vm3 = vweird.f32 %v3667_v18 }
 0x401   :  { %6323 = vrsqrt.f32 %v3665_v0  ;;  %v3684_v19 = vmul.f32 %v6320_v55, %v3683_v60 }
 0x403   :  { %v3688_v1 = vsel %vm6848_vm2, %v6320_v55, %v3684_v19 }
 0x405   :  { %v3574_v2 = vpop.f32.mrf.mxu2  ;;  %v3550_v7 = vpop.f32.mrf.mxu0 }
 0x406   :  { %v3575_v4 = vadd.f32 %v3574_v2, %v3562_v35  ;;  %v3587_v6 = vpop.f32.mrf.mxu3  ;;  %v3563_v8 = vpop.f32.mrf.mxu1  ;;  %v3713_v7 = vrot.slane %v3688_v1, 7 }
 0x407   :  { %v6322_v37 = vpop.eup %6321 }
 0x408   :  { %v6840_v12 = vadd.f32 %v3587_v6, %v3575_v4  ;;  %v6324_v44 = vpop.eup %6323  ;;  %v3690_v45 = vmul.f32 %v6322_v37, %v3667_v18  ;;  %vm3696_vm4 = vweird.f32 %v6322_v37 }
 0x409   :  { %v3670_v48 = vmul.f32 %v6324_v44, %v3665_v0  ;;  %vm3676_vm6 = vweird.f32 %v6324_v44  ;;  %vm3697_vm8 = vmor %vm3695_vm3, %vm3696_vm4 }
 0x40a   :  { %v3611_v31 = vrot.slane %v6840_v12, 4  ;;  %v3624_v30 = vmul.f32 %v6840_v12, %v6840_v12  ;;  %v3691_v51 = vmul.f32 %v6322_v37, %v3690_v45  ;;  %vm3677_vm9 = vmor %vm3675_vm5, %vm3676_vm6 }
 0x40b   :  { %v3671_v54 = vmul.f32 %v6324_v44, %v3670_v48 }
 0x40c   :  { %v3612_v39 = vadd.f32 %v3611_v31, %v6840_v12  ;;  %v3643_v16 = vrot.slane %v3624_v30, 4  ;;  %v3692_v58 = vmul.f32 0.5, %v3691_v51 }
 0x40d   :  { %v3576_v40 = vpop.f32.mrf.mxu2  ;;  %v3672_v61 = vmul.f32 0.5, %v3671_v54 }
 0x40e   :  { %v3613_v20 = vrot.slane %v3612_v39, 2  ;;  %v3644_v21 = vadd.f32 %v3643_v16, %v3624_v30  ;;  %v3589_v22 = vpop.f32.mrf.mxu3 }
 0x40f   :  { %v3673_v32 = vsub.f32 1.5, %v3672_v61 }
 0x410   :  { %v3614_v23 = vadd.f32 %v3613_v20, %v3612_v39  ;;  %v3645_v24 = vrot.slane %v3644_v21, 2 }
 0x411   :  { %v3674_v3 = vmul.f32 %v6324_v44, %v3673_v32 }
 0x412   :  { %v3615_v5 = vrot.slane %v3614_v23, 1  ;;  %v3646_v27 = vadd.f32 %v3645_v24, %v3644_v21 }
 0x413   :  { %v3678_v31 = vsel %vm3677_vm9, %v6324_v44, %v3674_v3 }
 0x414   :  { %v3616_v25 = vadd.f32 %v3615_v5, %v3614_v23  ;;  %v3647_v28 = vrot.slane %v3646_v27, 1  ;;  %v3716_v30 = vsel %vm1395_vm13, %v3678_v31, %v3713_v7 }
 0x416   :  { %v3620_v34 = vmul.f32 %v3616_v25, %v6635_v29  ;;  %v3648_v36 = vadd.f32 %v3647_v28, %v3646_v27  ;;  %v3592_v25 = vld [vmem:[%s6900_s9] sm:$0xf] }
 0x418   :  { %v3652_v38 = vmul.f32 %v3648_v36, %v6635_v29  ;;  %v3656_v41 = vmul.f32 %v3620_v34, %v3620_v34  ;;  %v3693_v29 = vsub.f32 1.5, %v3692_v58 }
 0x41a   :  { %v3660_v43 = vsub.f32 %v3652_v38, %v3656_v41  ;;  %v3694_v57 = vmul.f32 %v6322_v37, %v3693_v29 }
 0x41c   :  { %v3664_v46 = vmax.f32 %v3660_v43, 0.0  ;;  %v3698_v4 = vsel %vm3697_vm8, %v6322_v37, %v3694_v57 }
 0x41d   :  { %v3714_v10 = vrot.slane %v3698_v4, 6 }
 0x41e   :  { %v3668_v49 = vadd.f32 1e-05, %v3664_v46 }
 0x420   :  { %6325 = vrsqrt.f32 %v3668_v49  ;;  %vm3705_vm10 = vweird.f32 %v3668_v49 }
 0x426   :  { %v6326_v15 = vpop.eup %6325 }
 0x427   :  { %v3700_v11 = vmul.f32 %v6326_v15, %v3668_v49  ;;  %vm3706_vm7 = vweird.f32 %v6326_v15 }
 0x428   :  { %vm3707_vm11 = vmor %vm3705_vm10, %vm3706_vm7 }
 0x429   :  { %v3701_v14 = vmul.f32 %v6326_v15, %v3700_v11 }
 0x42b   :  { %v3702_v63 = vmul.f32 0.5, %v3701_v14 }
 0x42d   :  { %v3703_v2 = vsub.f32 1.5, %v3702_v63 }
 0x42f   :  { %v3704_v6 = vmul.f32 %v6326_v15, %v3703_v2 }
 0x431   :  { %v3708_v8 = vsel %vm3707_vm11, %v6326_v15, %v3704_v6 }
 0x432   :  { %v3715_v13 = vrot.slane %v3708_v8, 5 }
 0x434   :  { %v3717_v33 = vsel %vm1397_vm14, %v3714_v10, %v3715_v13 }
 0x435   :  { %v3718_v39 = vsel %vm1399_vm0, %v3716_v30, %v3717_v33 }
 0x436   :  { %v3720_v16 = vmul.f32 %v3718_v39, %v3591_v26 }
 0x438   :  { %v3722_v59 = vperm.slane %v3720_v16, 0  ;;  %v3723_v40 = vperm.slane %v3720_v16, 1  ;;  %v3724_v18 = vperm.slane %v3720_v16, 2  ;;  %v3725_v20 = vperm.slane %v3720_v16, 3 }
 0x43a   :  { %v3731_v21 = vmul.f32 %v3723_v40, %v6823_v50  ;;  %v3732_v22 = vmul.f32 %v3724_v18, %v6826_v56  ;;  %v3733_v23 = vmul.f32 %v3725_v20, %v3620_v34  ;;  %v3730_v24 = vmul.f32 %v3722_v59, %v6832_v9 }
 0x43b   :  { %v3746_v50 = vmul.f32 %v3722_v59, %v6804_v52  ;;  %v3747_v56 = vmul.f32 %v3723_v40, %v6806_v62  ;;  %v3748_v9 = vmul.f32 %v3724_v18, %v6815_v17  ;;  %v3749_v34 = vmul.f32 %v3725_v20, %v6840_v12 }
 0x43c   :  { %v3738_v0 = vrot.slane %v3731_v21, 7  ;;  %v3739_v5 = vrot.slane %v3732_v22, 6  ;;  %v3740_v27 = vrot.slane %v3733_v23, 5 }
 0x43e   :  { %v3741_v28 = vsel %vm1395_vm13, %v3730_v24, %v3738_v0  ;;  %v3742_v55 = vsel %vm1397_vm14, %v3739_v5, %v3740_v27 }
 0x43f   :  { %v3743_v36 = vsel %vm1399_vm0, %v3741_v28, %v3742_v55 }
 0x440   :  { %v3745_v37 = vsub.f32 %v3592_v25, %v3743_v36 }
 0x442   :  { %v3751_v38 = vperm.slane %v3745_v37, 0  ;;  %v3752_v41 = vperm.slane %v3745_v37, 1  ;;  %v3753_v42 = vperm.slane %v3745_v37, 2  ;;  %v3754_v43 = vperm.slane %v3745_v37, 3 }
 0x444   :  { %v3759_v44 = vadd.f32 %v3751_v38, %v3746_v50  ;;  %v3760_v45 = vadd.f32 %v3752_v41, %v3747_v56  ;;  %v3761_v46 = vadd.f32 %v3753_v42, %v3748_v9  ;;  %v3762_v47 = vadd.f32 %v3754_v43, %v3749_v34 }
 0x446   :  { %v3763_v48 = vmax.f32 %v3759_v44, 0.0  ;;  %v3764_v49 = vmax.f32 %v3760_v45, 0.0  ;;  %v3765_v51 = vmax.f32 %v3761_v46, 0.0  ;;  %v3766_v53 = vmax.f32 %v3762_v47, 0.0 }
 0x448   :  { %v6873_v54 = vpack.c.bf16 %v3763_v48, %v3763_v48  ;;  %v6875_v52 = vpack.c.bf16 %v3764_v49, %v3764_v49  ;;  %v6877_v62 = vpack.c.bf16 %v3765_v51, %v3765_v51  ;;  %v6879_v17 = vpack.c.bf16 %v3766_v53, %v3766_v53 }
 0x449   :  { %6480 = dma.done.wait [#allocation5 + $0x2], 4096 }
 0x44a   :  { %6481 = vsyncadd [#allocation5 + $0x2], 4294963200  ;;  %v6267_v12 = vld [vmem:[#allocation4 + $0x38] sm:$0xff]  ;;  %v6266_v61 = vld [vmem:[#allocation4 + $0x30] sm:$0xff]  ;;  %s6492_s2 = smov [#allocation11]   ;;  %s4094_s29 = sshll.u32 %s6905_s14, 4  ;;  %s4095_s29 = int_to_ptr.hbm [resolvable:$true] %s4094_s29 }
 0x44b   :  { %v6275_v58 = vld [vmem:[#allocation4 + $0x78] sm:$0xff]  ;;  %4034 = vmatpush.bf16.msrb.mxu0 %v6267_v12  ;;  %v6274_v29 = vld [vmem:[#allocation4 + $0x70] sm:$0xff]  ;;  %v6265_v14 = vld [vmem:[#allocation4 + $0x28] sm:$0xff]  ;;  %s4092_s26 = sshll.u32 %s6492_s2, 4  ;;  %s4093_s26 = int_to_ptr.vmem [resolvable:$true] %s4092_s26 }
 0x44c   :  { %v6283_v60 = vld [vmem:[#allocation4 + $0xb8] sm:$0xff]  ;;  %4047 = vmatpush.bf16.msrb.mxu1 %v6275_v58  ;;  %v6282_v11 = vld [vmem:[#allocation4 + $0xb0] sm:$0xff]  ;;  %v6273_v32 = vld [vmem:[#allocation4 + $0x68] sm:$0xff] }
 0x44d   :  { %v6291_v15 = vld [vmem:[#allocation4 + $0xf8] sm:$0xff]  ;;  %4060 = vmatpush.bf16.msrb.mxu2 %v6283_v60  ;;  %v6290_v19 = vld [vmem:[#allocation4 + $0xf0] sm:$0xff]  ;;  %v6281_v35 = vld [vmem:[#allocation4 + $0xa8] sm:$0xff] }
 0x44e   :  { %4073 = vmatpush.bf16.msrb.mxu3 %v6291_v15  ;;  %v6289_v57 = vld [vmem:[#allocation4 + $0xe8] sm:$0xff]  ;;  %v6264_v63 = vld [vmem:[#allocation4 + $0x20] sm:$0xff]  ;;  %v6263_v4 = vld [vmem:[#allocation4 + $0x18] sm:$0xff] }
 0x44f   :  { %4035 = vmatpush.bf16.msrb.mxu0 %v6266_v61  ;;  %v6272_v1 = vld [vmem:[#allocation4 + $0x60] sm:$0xff]  ;;  %v6271_v6 = vld [vmem:[#allocation4 + $0x58] sm:$0xff]  ;;  %v6262_v10 = vld [vmem:[#allocation4 + $0x10] sm:$0xff] }
 0x450   :  { %4048 = vmatpush.bf16.msrb.mxu1 %v6274_v29  ;;  %v6280_v2 = vld [vmem:[#allocation4 + $0xa0] sm:$0xff]  ;;  %v6279_v7 = vld [vmem:[#allocation4 + $0x98] sm:$0xff]  ;;  %v6270_v13 = vld [vmem:[#allocation4 + $0x50] sm:$0xff] }
 0x451   :  { %4061 = vmatpush.bf16.msrb.mxu2 %v6282_v11  ;;  %v6288_v3 = vld [vmem:[#allocation4 + $0xe0] sm:$0xff]  ;;  %v6287_v8 = vld [vmem:[#allocation4 + $0xd8] sm:$0xff]  ;;  %v6278_v26 = vld [vmem:[#allocation4 + $0x90] sm:$0xff] }
 0x452   :  { %4074 = vmatpush.bf16.msrb.mxu3 %v6290_v19  ;;  %v6286_v31 = vld [vmem:[#allocation4 + $0xd0] sm:$0xff]  ;;  %v6261_v30 = vld [vmem:[#allocation4 + $0x8] sm:$0xff]  ;;  %v6260_v59 = vld [vmem:[#allocation4] sm:$0xff] }
 0x453   :  { %4036 = vmatpush.bf16.msrb.mxu0 %v6265_v14  ;;  %v6269_v33 = vld [vmem:[#allocation4 + $0x48] sm:$0xff]  ;;  %v6268_v40 = vld [vmem:[#allocation4 + $0x40] sm:$0xff] }
 0x454   :  { %4049 = vmatpush.bf16.msrb.mxu1 %v6273_v32  ;;  %v6277_v39 = vld [vmem:[#allocation4 + $0x88] sm:$0xff]  ;;  %v6276_v18 = vld [vmem:[#allocation4 + $0x80] sm:$0xff] }
 0x455   :  { %4062 = vmatpush.bf16.msrb.mxu2 %v6281_v35  ;;  %v6285_v16 = vld [vmem:[#allocation4 + $0xc8] sm:$0xff]  ;;  %v6284_v20 = vld [vmem:[#allocation4 + $0xc0] sm:$0xff] }
 0x456   :  { %4075 = vmatpush.bf16.msrb.mxu3 %v6289_v57  ;;  %v6327_v21 = vld [vmem:[%s6901_s10] ss:$0 sm:$0xff] }
 0x457   :  { %4037 = vmatpush.bf16.msrb.mxu0 %v6264_v63 }
 0x458   :  { %4050 = vmatpush.bf16.msrb.mxu1 %v6272_v1 }
 0x459   :  { %4063 = vmatpush.bf16.msrb.mxu2 %v6280_v2 }
 0x45a   :  { %4076 = vmatpush.bf16.msrb.mxu3 %v6288_v3 }
 0x45b   :  { %4038 = vmatpush.bf16.msrb.mxu0 %v6263_v4 }
 0x45c   :  { %4051 = vmatpush.bf16.msrb.mxu1 %v6271_v6 }
 0x45d   :  { %4064 = vmatpush.bf16.msrb.mxu2 %v6279_v7 }
 0x45e   :  { %4077 = vmatpush.bf16.msrb.mxu3 %v6287_v8 }
 0x45f   :  { %4039 = vmatpush.bf16.msrb.mxu0 %v6262_v10 }
 0x460   :  { %4052 = vmatpush.bf16.msrb.mxu1 %v6270_v13 }
 0x461   :  { %4065 = vmatpush.bf16.msrb.mxu2 %v6278_v26 }
 0x462   :  { %4078 = vmatpush.bf16.msrb.mxu3 %v6286_v31 }
 0x463   :  { %4040 = vmatpush.bf16.msrb.mxu0 %v6261_v30 }
 0x464   :  { %4053 = vmatpush.bf16.msrb.mxu1 %v6269_v33 }
 0x465   :  { %4066 = vmatpush.bf16.msrb.mxu2 %v6277_v39 }
 0x466   :  { %4079 = vmatpush.bf16.msrb.mxu3 %v6285_v16 }
 0x467   :  { %4041 = vmatpush.bf16.msrb.mxu0 %v6260_v59 }
 0x468   :  { %4054 = vmatpush.bf16.msrb.mxu1 %v6268_v40 }
 0x469   :  { %4067 = vmatpush.bf16.msrb.mxu2 %v6276_v18 }
 0x46a   :  { %4080 = vmatpush.bf16.msrb.mxu3 %v6284_v20  ;;  %4042 = vmatmul.bf16.vlgmr.msrb.gmra.mxu0 %v6873_v54 }
 0x46b   :  { %4055 = vmatmul.bf16.vlgmr.msrb.gmra.mxu1 %v6875_v52 }
 0x46c   :  { %4068 = vmatmul.bf16.vlgmr.msrb.gmra.mxu2 %v6877_v62 }
 0x46d   :  { %4081 = vmatmul.bf16.vlgmr.msrb.gmra.mxu3 %v6879_v17 }
 0x4e7   :  { %v4043_v22 = vpop.f32.mrf.mxu0 }
 0x4e8   :  { %v4056_v23 = vpop.f32.mrf.mxu1  ;;  %v4044_v24 = vadd.f32 %v6327_v21, %v4043_v22 }
 0x4ea   :  { %v4057_v0 = vadd.f32 %v4056_v23, %v4044_v24 }
 0x4ef   :  { %v4069_v5 = vpop.f32.mrf.mxu2  ;;  %v4045_v28 = vpop.f32.mrf.mxu0 }
 0x4f0   :  { %v4082_v27 = vpop.f32.mrf.mxu3  ;;  %v4070_v25 = vadd.f32 %v4069_v5, %v4057_v0  ;;  %v4058_v55 = vpop.f32.mrf.mxu1 }
 0x4f2   :  { %v4083_v36 = vadd.f32 %v4082_v27, %v4070_v25 }
 0x4f4   :  { %4086 = vst [vmem:[#allocation11] sm:$0xff] %v4083_v36 }
 0x4f5   :  { %4097 = dma.vmem_to_hbm [thread:$0]  %s4093_s26, 128, %s4095_s29, [#allocation8]  }
 0x4f7   :  { %v4071_v37 = vpop.f32.mrf.mxu2 }
 0x4f8   :  { %v4084_v50 = vpop.f32.mrf.mxu3 }
 0x4f9   :  { %6482 = dma.done.wait [#allocation8], 128  }
 0x4fa   :  { %6483 = vsyncadd [#allocation8], 4294967168 }
 0x4fb   :  { %4102 = vsyncpa [#allocation7], 1 }
 0x4fc   :  { %4103 = vsyncpa [#allocation10], 1 }
 0x4fd   :  { %4104 = vsyncpa [#allocation8], 1 }
 0x4fe   :  { %4105 = vsyncmov [#allocation5] }
 0x501   :  { %s4106_s10 = vpop.sfrf %4105 }
 0x502   :  { %p5857_p0 = scmp.ne.s32.totalorder %s4106_s10, 0 }
 0x504   :  { %4110 = shalt.err (%p5857_p0)  }
 0x505   :  { %4112 = vsyncmov [#allocation5 + $0x1] }
 0x508   :  { %s4113_s14 = vpop.sfrf %4112 }
 0x509   :  { %p5858_p1 = scmp.ne.s32.totalorder %s4113_s14, 0 }
 0x50b   :  { %4117 = shalt.err (%p5858_p1)  }
 0x50c   :  { %4119 = vsyncmov [#allocation5 + $0x2] }
 0x50f   :  { %s4120_s30 = vpop.sfrf %4119 }
 0x510   :  { %p5859_p2 = scmp.ne.s32.totalorder %s4120_s30, 0 }
 0x512   :  { %4124 = shalt.err (%p5859_p2)  }

</bundles_post_ra>
